<compile_context>
chip_gen: v5e
topology: v5e:2x2
jax: 0.10.0
libtpu: 0.0.40
codegen_flags: <defaults>
</compile_context>

<pallas_src>
import numpy as np

import jax
import jax.numpy as jnp
from jax import lax
from jax.experimental import pallas as pl
from jax.experimental.pallas import tpu as pltpu


# --------------------------------------------------------------------------
# Helpers
# --------------------------------------------------------------------------
def conv2d_size_out(size, kernel_size=3, stride=2):
    return (size - (kernel_size - 1) - 1) // stride + 1


def _round_up(x, m):
    return ((x + m - 1) // m) * m


def im2col(x, k, stride):
    """x: [N, C, H, W] -> patches [N*OH*OW, C*k*k] (feature order: C, kh, kw)."""
    N, C, H, W = x.shape
    OH = (H - k) // stride + 1
    OW = (W - k) // stride + 1
    patches = []
    for dh in range(k):
        for dw in range(k):
            patches.append(
                x[:, :, dh:dh + stride * OH:stride, dw:dw + stride * OW:stride]
            )
    p = jnp.stack(patches, axis=2)          # [N, C, k*k, OH, OW]
    p = p.transpose(0, 3, 4, 1, 2)          # [N, OH, OW, C, k*k]
    return p.reshape(N * OH * OW, C * k * k), OH, OW


def _build_conv_index(n, ih, iw, oh, ow, out_pad, k, stride):
    """idx[t, m] = source column of the [C, N*ih*iw] activation feeding conv tap t at
    output column m (m = n*oh*ow + oh_*ow + ow_); -1 for padded output columns."""
    idx = np.full((k * k, out_pad), -1, np.int32)
    for dh in range(k):
        for dw in range(k):
            t = dh * k + dw
            for n_ in range(n):
                for oh_ in range(oh):
                    for ow_ in range(ow):
                        m = n_ * oh * ow + oh_ * ow + ow_
                        idx[t, m] = (n_ * ih * iw
                                     + (stride * oh_ + dh) * iw
                                     + (stride * ow_ + dw))
    return idx


def _build_head_index(n, s_spatial, n_pad):
    """idx[s, n_] = column of a3 holding (sample n_, spatial slot s); -1 for padding."""
    idx = np.full((s_spatial, n_pad), -1, np.int32)
    for s in range(s_spatial):
        for n_ in range(n):
            idx[s, n_] = n_ * s_spatial + s
    return idx


def _full_spec(shape):
    shape = tuple(int(d) for d in shape)
    nd = len(shape)

    def idx(i):
        return (0,) * nd

    return pl.BlockSpec(shape, idx)


# --------------------------------------------------------------------------
# Fused whole-network Pallas kernel
# --------------------------------------------------------------------------
def _dqn_fused_kernel(cols1_ref, w1_ref, s1_ref,
                      idx2_ref, w2_ref, s2_ref,
                      idx3_ref, w3_ref, s3_ref,
                      idxh_ref, wh_ref, bh_ref,
                      out_ref,
                      cols2_ref, cols3_ref, colsh_ref):
    f32, bf16 = jnp.float32, jnp.bfloat16

    def onehot(iota, idx_ref, t):
        # [src, dst] bf16 one-hot: (j, m) = 1 iff j == idx[t, m]; idx == -1 -> zero column.
        return jnp.where(iota == idx_ref[pl.ds(t, 1), :], 1.0, 0.0).astype(bf16)

    # ---- layer 1: conv1 (im2col'd in the wrapper) + folded bn1 + relu -> [C1, M1P]
    a1 = jnp.dot(w1_ref[...], cols1_ref[...], preferred_element_type=f32)
    a1 = jnp.maximum(a1 + s1_ref[...], 0.0).astype(bf16)
    C1, M1P = a1.shape

    # ---- layer 2: gather the 9 taps into a [9*C1, M2P] im2col scratch, ONE K=9*C1 matmul
    ntap, M2P = idx2_ref.shape
    iota12 = lax.broadcasted_iota(jnp.int32, (M1P, M2P), 0)
    for t in range(ntap):
        g = jnp.dot(a1, onehot(iota12, idx2_ref, t), preferred_element_type=f32)
        cols2_ref[pl.ds(t * C1, C1), :] = g.astype(bf16)
    a2 = jnp.dot(w2_ref[...], cols2_ref[...], preferred_element_type=f32)
    a2 = jnp.maximum(a2 + s2_ref[...], 0.0).astype(bf16)
    C2 = a2.shape[0]

    # ---- layer 3: same pattern, K = 9*C2 -> [C3, M3P]
    _, M3P = idx3_ref.shape
    iota23 = lax.broadcasted_iota(jnp.int32, (M2P, M3P), 0)
    for t in range(ntap):
        g = jnp.dot(a2, onehot(iota23, idx3_ref, t), preferred_element_type=f32)
        cols3_ref[pl.ds(t * C2, C2), :] = g.astype(bf16)
    a3 = jnp.dot(w3_ref[...], cols3_ref[...], preferred_element_type=f32)
    a3 = jnp.maximum(a3 + s3_ref[...], 0.0).astype(bf16)
    C3 = a3.shape[0]

    # ---- head: rearrange a3 columns into a [S3*C3, NP] feature matrix, ONE matmul
    S3, NP = idxh_ref.shape
    iota3h = lax.broadcasted_iota(jnp.int32, (M3P, NP), 0)
    for s in range(S3):
        g = jnp.dot(a3, onehot(iota3h, idxh_ref, s), preferred_element_type=f32)
        colsh_ref[pl.ds(s * C3, C3), :] = g.astype(bf16)
    out = jnp.dot(wh_ref[...], colsh_ref[...], preferred_element_type=f32)
    out_ref[...] = out + bh_ref[...]


# --------------------------------------------------------------------------
# One-time prep (BN fold, weight layout, index tables) + jitted forward
# --------------------------------------------------------------------------
def make_dqn_forward(params, x_shape, eps=1e-5):
    N, C_in, H, W = (int(d) for d in x_shape)
    k, stride = 3, 2
    bf16 = jnp.bfloat16

    w1 = params["layer1"][0]
    w2 = params["layer2"][0]
    w3 = params["layer3"][0]
    head_w, head_b = params["head_w"], params["head_b"]
    C1, C2, C3 = int(w1.shape[0]), int(w2.shape[0]), int(w3.shape[0])
    out_size = int(head_w.shape[0])

    OH1, OW1 = conv2d_size_out(H), conv2d_size_out(W)
    OH2, OW2 = conv2d_size_out(OH1), conv2d_size_out(OW1)
    OH3, OW3 = conv2d_size_out(OH2), conv2d_size_out(OW2)
    S3 = OH3 * OW3
    M1, M2, M3 = N * OH1 * OW1, N * OH2 * OW2, N * OH3 * OW3
    M1P, M2P, M3P = (_round_up(m, 128) for m in (M1, M2, M3))
    NP = _round_up(N, 128)
    K1 = C_in * k * k
    K1P = _round_up(K1, 16)            # bf16 sublane packing
    OUTP = _round_up(out_size, 8)

    # ---- fold eval-mode BN into per-output-channel (scale, shift)
    def fold(layer):
        w_, b_, gm, bt, mu, vr = layer
        s = gm / jnp.sqrt(vr + eps)
        return s, (b_ * s + bt - mu * s)

    s1v, sh1 = fold(params["layer1"])
    s2v, sh2 = fold(params["layer2"])
    s3v, sh3 = fold(params["layer3"])

    # ---- bf16 MXU weights (BN scale folded in); f32 shifts/bias for the epilogue
    w1m = jnp.pad(w1.reshape(C1, K1) * s1v[:, None],
                  ((0, 0), (0, K1P - K1))).astype(bf16)
    w2c = (w2 * s2v[:, None, None, None]).transpose(0, 2, 3, 1).reshape(C2, k * k * C1)
    w2c = w2c.astype(bf16)                                          # col = t*C1 + c1
    w3c = (w3 * s3v[:, None, None, None]).transpose(0, 2, 3, 1).reshape(C3, k * k * C2)
    w3c = w3c.astype(bf16)                                          # col = t*C2 + c2
    whc = head_w.reshape(out_size, C3, S3).transpose(0, 2, 1).reshape(out_size, S3 * C3)
    whc = jnp.pad(whc, ((0, OUTP - out_size), (0, 0))).astype(bf16)  # col = s*C3 + c3
    sh1c = sh1[:, None].astype(jnp.float32)
    sh2c = sh2[:, None].astype(jnp.float32)
    sh3c = sh3[:, None].astype(jnp.float32)
    bhc = jnp.pad(head_b, (0, OUTP - out_size))[:, None].astype(jnp.float32)

    # ---- tiny int32 gather tables (replace ~1.9 MiB of dense one-hot HBM constants)
    idx2 = jnp.asarray(_build_conv_index(N, OH1, OW1, OH2, OW2, M2P, k, stride))
    idx3 = jnp.asarray(_build_conv_index(N, OH2, OW2, OH3, OW3, M3P, k, stride))
    idxh = jnp.asarray(_build_head_index(N, S3, NP))

    flops = 2 * (C1 * K1P * M1P
                 + k * k * (C1 * M1P * M2P) + C2 * (k * k * C1) * M2P
                 + k * k * (C2 * M2P * M3P) + C3 * (k * k * C2) * M3P
                 + S3 * (C3 * M3P * NP) + OUTP * (S3 * C3) * NP)
    consts = (w1m, sh1c, idx2, w2c, sh2c, idx3, w3c, sh3c, idxh, whc, bhc)
    bytes_accessed = int(sum(int(np.prod(a.shape)) * a.dtype.itemsize for a in consts)
                         + K1P * M1P * 2 + OUTP * NP * 4)

    @jax.jit
    def forward(x):
        # per-call path: im2col of the network input + one pallas_call + slice
        cols1, _, _ = im2col(x, k, stride)                               # [M1, K1] f32
        cols1_t = jnp.pad(cols1.T, ((0, K1P - K1), (0, M1P - M1))).astype(bf16)
        inputs = (cols1_t, w1m, sh1c, idx2, w2c, sh2c, idx3, w3c, sh3c, idxh, whc, bhc)
        out_t = pl.pallas_call(
            _dqn_fused_kernel,
            out_shape=jax.ShapeDtypeStruct((OUTP, NP), jnp.float32),
            grid=(1,),
            in_specs=[_full_spec(a.shape) for a in inputs],
            out_specs=pl.BlockSpec((OUTP, NP), lambda i: (0, 0)),
            scratch_shapes=[pltpu.VMEM((k * k * C1, M2P), bf16),   # layer-2 im2col
                            pltpu.VMEM((k * k * C2, M3P), bf16),   # layer-3 im2col
                            pltpu.VMEM((S3 * C3, NP), bf16)],      # head features
            compiler_params=pltpu.CompilerParams(
                dimension_semantics=("arbitrary",)),
            cost_estimate=pl.CostEstimate(flops=int(flops), transcendentals=0,
                                          bytes_accessed=bytes_accessed),
        )(*inputs)
        return out_t[:out_size, :N].T                                   # [N, out_size]

    return forward


# --------------------------------------------------------------------------
# Pure-JAX reference (lax.conv, f32) for correctness checking
# --------------------------------------------------------------------------
def _ref_conv_bn_relu(x, w, b, gamma, beta, mean, var, eps=1e-5):
    y = lax.conv_general_dilated(
        x, w, window_strides=(2, 2), padding="VALID",
        dimension_numbers=("NCHW", "OIHW", "NCHW"),
    ) + b[None, :, None, None]
    y = gamma[None, :, None, None] * (y - mean[None, :, None, None]) / jnp.sqrt(
        var[None, :, None, None] + eps
    ) + beta[None, :, None, None]
    return jnp.maximum(y, 0.0)


def dqn_forward_ref(x, params):
    x = _ref_conv_bn_relu(x, *params["layer1"])
    x = _ref_conv_bn_relu(x, *params["layer2"])
    x = _ref_conv_bn_relu(x, *params["layer3"])
    x_flat = x.reshape(x.shape[0], -1)
    return x_flat @ params["head_w"].T + params["head_b"][None, :]


# --------------------------------------------------------------------------
# Deterministic parameter init + main
# --------------------------------------------------------------------------
def init_params(key, h, w, output_size):
    def conv_bn(key, c_in, c_out):
        ks = jax.random.split(key, 6)
        wt = jax.random.normal(ks[0], (c_out, c_in, 3, 3), jnp.float32) * 0.1
        b = jax.random.normal(ks[1], (c_out,), jnp.float32) * 0.1
        gamma = 1.0 + 0.1 * jax.random.normal(ks[2], (c_out,), jnp.float32)
        beta = 0.1 * jax.random.normal(ks[3], (c_out,), jnp.float32)
        mean = 0.1 * jax.random.normal(ks[4], (c_out,), jnp.float32)
        var = 0.5 + jax.random.uniform(ks[5], (c_out,), jnp.float32)
        return (wt, b, gamma, beta, mean, var)

    k1, k2, k3, k4 = jax.random.split(key, 4)
    conv_w_out = conv2d_size_out(conv2d_size_out(conv2d_size_out(w)))
    conv_h_out = conv2d_size_out(conv2d_size_out(conv2d_size_out(h)))
    linear_in = conv_w_out * conv_h_out * 64
    kw, kb = jax.random.split(k4)
    return {
        "layer1": conv_bn(k1, 3, 32),
        "layer2": conv_bn(k2, 32, 64),
        "layer3": conv_bn(k3, 64, 64),
        "head_w": jax.random.normal(kw, (output_size, linear_in), jnp.float32) * 0.05,
        "head_b": jax.random.normal(kb, (output_size,), jnp.float32) * 0.05,
    }


if __name__ == "__main__":
    batch, H, W, output_size = 2, 24, 24, 2   # input_size = (H, W), 3 channels

    key = jax.random.PRNGKey(0)
    k_x, k_p = jax.random.split(key)
    x = jax.random.normal(k_x, (batch, 3, H, W), jnp.float32)   # NCHW like PyTorch
    params = init_params(k_p, H, W, output_size)

    forward = make_dqn_forward(params, x.shape)   # one-time prep (review item 7)
    out = jax.block_until_ready(forward(x))
    ref = jax.block_until_ready(dqn_forward_ref(x, params))

    assert out.shape == (batch, output_size), out.shape
    # bf16 MXU operands (per perf review) -> looser tolerance vs. the pure-f32 reference.
    assert jnp.allclose(out, ref, rtol=5e-2, atol=5e-2), (out, ref)
    print("KERNEL_OK")
</pallas_src>

<mosaic_0001>
module attributes {stable_mosaic.version = 11 : i64} {
  func.func @_dqn_fused_kernel(%arg0: i32, %arg1: memref<32x256xbf16, #tpu.memory_space<vmem>>, %arg2: memref<32x32xbf16, #tpu.memory_space<vmem>>, %arg3: memref<32x1xf32, #tpu.memory_space<vmem>>, %arg4: memref<9x128xi32, #tpu.memory_space<vmem>>, %arg5: memref<64x288xbf16, #tpu.memory_space<vmem>>, %arg6: memref<64x1xf32, #tpu.memory_space<vmem>>, %arg7: memref<9x128xi32, #tpu.memory_space<vmem>>, %arg8: memref<64x576xbf16, #tpu.memory_space<vmem>>, %arg9: memref<64x1xf32, #tpu.memory_space<vmem>>, %arg10: memref<4x128xi32, #tpu.memory_space<vmem>>, %arg11: memref<8x256xbf16, #tpu.memory_space<vmem>>, %arg12: memref<8x1xf32, #tpu.memory_space<vmem>>, %arg13: memref<8x128xf32, #tpu.memory_space<vmem>>, %arg14: memref<288x128xbf16, #tpu.memory_space<vmem>>, %arg15: memref<576x128xbf16, #tpu.memory_space<vmem>>, %arg16: memref<256x128xbf16, #tpu.memory_space<vmem>>) attributes {dimension_semantics = [#tpu.dimension_semantics<arbitrary>], iteration_bounds = array<i64: 1>, scalar_prefetch = 0 : i64, scratch_operands = 3 : i64, tpu.core_type = #tpu.core_type<tc>, window_params = [{pipeline_mode = #tpu.pipeline_mode<synchronous>, transform_indices = @transform_0, window_bounds = array<i64: 32, 256>}, {pipeline_mode = #tpu.pipeline_mode<synchronous>, transform_indices = @transform_1, window_bounds = array<i64: 32, 32>}, {pipeline_mode = #tpu.pipeline_mode<synchronous>, transform_indices = @transform_2, window_bounds = array<i64: 32, 1>}, {pipeline_mode = #tpu.pipeline_mode<synchronous>, transform_indices = @transform_3, window_bounds = array<i64: 9, 128>}, {pipeline_mode = #tpu.pipeline_mode<synchronous>, transform_indices = @transform_4, window_bounds = array<i64: 64, 288>}, {pipeline_mode = #tpu.pipeline_mode<synchronous>, transform_indices = @transform_5, window_bounds = array<i64: 64, 1>}, {pipeline_mode = #tpu.pipeline_mode<synchronous>, transform_indices = @transform_6, window_bounds = array<i64: 9, 128>}, {pipeline_mode = #tpu.pipeline_mode<synchronous>, transform_indices = @transform_7, window_bounds = array<i64: 64, 576>}, {pipeline_mode = #tpu.pipeline_mode<synchronous>, transform_indices = @transform_8, window_bounds = array<i64: 64, 1>}, {pipeline_mode = #tpu.pipeline_mode<synchronous>, transform_indices = @transform_9, window_bounds = array<i64: 4, 128>}, {pipeline_mode = #tpu.pipeline_mode<synchronous>, transform_indices = @transform_10, window_bounds = array<i64: 8, 256>}, {pipeline_mode = #tpu.pipeline_mode<synchronous>, transform_indices = @transform_11, window_bounds = array<i64: 8, 1>}, {pipeline_mode = #tpu.pipeline_mode<synchronous>, transform_indices = @transform_12, window_bounds = array<i64: 8, 128>}]} {
    %c0 = arith.constant 0 : index
    %c0_0 = arith.constant 0 : index
    %0 = vector.load %arg2[%c0, %c0_0] : memref<32x32xbf16, #tpu.memory_space<vmem>>, vector<32x32xbf16>
    %c0_1 = arith.constant 0 : index
    %c0_2 = arith.constant 0 : index
    %1 = vector.load %arg1[%c0_1, %c0_2] : memref<32x256xbf16, #tpu.memory_space<vmem>>, vector<32x256xbf16>
    %cst = arith.constant dense<0.000000e+00> : vector<32x256xf32>
    %2 = tpu.matmul %0, %1, %cst {dimension_numbers = #tpu.dot_dimension_numbers<[1], [0], [0], [1], [0, 0, 1, 1], [], []>} : vector<32x32xbf16>, vector<32x256xbf16>, vector<32x256xf32> -> vector<32x256xf32>
    %c0_3 = arith.constant 0 : index
    %c0_4 = arith.constant 0 : index
    %3 = vector.load %arg3[%c0_3, %c0_4] : memref<32x1xf32, #tpu.memory_space<vmem>>, vector<32x1xf32>
    %4 = vector.broadcast %3 : vector<32x1xf32> to vector<32x256xf32>
    %5 = arith.addf %2, %4 : vector<32x256xf32>
    %cst_5 = arith.constant 0.000000e+00 : f32
    %6 = vector.broadcast %cst_5 : f32 to vector<32x256xf32>
    %7 = arith.maximumf %5, %6 : vector<32x256xf32>
    %8 = arith.truncf %7 : vector<32x256xf32> to vector<32x256xbf16>
    %9 = tpu.iota {dimensions = array<i32: 0>} : vector<256x128xi32>
    %c0_6 = arith.constant 0 : index
    %c0_7 = arith.constant 0 : index
    %10 = vector.load %arg4[%c0_6, %c0_7] : memref<9x128xi32, #tpu.memory_space<vmem>>, vector<1x128xi32>
    %11 = vector.broadcast %10 : vector<1x128xi32> to vector<256x128xi32>
    %12 = arith.cmpi eq, %9, %11 : vector<256x128xi32>
    %cst_8 = arith.constant 1.000000e+00 : f32
    %cst_9 = arith.constant 0.000000e+00 : f32
    %13 = vector.broadcast %cst_8 : f32 to vector<256x128xf32>
    %14 = vector.broadcast %cst_9 : f32 to vector<256x128xf32>
    %15 = arith.select %12, %13, %14 : vector<256x128xi1>, vector<256x128xf32>
    %16 = arith.truncf %15 : vector<256x128xf32> to vector<256x128xbf16>
    %cst_10 = arith.constant dense<0.000000e+00> : vector<32x128xf32>
    %17 = tpu.matmul %8, %16, %cst_10 {dimension_numbers = #tpu.dot_dimension_numbers<[1], [0], [0], [1], [0, 0, 1, 1], [], []>} : vector<32x256xbf16>, vector<256x128xbf16>, vector<32x128xf32> -> vector<32x128xf32>
    %18 = arith.truncf %17 : vector<32x128xf32> to vector<32x128xbf16>
    %c0_11 = arith.constant 0 : index
    %c0_12 = arith.constant 0 : index
    %19 = vector.load %arg14[%c0_11, %c0_12] : memref<288x128xbf16, #tpu.memory_space<vmem>>, vector<32x128xbf16>
    tpu.vector_store %arg14[%c0_11, %c0_12], %18 {strides = array<i32>} : memref<288x128xbf16, #tpu.memory_space<vmem>>, vector<32x128xbf16>,
    %c1 = arith.constant 1 : index
    %c0_13 = arith.constant 0 : index
    %20 = vector.load %arg4[%c1, %c0_13] : memref<9x128xi32, #tpu.memory_space<vmem>>, vector<1x128xi32>
    %21 = vector.broadcast %20 : vector<1x128xi32> to vector<256x128xi32>
    %22 = arith.cmpi eq, %9, %21 : vector<256x128xi32>
    %cst_14 = arith.constant 1.000000e+00 : f32
    %cst_15 = arith.constant 0.000000e+00 : f32
    %23 = vector.broadcast %cst_14 : f32 to vector<256x128xf32>
    %24 = vector.broadcast %cst_15 : f32 to vector<256x128xf32>
    %25 = arith.select %22, %23, %24 : vector<256x128xi1>, vector<256x128xf32>
    %26 = arith.truncf %25 : vector<256x128xf32> to vector<256x128xbf16>
    %cst_16 = arith.constant dense<0.000000e+00> : vector<32x128xf32>
    %27 = tpu.matmul %8, %26, %cst_16 {dimension_numbers = #tpu.dot_dimension_numbers<[1], [0], [0], [1], [0, 0, 1, 1], [], []>} : vector<32x256xbf16>, vector<256x128xbf16>, vector<32x128xf32> -> vector<32x128xf32>
    %28 = arith.truncf %27 : vector<32x128xf32> to vector<32x128xbf16>
    %c32 = arith.constant 32 : index
    %c0_17 = arith.constant 0 : index
    %29 = vector.load %arg14[%c32, %c0_17] : memref<288x128xbf16, #tpu.memory_space<vmem>>, vector<32x128xbf16>
    tpu.vector_store %arg14[%c32, %c0_17], %28 {strides = array<i32>} : memref<288x128xbf16, #tpu.memory_space<vmem>>, vector<32x128xbf16>,
    %c2 = arith.constant 2 : index
    %c0_18 = arith.constant 0 : index
    %30 = vector.load %arg4[%c2, %c0_18] : memref<9x128xi32, #tpu.memory_space<vmem>>, vector<1x128xi32>
    %31 = vector.broadcast %30 : vector<1x128xi32> to vector<256x128xi32>
    %32 = arith.cmpi eq, %9, %31 : vector<256x128xi32>
    %cst_19 = arith.constant 1.000000e+00 : f32
    %cst_20 = arith.constant 0.000000e+00 : f32
    %33 = vector.broadcast %cst_19 : f32 to vector<256x128xf32>
    %34 = vector.broadcast %cst_20 : f32 to vector<256x128xf32>
    %35 = arith.select %32, %33, %34 : vector<256x128xi1>, vector<256x128xf32>
    %36 = arith.truncf %35 : vector<256x128xf32> to vector<256x128xbf16>
    %cst_21 = arith.constant dense<0.000000e+00> : vector<32x128xf32>
    %37 = tpu.matmul %8, %36, %cst_21 {dimension_numbers = #tpu.dot_dimension_numbers<[1], [0], [0], [1], [0, 0, 1, 1], [], []>} : vector<32x256xbf16>, vector<256x128xbf16>, vector<32x128xf32> -> vector<32x128xf32>
    %38 = arith.truncf %37 : vector<32x128xf32> to vector<32x128xbf16>
    %c64 = arith.constant 64 : index
    %c0_22 = arith.constant 0 : index
    %39 = vector.load %arg14[%c64, %c0_22] : memref<288x128xbf16, #tpu.memory_space<vmem>>, vector<32x128xbf16>
    tpu.vector_store %arg14[%c64, %c0_22], %38 {strides = array<i32>} : memref<288x128xbf16, #tpu.memory_space<vmem>>, vector<32x128xbf16>,
    %c3 = arith.constant 3 : index
    %c0_23 = arith.constant 0 : index
    %40 = vector.load %arg4[%c3, %c0_23] : memref<9x128xi32, #tpu.memory_space<vmem>>, vector<1x128xi32>
    %41 = vector.broadcast %40 : vector<1x128xi32> to vector<256x128xi32>
    %42 = arith.cmpi eq, %9, %41 : vector<256x128xi32>
    %cst_24 = arith.constant 1.000000e+00 : f32
    %cst_25 = arith.constant 0.000000e+00 : f32
    %43 = vector.broadcast %cst_24 : f32 to vector<256x128xf32>
    %44 = vector.broadcast %cst_25 : f32 to vector<256x128xf32>
    %45 = arith.select %42, %43, %44 : vector<256x128xi1>, vector<256x128xf32>
    %46 = arith.truncf %45 : vector<256x128xf32> to vector<256x128xbf16>
    %cst_26 = arith.constant dense<0.000000e+00> : vector<32x128xf32>
    %47 = tpu.matmul %8, %46, %cst_26 {dimension_numbers = #tpu.dot_dimension_numbers<[1], [0], [0], [1], [0, 0, 1, 1], [], []>} : vector<32x256xbf16>, vector<256x128xbf16>, vector<32x128xf32> -> vector<32x128xf32>
    %48 = arith.truncf %47 : vector<32x128xf32> to vector<32x128xbf16>
    %c96 = arith.constant 96 : index
    %c0_27 = arith.constant 0 : index
    %49 = vector.load %arg14[%c96, %c0_27] : memref<288x128xbf16, #tpu.memory_space<vmem>>, vector<32x128xbf16>
    tpu.vector_store %arg14[%c96, %c0_27], %48 {strides = array<i32>} : memref<288x128xbf16, #tpu.memory_space<vmem>>, vector<32x128xbf16>,
    %c4 = arith.constant 4 : index
    %c0_28 = arith.constant 0 : index
    %50 = vector.load %arg4[%c4, %c0_28] : memref<9x128xi32, #tpu.memory_space<vmem>>, vector<1x128xi32>
    %51 = vector.broadcast %50 : vector<1x128xi32> to vector<256x128xi32>
    %52 = arith.cmpi eq, %9, %51 : vector<256x128xi32>
    %cst_29 = arith.constant 1.000000e+00 : f32
    %cst_30 = arith.constant 0.000000e+00 : f32
    %53 = vector.broadcast %cst_29 : f32 to vector<256x128xf32>
    %54 = vector.broadcast %cst_30 : f32 to vector<256x128xf32>
    %55 = arith.select %52, %53, %54 : vector<256x128xi1>, vector<256x128xf32>
    %56 = arith.truncf %55 : vector<256x128xf32> to vector<256x128xbf16>
    %cst_31 = arith.constant dense<0.000000e+00> : vector<32x128xf32>
    %57 = tpu.matmul %8, %56, %cst_31 {dimension_numbers = #tpu.dot_dimension_numbers<[1], [0], [0], [1], [0, 0, 1, 1], [], []>} : vector<32x256xbf16>, vector<256x128xbf16>, vector<32x128xf32> -> vector<32x128xf32>
    %58 = arith.truncf %57 : vector<32x128xf32> to vector<32x128xbf16>
    %c128 = arith.constant 128 : index
    %c0_32 = arith.constant 0 : index
    %59 = vector.load %arg14[%c128, %c0_32] : memref<288x128xbf16, #tpu.memory_space<vmem>>, vector<32x128xbf16>
    tpu.vector_store %arg14[%c128, %c0_32], %58 {strides = array<i32>} : memref<288x128xbf16, #tpu.memory_space<vmem>>, vector<32x128xbf16>,
    %c5 = arith.constant 5 : index
    %c0_33 = arith.constant 0 : index
    %60 = vector.load %arg4[%c5, %c0_33] : memref<9x128xi32, #tpu.memory_space<vmem>>, vector<1x128xi32>
    %61 = vector.broadcast %60 : vector<1x128xi32> to vector<256x128xi32>
    %62 = arith.cmpi eq, %9, %61 : vector<256x128xi32>
    %cst_34 = arith.constant 1.000000e+00 : f32
    %cst_35 = arith.constant 0.000000e+00 : f32
    %63 = vector.broadcast %cst_34 : f32 to vector<256x128xf32>
    %64 = vector.broadcast %cst_35 : f32 to vector<256x128xf32>
    %65 = arith.select %62, %63, %64 : vector<256x128xi1>, vector<256x128xf32>
    %66 = arith.truncf %65 : vector<256x128xf32> to vector<256x128xbf16>
    %cst_36 = arith.constant dense<0.000000e+00> : vector<32x128xf32>
    %67 = tpu.matmul %8, %66, %cst_36 {dimension_numbers = #tpu.dot_dimension_numbers<[1], [0], [0], [1], [0, 0, 1, 1], [], []>} : vector<32x256xbf16>, vector<256x128xbf16>, vector<32x128xf32> -> vector<32x128xf32>
    %68 = arith.truncf %67 : vector<32x128xf32> to vector<32x128xbf16>
    %c160 = arith.constant 160 : index
    %c0_37 = arith.constant 0 : index
    %69 = vector.load %arg14[%c160, %c0_37] : memref<288x128xbf16, #tpu.memory_space<vmem>>, vector<32x128xbf16>
    tpu.vector_store %arg14[%c160, %c0_37], %68 {strides = array<i32>} : memref<288x128xbf16, #tpu.memory_space<vmem>>, vector<32x128xbf16>,
    %c6 = arith.constant 6 : index
    %c0_38 = arith.constant 0 : index
    %70 = vector.load %arg4[%c6, %c0_38] : memref<9x128xi32, #tpu.memory_space<vmem>>, vector<1x128xi32>
    %71 = vector.broadcast %70 : vector<1x128xi32> to vector<256x128xi32>
    %72 = arith.cmpi eq, %9, %71 : vector<256x128xi32>
    %cst_39 = arith.constant 1.000000e+00 : f32
    %cst_40 = arith.constant 0.000000e+00 : f32
    %73 = vector.broadcast %cst_39 : f32 to vector<256x128xf32>
    %74 = vector.broadcast %cst_40 : f32 to vector<256x128xf32>
    %75 = arith.select %72, %73, %74 : vector<256x128xi1>, vector<256x128xf32>
    %76 = arith.truncf %75 : vector<256x128xf32> to vector<256x128xbf16>
    %cst_41 = arith.constant dense<0.000000e+00> : vector<32x128xf32>
    %77 = tpu.matmul %8, %76, %cst_41 {dimension_numbers = #tpu.dot_dimension_numbers<[1], [0], [0], [1], [0, 0, 1, 1], [], []>} : vector<32x256xbf16>, vector<256x128xbf16>, vector<32x128xf32> -> vector<32x128xf32>
    %78 = arith.truncf %77 : vector<32x128xf32> to vector<32x128xbf16>
    %c192 = arith.constant 192 : index
    %c0_42 = arith.constant 0 : index
    %79 = vector.load %arg14[%c192, %c0_42] : memref<288x128xbf16, #tpu.memory_space<vmem>>, vector<32x128xbf16>
    tpu.vector_store %arg14[%c192, %c0_42], %78 {strides = array<i32>} : memref<288x128xbf16, #tpu.memory_space<vmem>>, vector<32x128xbf16>,
    %c7 = arith.constant 7 : index
    %c0_43 = arith.constant 0 : index
    %80 = vector.load %arg4[%c7, %c0_43] : memref<9x128xi32, #tpu.memory_space<vmem>>, vector<1x128xi32>
    %81 = vector.broadcast %80 : vector<1x128xi32> to vector<256x128xi32>
    %82 = arith.cmpi eq, %9, %81 : vector<256x128xi32>
    %cst_44 = arith.constant 1.000000e+00 : f32
    %cst_45 = arith.constant 0.000000e+00 : f32
    %83 = vector.broadcast %cst_44 : f32 to vector<256x128xf32>
    %84 = vector.broadcast %cst_45 : f32 to vector<256x128xf32>
    %85 = arith.select %82, %83, %84 : vector<256x128xi1>, vector<256x128xf32>
    %86 = arith.truncf %85 : vector<256x128xf32> to vector<256x128xbf16>
    %cst_46 = arith.constant dense<0.000000e+00> : vector<32x128xf32>
    %87 = tpu.matmul %8, %86, %cst_46 {dimension_numbers = #tpu.dot_dimension_numbers<[1], [0], [0], [1], [0, 0, 1, 1], [], []>} : vector<32x256xbf16>, vector<256x128xbf16>, vector<32x128xf32> -> vector<32x128xf32>
    %88 = arith.truncf %87 : vector<32x128xf32> to vector<32x128xbf16>
    %c224 = arith.constant 224 : index
    %c0_47 = arith.constant 0 : index
    %89 = vector.load %arg14[%c224, %c0_47] : memref<288x128xbf16, #tpu.memory_space<vmem>>, vector<32x128xbf16>
    tpu.vector_store %arg14[%c224, %c0_47], %88 {strides = array<i32>} : memref<288x128xbf16, #tpu.memory_space<vmem>>, vector<32x128xbf16>,
    %c8 = arith.constant 8 : index
    %c0_48 = arith.constant 0 : index
    %90 = vector.load %arg4[%c8, %c0_48] : memref<9x128xi32, #tpu.memory_space<vmem>>, vector<1x128xi32>
    %91 = vector.broadcast %90 : vector<1x128xi32> to vector<256x128xi32>
    %92 = arith.cmpi eq, %9, %91 : vector<256x128xi32>
    %cst_49 = arith.constant 1.000000e+00 : f32
    %cst_50 = arith.constant 0.000000e+00 : f32
    %93 = vector.broadcast %cst_49 : f32 to vector<256x128xf32>
    %94 = vector.broadcast %cst_50 : f32 to vector<256x128xf32>
    %95 = arith.select %92, %93, %94 : vector<256x128xi1>, vector<256x128xf32>
    %96 = arith.truncf %95 : vector<256x128xf32> to vector<256x128xbf16>
    %cst_51 = arith.constant dense<0.000000e+00> : vector<32x128xf32>
    %97 = tpu.matmul %8, %96, %cst_51 {dimension_numbers = #tpu.dot_dimension_numbers<[1], [0], [0], [1], [0, 0, 1, 1], [], []>} : vector<32x256xbf16>, vector<256x128xbf16>, vector<32x128xf32> -> vector<32x128xf32>
    %98 = arith.truncf %97 : vector<32x128xf32> to vector<32x128xbf16>
    %c256 = arith.constant 256 : index
    %c0_52 = arith.constant 0 : index
    %99 = vector.load %arg14[%c256, %c0_52] : memref<288x128xbf16, #tpu.memory_space<vmem>>, vector<32x128xbf16>
    tpu.vector_store %arg14[%c256, %c0_52], %98 {strides = array<i32>} : memref<288x128xbf16, #tpu.memory_space<vmem>>, vector<32x128xbf16>,
    %c0_53 = arith.constant 0 : index
    %c0_54 = arith.constant 0 : index
    %100 = vector.load %arg5[%c0_53, %c0_54] : memref<64x288xbf16, #tpu.memory_space<vmem>>, vector<64x288xbf16>
    %c0_55 = arith.constant 0 : index
    %c0_56 = arith.constant 0 : index
    %101 = vector.load %arg14[%c0_55, %c0_56] : memref<288x128xbf16, #tpu.memory_space<vmem>>, vector<288x128xbf16>
    %cst_57 = arith.constant dense<0.000000e+00> : vector<64x128xf32>
    %102 = tpu.matmul %100, %101, %cst_57 {dimension_numbers = #tpu.dot_dimension_numbers<[1], [0], [0], [1], [0, 0, 1, 1], [], []>} : vector<64x288xbf16>, vector<288x128xbf16>, vector<64x128xf32> -> vector<64x128xf32>
    %c0_58 = arith.constant 0 : index
    %c0_59 = arith.constant 0 : index
    %103 = vector.load %arg6[%c0_58, %c0_59] : memref<64x1xf32, #tpu.memory_space<vmem>>, vector<64x1xf32>
    %104 = vector.broadcast %103 : vector<64x1xf32> to vector<64x128xf32>
    %105 = arith.addf %102, %104 : vector<64x128xf32>
    %cst_60 = arith.constant 0.000000e+00 : f32
    %106 = vector.broadcast %cst_60 : f32 to vector<64x128xf32>
    %107 = arith.maximumf %105, %106 : vector<64x128xf32>
    %108 = arith.truncf %107 : vector<64x128xf32> to vector<64x128xbf16>
    %109 = tpu.iota {dimensions = array<i32: 0>} : vector<128x128xi32>
    %c0_61 = arith.constant 0 : index
    %c0_62 = arith.constant 0 : index
    %110 = vector.load %arg7[%c0_61, %c0_62] : memref<9x128xi32, #tpu.memory_space<vmem>>, vector<1x128xi32>
    %111 = vector.broadcast %110 : vector<1x128xi32> to vector<128x128xi32>
    %112 = arith.cmpi eq, %109, %111 : vector<128x128xi32>
    %cst_63 = arith.constant 1.000000e+00 : f32
    %cst_64 = arith.constant 0.000000e+00 : f32
    %113 = vector.broadcast %cst_63 : f32 to vector<128x128xf32>
    %114 = vector.broadcast %cst_64 : f32 to vector<128x128xf32>
    %115 = arith.select %112, %113, %114 : vector<128x128xi1>, vector<128x128xf32>
    %116 = arith.truncf %115 : vector<128x128xf32> to vector<128x128xbf16>
    %cst_65 = arith.constant dense<0.000000e+00> : vector<64x128xf32>
    %117 = tpu.matmul %108, %116, %cst_65 {dimension_numbers = #tpu.dot_dimension_numbers<[1], [0], [0], [1], [0, 0, 1, 1], [], []>} : vector<64x128xbf16>, vector<128x128xbf16>, vector<64x128xf32> -> vector<64x128xf32>
    %118 = arith.truncf %117 : vector<64x128xf32> to vector<64x128xbf16>
    %c0_66 = arith.constant 0 : index
    %c0_67 = arith.constant 0 : index
    %119 = vector.load %arg15[%c0_66, %c0_67] : memref<576x128xbf16, #tpu.memory_space<vmem>>, vector<64x128xbf16>
    tpu.vector_store %arg15[%c0_66, %c0_67], %118 {strides = array<i32>} : memref<576x128xbf16, #tpu.memory_space<vmem>>, vector<64x128xbf16>,
    %c1_68 = arith.constant 1 : index
    %c0_69 = arith.constant 0 : index
    %120 = vector.load %arg7[%c1_68, %c0_69] : memref<9x128xi32, #tpu.memory_space<vmem>>, vector<1x128xi32>
    %121 = vector.broadcast %120 : vector<1x128xi32> to vector<128x128xi32>
    %122 = arith.cmpi eq, %109, %121 : vector<128x128xi32>
    %cst_70 = arith.constant 1.000000e+00 : f32
    %cst_71 = arith.constant 0.000000e+00 : f32
    %123 = vector.broadcast %cst_70 : f32 to vector<128x128xf32>
    %124 = vector.broadcast %cst_71 : f32 to vector<128x128xf32>
    %125 = arith.select %122, %123, %124 : vector<128x128xi1>, vector<128x128xf32>
    %126 = arith.truncf %125 : vector<128x128xf32> to vector<128x128xbf16>
    %cst_72 = arith.constant dense<0.000000e+00> : vector<64x128xf32>
    %127 = tpu.matmul %108, %126, %cst_72 {dimension_numbers = #tpu.dot_dimension_numbers<[1], [0], [0], [1], [0, 0, 1, 1], [], []>} : vector<64x128xbf16>, vector<128x128xbf16>, vector<64x128xf32> -> vector<64x128xf32>
    %128 = arith.truncf %127 : vector<64x128xf32> to vector<64x128xbf16>
    %c64_73 = arith.constant 64 : index
    %c0_74 = arith.constant 0 : index
    %129 = vector.load %arg15[%c64_73, %c0_74] : memref<576x128xbf16, #tpu.memory_space<vmem>>, vector<64x128xbf16>
    tpu.vector_store %arg15[%c64_73, %c0_74], %128 {strides = array<i32>} : memref<576x128xbf16, #tpu.memory_space<vmem>>, vector<64x128xbf16>,
    %c2_75 = arith.constant 2 : index
    %c0_76 = arith.constant 0 : index
    %130 = vector.load %arg7[%c2_75, %c0_76] : memref<9x128xi32, #tpu.memory_space<vmem>>, vector<1x128xi32>
    %131 = vector.broadcast %130 : vector<1x128xi32> to vector<128x128xi32>
    %132 = arith.cmpi eq, %109, %131 : vector<128x128xi32>
    %cst_77 = arith.constant 1.000000e+00 : f32
    %cst_78 = arith.constant 0.000000e+00 : f32
    %133 = vector.broadcast %cst_77 : f32 to vector<128x128xf32>
    %134 = vector.broadcast %cst_78 : f32 to vector<128x128xf32>
    %135 = arith.select %132, %133, %134 : vector<128x128xi1>, vector<128x128xf32>
    %136 = arith.truncf %135 : vector<128x128xf32> to vector<128x128xbf16>
    %cst_79 = arith.constant dense<0.000000e+00> : vector<64x128xf32>
    %137 = tpu.matmul %108, %136, %cst_79 {dimension_numbers = #tpu.dot_dimension_numbers<[1], [0], [0], [1], [0, 0, 1, 1], [], []>} : vector<64x128xbf16>, vector<128x128xbf16>, vector<64x128xf32> -> vector<64x128xf32>
    %138 = arith.truncf %137 : vector<64x128xf32> to vector<64x128xbf16>
    %c128_80 = arith.constant 128 : index
    %c0_81 = arith.constant 0 : index
    %139 = vector.load %arg15[%c128_80, %c0_81] : memref<576x128xbf16, #tpu.memory_space<vmem>>, vector<64x128xbf16>
    tpu.vector_store %arg15[%c128_80, %c0_81], %138 {strides = array<i32>} : memref<576x128xbf16, #tpu.memory_space<vmem>>, vector<64x128xbf16>,
    %c3_82 = arith.constant 3 : index
    %c0_83 = arith.constant 0 : index
    %140 = vector.load %arg7[%c3_82, %c0_83] : memref<9x128xi32, #tpu.memory_space<vmem>>, vector<1x128xi32>
    %141 = vector.broadcast %140 : vector<1x128xi32> to vector<128x128xi32>
    %142 = arith.cmpi eq, %109, %141 : vector<128x128xi32>
    %cst_84 = arith.constant 1.000000e+00 : f32
    %cst_85 = arith.constant 0.000000e+00 : f32
    %143 = vector.broadcast %cst_84 : f32 to vector<128x128xf32>
    %144 = vector.broadcast %cst_85 : f32 to vector<128x128xf32>
    %145 = arith.select %142, %143, %144 : vector<128x128xi1>, vector<128x128xf32>
    %146 = arith.truncf %145 : vector<128x128xf32> to vector<128x128xbf16>
    %cst_86 = arith.constant dense<0.000000e+00> : vector<64x128xf32>
    %147 = tpu.matmul %108, %146, %cst_86 {dimension_numbers = #tpu.dot_dimension_numbers<[1], [0], [0], [1], [0, 0, 1, 1], [], []>} : vector<64x128xbf16>, vector<128x128xbf16>, vector<64x128xf32> -> vector<64x128xf32>
    %148 = arith.truncf %147 : vector<64x128xf32> to vector<64x128xbf16>
    %c192_87 = arith.constant 192 : index
    %c0_88 = arith.constant 0 : index
    %149 = vector.load %arg15[%c192_87, %c0_88] : memref<576x128xbf16, #tpu.memory_space<vmem>>, vector<64x128xbf16>
    tpu.vector_store %arg15[%c192_87, %c0_88], %148 {strides = array<i32>} : memref<576x128xbf16, #tpu.memory_space<vmem>>, vector<64x128xbf16>,
    %c4_89 = arith.constant 4 : index
    %c0_90 = arith.constant 0 : index
    %150 = vector.load %arg7[%c4_89, %c0_90] : memref<9x128xi32, #tpu.memory_space<vmem>>, vector<1x128xi32>
    %151 = vector.broadcast %150 : vector<1x128xi32> to vector<128x128xi32>
    %152 = arith.cmpi eq, %109, %151 : vector<128x128xi32>
    %cst_91 = arith.constant 1.000000e+00 : f32
    %cst_92 = arith.constant 0.000000e+00 : f32
    %153 = vector.broadcast %cst_91 : f32 to vector<128x128xf32>
    %154 = vector.broadcast %cst_92 : f32 to vector<128x128xf32>
    %155 = arith.select %152, %153, %154 : vector<128x128xi1>, vector<128x128xf32>
    %156 = arith.truncf %155 : vector<128x128xf32> to vector<128x128xbf16>
    %cst_93 = arith.constant dense<0.000000e+00> : vector<64x128xf32>
    %157 = tpu.matmul %108, %156, %cst_93 {dimension_numbers = #tpu.dot_dimension_numbers<[1], [0], [0], [1], [0, 0, 1, 1], [], []>} : vector<64x128xbf16>, vector<128x128xbf16>, vector<64x128xf32> -> vector<64x128xf32>
    %158 = arith.truncf %157 : vector<64x128xf32> to vector<64x128xbf16>
    %c256_94 = arith.constant 256 : index
    %c0_95 = arith.constant 0 : index
    %159 = vector.load %arg15[%c256_94, %c0_95] : memref<576x128xbf16, #tpu.memory_space<vmem>>, vector<64x128xbf16>
    tpu.vector_store %arg15[%c256_94, %c0_95], %158 {strides = array<i32>} : memref<576x128xbf16, #tpu.memory_space<vmem>>, vector<64x128xbf16>,
    %c5_96 = arith.constant 5 : index
    %c0_97 = arith.constant 0 : index
    %160 = vector.load %arg7[%c5_96, %c0_97] : memref<9x128xi32, #tpu.memory_space<vmem>>, vector<1x128xi32>
    %161 = vector.broadcast %160 : vector<1x128xi32> to vector<128x128xi32>
    %162 = arith.cmpi eq, %109, %161 : vector<128x128xi32>
    %cst_98 = arith.constant 1.000000e+00 : f32
    %cst_99 = arith.constant 0.000000e+00 : f32
    %163 = vector.broadcast %cst_98 : f32 to vector<128x128xf32>
    %164 = vector.broadcast %cst_99 : f32 to vector<128x128xf32>
    %165 = arith.select %162, %163, %164 : vector<128x128xi1>, vector<128x128xf32>
    %166 = arith.truncf %165 : vector<128x128xf32> to vector<128x128xbf16>
    %cst_100 = arith.constant dense<0.000000e+00> : vector<64x128xf32>
    %167 = tpu.matmul %108, %166, %cst_100 {dimension_numbers = #tpu.dot_dimension_numbers<[1], [0], [0], [1], [0, 0, 1, 1], [], []>} : vector<64x128xbf16>, vector<128x128xbf16>, vector<64x128xf32> -> vector<64x128xf32>
    %168 = arith.truncf %167 : vector<64x128xf32> to vector<64x128xbf16>
    %c320 = arith.constant 320 : index
    %c0_101 = arith.constant 0 : index
    %169 = vector.load %arg15[%c320, %c0_101] : memref<576x128xbf16, #tpu.memory_space<vmem>>, vector<64x128xbf16>
    tpu.vector_store %arg15[%c320, %c0_101], %168 {strides = array<i32>} : memref<576x128xbf16, #tpu.memory_space<vmem>>, vector<64x128xbf16>,
    %c6_102 = arith.constant 6 : index
    %c0_103 = arith.constant 0 : index
    %170 = vector.load %arg7[%c6_102, %c0_103] : memref<9x128xi32, #tpu.memory_space<vmem>>, vector<1x128xi32>
    %171 = vector.broadcast %170 : vector<1x128xi32> to vector<128x128xi32>
    %172 = arith.cmpi eq, %109, %171 : vector<128x128xi32>
    %cst_104 = arith.constant 1.000000e+00 : f32
    %cst_105 = arith.constant 0.000000e+00 : f32
    %173 = vector.broadcast %cst_104 : f32 to vector<128x128xf32>
    %174 = vector.broadcast %cst_105 : f32 to vector<128x128xf32>
    %175 = arith.select %172, %173, %174 : vector<128x128xi1>, vector<128x128xf32>
    %176 = arith.truncf %175 : vector<128x128xf32> to vector<128x128xbf16>
    %cst_106 = arith.constant dense<0.000000e+00> : vector<64x128xf32>
    %177 = tpu.matmul %108, %176, %cst_106 {dimension_numbers = #tpu.dot_dimension_numbers<[1], [0], [0], [1], [0, 0, 1, 1], [], []>} : vector<64x128xbf16>, vector<128x128xbf16>, vector<64x128xf32> -> vector<64x128xf32>
    %178 = arith.truncf %177 : vector<64x128xf32> to vector<64x128xbf16>
    %c384 = arith.constant 384 : index
    %c0_107 = arith.constant 0 : index
    %179 = vector.load %arg15[%c384, %c0_107] : memref<576x128xbf16, #tpu.memory_space<vmem>>, vector<64x128xbf16>
    tpu.vector_store %arg15[%c384, %c0_107], %178 {strides = array<i32>} : memref<576x128xbf16, #tpu.memory_space<vmem>>, vector<64x128xbf16>,
    %c7_108 = arith.constant 7 : index
    %c0_109 = arith.constant 0 : index
    %180 = vector.load %arg7[%c7_108, %c0_109] : memref<9x128xi32, #tpu.memory_space<vmem>>, vector<1x128xi32>
    %181 = vector.broadcast %180 : vector<1x128xi32> to vector<128x128xi32>
    %182 = arith.cmpi eq, %109, %181 : vector<128x128xi32>
    %cst_110 = arith.constant 1.000000e+00 : f32
    %cst_111 = arith.constant 0.000000e+00 : f32
    %183 = vector.broadcast %cst_110 : f32 to vector<128x128xf32>
    %184 = vector.broadcast %cst_111 : f32 to vector<128x128xf32>
    %185 = arith.select %182, %183, %184 : vector<128x128xi1>, vector<128x128xf32>
    %186 = arith.truncf %185 : vector<128x128xf32> to vector<128x128xbf16>
    %cst_112 = arith.constant dense<0.000000e+00> : vector<64x128xf32>
    %187 = tpu.matmul %108, %186, %cst_112 {dimension_numbers = #tpu.dot_dimension_numbers<[1], [0], [0], [1], [0, 0, 1, 1], [], []>} : vector<64x128xbf16>, vector<128x128xbf16>, vector<64x128xf32> -> vector<64x128xf32>
    %188 = arith.truncf %187 : vector<64x128xf32> to vector<64x128xbf16>
    %c448 = arith.constant 448 : index
    %c0_113 = arith.constant 0 : index
    %189 = vector.load %arg15[%c448, %c0_113] : memref<576x128xbf16, #tpu.memory_space<vmem>>, vector<64x128xbf16>
    tpu.vector_store %arg15[%c448, %c0_113], %188 {strides = array<i32>} : memref<576x128xbf16, #tpu.memory_space<vmem>>, vector<64x128xbf16>,
    %c8_114 = arith.constant 8 : index
    %c0_115 = arith.constant 0 : index
    %190 = vector.load %arg7[%c8_114, %c0_115] : memref<9x128xi32, #tpu.memory_space<vmem>>, vector<1x128xi32>
    %191 = vector.broadcast %190 : vector<1x128xi32> to vector<128x128xi32>
    %192 = arith.cmpi eq, %109, %191 : vector<128x128xi32>
    %cst_116 = arith.constant 1.000000e+00 : f32
    %cst_117 = arith.constant 0.000000e+00 : f32
    %193 = vector.broadcast %cst_116 : f32 to vector<128x128xf32>
    %194 = vector.broadcast %cst_117 : f32 to vector<128x128xf32>
    %195 = arith.select %192, %193, %194 : vector<128x128xi1>, vector<128x128xf32>
    %196 = arith.truncf %195 : vector<128x128xf32> to vector<128x128xbf16>
    %cst_118 = arith.constant dense<0.000000e+00> : vector<64x128xf32>
    %197 = tpu.matmul %108, %196, %cst_118 {dimension_numbers = #tpu.dot_dimension_numbers<[1], [0], [0], [1], [0, 0, 1, 1], [], []>} : vector<64x128xbf16>, vector<128x128xbf16>, vector<64x128xf32> -> vector<64x128xf32>
    %198 = arith.truncf %197 : vector<64x128xf32> to vector<64x128xbf16>
    %c512 = arith.constant 512 : index
    %c0_119 = arith.constant 0 : index
    %199 = vector.load %arg15[%c512, %c0_119] : memref<576x128xbf16, #tpu.memory_space<vmem>>, vector<64x128xbf16>
    tpu.vector_store %arg15[%c512, %c0_119], %198 {strides = array<i32>} : memref<576x128xbf16, #tpu.memory_space<vmem>>, vector<64x128xbf16>,
    %c0_120 = arith.constant 0 : index
    %c0_121 = arith.constant 0 : index
    %200 = vector.load %arg8[%c0_120, %c0_121] : memref<64x576xbf16, #tpu.memory_space<vmem>>, vector<64x576xbf16>
    %c0_122 = arith.constant 0 : index
    %c0_123 = arith.constant 0 : index
    %201 = vector.load %arg15[%c0_122, %c0_123] : memref<576x128xbf16, #tpu.memory_space<vmem>>, vector<576x128xbf16>
    %cst_124 = arith.constant dense<0.000000e+00> : vector<64x128xf32>
    %202 = tpu.matmul %200, %201, %cst_124 {dimension_numbers = #tpu.dot_dimension_numbers<[1], [0], [0], [1], [0, 0, 1, 1], [], []>} : vector<64x576xbf16>, vector<576x128xbf16>, vector<64x128xf32> -> vector<64x128xf32>
    %c0_125 = arith.constant 0 : index
    %c0_126 = arith.constant 0 : index
    %203 = vector.load %arg9[%c0_125, %c0_126] : memref<64x1xf32, #tpu.memory_space<vmem>>, vector<64x1xf32>
    %204 = vector.broadcast %203 : vector<64x1xf32> to vector<64x128xf32>
    %205 = arith.addf %202, %204 : vector<64x128xf32>
    %cst_127 = arith.constant 0.000000e+00 : f32
    %206 = vector.broadcast %cst_127 : f32 to vector<64x128xf32>
    %207 = arith.maximumf %205, %206 : vector<64x128xf32>
    %208 = arith.truncf %207 : vector<64x128xf32> to vector<64x128xbf16>
    %209 = tpu.iota {dimensions = array<i32: 0>} : vector<128x128xi32>
    %c0_128 = arith.constant 0 : index
    %c0_129 = arith.constant 0 : index
    %210 = vector.load %arg10[%c0_128, %c0_129] : memref<4x128xi32, #tpu.memory_space<vmem>>, vector<1x128xi32>
    %211 = vector.broadcast %210 : vector<1x128xi32> to vector<128x128xi32>
    %212 = arith.cmpi eq, %209, %211 : vector<128x128xi32>
    %cst_130 = arith.constant 1.000000e+00 : f32
    %cst_131 = arith.constant 0.000000e+00 : f32
    %213 = vector.broadcast %cst_130 : f32 to vector<128x128xf32>
    %214 = vector.broadcast %cst_131 : f32 to vector<128x128xf32>
    %215 = arith.select %212, %213, %214 : vector<128x128xi1>, vector<128x128xf32>
    %216 = arith.truncf %215 : vector<128x128xf32> to vector<128x128xbf16>
    %cst_132 = arith.constant dense<0.000000e+00> : vector<64x128xf32>
    %217 = tpu.matmul %208, %216, %cst_132 {dimension_numbers = #tpu.dot_dimension_numbers<[1], [0], [0], [1], [0, 0, 1, 1], [], []>} : vector<64x128xbf16>, vector<128x128xbf16>, vector<64x128xf32> -> vector<64x128xf32>
    %218 = arith.truncf %217 : vector<64x128xf32> to vector<64x128xbf16>
    %c0_133 = arith.constant 0 : index
    %c0_134 = arith.constant 0 : index
    %219 = vector.load %arg16[%c0_133, %c0_134] : memref<256x128xbf16, #tpu.memory_space<vmem>>, vector<64x128xbf16>
    tpu.vector_store %arg16[%c0_133, %c0_134], %218 {strides = array<i32>} : memref<256x128xbf16, #tpu.memory_space<vmem>>, vector<64x128xbf16>,
    %c1_135 = arith.constant 1 : index
    %c0_136 = arith.constant 0 : index
    %220 = vector.load %arg10[%c1_135, %c0_136] : memref<4x128xi32, #tpu.memory_space<vmem>>, vector<1x128xi32>
    %221 = vector.broadcast %220 : vector<1x128xi32> to vector<128x128xi32>
    %222 = arith.cmpi eq, %209, %221 : vector<128x128xi32>
    %cst_137 = arith.constant 1.000000e+00 : f32
    %cst_138 = arith.constant 0.000000e+00 : f32
    %223 = vector.broadcast %cst_137 : f32 to vector<128x128xf32>
    %224 = vector.broadcast %cst_138 : f32 to vector<128x128xf32>
    %225 = arith.select %222, %223, %224 : vector<128x128xi1>, vector<128x128xf32>
    %226 = arith.truncf %225 : vector<128x128xf32> to vector<128x128xbf16>
    %cst_139 = arith.constant dense<0.000000e+00> : vector<64x128xf32>
    %227 = tpu.matmul %208, %226, %cst_139 {dimension_numbers = #tpu.dot_dimension_numbers<[1], [0], [0], [1], [0, 0, 1, 1], [], []>} : vector<64x128xbf16>, vector<128x128xbf16>, vector<64x128xf32> -> vector<64x128xf32>
    %228 = arith.truncf %227 : vector<64x128xf32> to vector<64x128xbf16>
    %c64_140 = arith.constant 64 : index
    %c0_141 = arith.constant 0 : index
    %229 = vector.load %arg16[%c64_140, %c0_141] : memref<256x128xbf16, #tpu.memory_space<vmem>>, vector<64x128xbf16>
    tpu.vector_store %arg16[%c64_140, %c0_141], %228 {strides = array<i32>} : memref<256x128xbf16, #tpu.memory_space<vmem>>, vector<64x128xbf16>,
    %c2_142 = arith.constant 2 : index
    %c0_143 = arith.constant 0 : index
    %230 = vector.load %arg10[%c2_142, %c0_143] : memref<4x128xi32, #tpu.memory_space<vmem>>, vector<1x128xi32>
    %231 = vector.broadcast %230 : vector<1x128xi32> to vector<128x128xi32>
    %232 = arith.cmpi eq, %209, %231 : vector<128x128xi32>
    %cst_144 = arith.constant 1.000000e+00 : f32
    %cst_145 = arith.constant 0.000000e+00 : f32
    %233 = vector.broadcast %cst_144 : f32 to vector<128x128xf32>
    %234 = vector.broadcast %cst_145 : f32 to vector<128x128xf32>
    %235 = arith.select %232, %233, %234 : vector<128x128xi1>, vector<128x128xf32>
    %236 = arith.truncf %235 : vector<128x128xf32> to vector<128x128xbf16>
    %cst_146 = arith.constant dense<0.000000e+00> : vector<64x128xf32>
    %237 = tpu.matmul %208, %236, %cst_146 {dimension_numbers = #tpu.dot_dimension_numbers<[1], [0], [0], [1], [0, 0, 1, 1], [], []>} : vector<64x128xbf16>, vector<128x128xbf16>, vector<64x128xf32> -> vector<64x128xf32>
    %238 = arith.truncf %237 : vector<64x128xf32> to vector<64x128xbf16>
    %c128_147 = arith.constant 128 : index
    %c0_148 = arith.constant 0 : index
    %239 = vector.load %arg16[%c128_147, %c0_148] : memref<256x128xbf16, #tpu.memory_space<vmem>>, vector<64x128xbf16>
    tpu.vector_store %arg16[%c128_147, %c0_148], %238 {strides = array<i32>} : memref<256x128xbf16, #tpu.memory_space<vmem>>, vector<64x128xbf16>,
    %c3_149 = arith.constant 3 : index
    %c0_150 = arith.constant 0 : index
    %240 = vector.load %arg10[%c3_149, %c0_150] : memref<4x128xi32, #tpu.memory_space<vmem>>, vector<1x128xi32>
    %241 = vector.broadcast %240 : vector<1x128xi32> to vector<128x128xi32>
    %242 = arith.cmpi eq, %209, %241 : vector<128x128xi32>
    %cst_151 = arith.constant 1.000000e+00 : f32
    %cst_152 = arith.constant 0.000000e+00 : f32
    %243 = vector.broadcast %cst_151 : f32 to vector<128x128xf32>
    %244 = vector.broadcast %cst_152 : f32 to vector<128x128xf32>
    %245 = arith.select %242, %243, %244 : vector<128x128xi1>, vector<128x128xf32>
    %246 = arith.truncf %245 : vector<128x128xf32> to vector<128x128xbf16>
    %cst_153 = arith.constant dense<0.000000e+00> : vector<64x128xf32>
    %247 = tpu.matmul %208, %246, %cst_153 {dimension_numbers = #tpu.dot_dimension_numbers<[1], [0], [0], [1], [0, 0, 1, 1], [], []>} : vector<64x128xbf16>, vector<128x128xbf16>, vector<64x128xf32> -> vector<64x128xf32>
    %248 = arith.truncf %247 : vector<64x128xf32> to vector<64x128xbf16>
    %c192_154 = arith.constant 192 : index
    %c0_155 = arith.constant 0 : index
    %249 = vector.load %arg16[%c192_154, %c0_155] : memref<256x128xbf16, #tpu.memory_space<vmem>>, vector<64x128xbf16>
    tpu.vector_store %arg16[%c192_154, %c0_155], %248 {strides = array<i32>} : memref<256x128xbf16, #tpu.memory_space<vmem>>, vector<64x128xbf16>,
    %c0_156 = arith.constant 0 : index
    %c0_157 = arith.constant 0 : index
    %250 = vector.load %arg11[%c0_156, %c0_157] : memref<8x256xbf16, #tpu.memory_space<vmem>>, vector<8x256xbf16>
    %c0_158 = arith.constant 0 : index
    %c0_159 = arith.constant 0 : index
    %251 = vector.load %arg16[%c0_158, %c0_159] : memref<256x128xbf16, #tpu.memory_space<vmem>>, vector<256x128xbf16>
    %cst_160 = arith.constant dense<0.000000e+00> : vector<8x128xf32>
    %252 = tpu.matmul %250, %251, %cst_160 {dimension_numbers = #tpu.dot_dimension_numbers<[1], [0], [0], [1], [0, 0, 1, 1], [], []>} : vector<8x256xbf16>, vector<256x128xbf16>, vector<8x128xf32> -> vector<8x128xf32>
    %c0_161 = arith.constant 0 : index
    %c0_162 = arith.constant 0 : index
    %253 = vector.load %arg12[%c0_161, %c0_162] : memref<8x1xf32, #tpu.memory_space<vmem>>, vector<8x1xf32>
    %254 = vector.broadcast %253 : vector<8x1xf32> to vector<8x128xf32>
    %255 = arith.addf %252, %254 : vector<8x128xf32>
    %c0_163 = arith.constant 0 : index
    %c0_164 = arith.constant 0 : index
    %256 = vector.load %arg13[%c0_163, %c0_164] : memref<8x128xf32, #tpu.memory_space<vmem>>, vector<8x128xf32>
    tpu.vector_store %arg13[%c0_163, %c0_164], %255 {strides = array<i32>} : memref<8x128xf32, #tpu.memory_space<vmem>>, vector<8x128xf32>,
    return
  }
  func.func @transform_0(%arg0: i32) -> (i32, i32) {
    %c0_i32 = arith.constant 0 : i32
    %c0_i32_0 = arith.constant 0 : i32
    %c0_i32_1 = arith.constant 0 : i32
    return %c0_i32, %c0_i32_0 : i32, i32
  }
  func.func @transform_1(%arg0: i32) -> (i32, i32) {
    %c0_i32 = arith.constant 0 : i32
    %c0_i32_0 = arith.constant 0 : i32
    %c0_i32_1 = arith.constant 0 : i32
    return %c0_i32, %c0_i32_0 : i32, i32
  }
  func.func @transform_2(%arg0: i32) -> (i32, i32) {
    %c0_i32 = arith.constant 0 : i32
    %c0_i32_0 = arith.constant 0 : i32
    %c0_i32_1 = arith.constant 0 : i32
    return %c0_i32, %c0_i32_0 : i32, i32
  }
  func.func @transform_3(%arg0: i32) -> (i32, i32) {
    %c0_i32 = arith.constant 0 : i32
    %c0_i32_0 = arith.constant 0 : i32
    %c0_i32_1 = arith.constant 0 : i32
    return %c0_i32, %c0_i32_0 : i32, i32
  }
  func.func @transform_4(%arg0: i32) -> (i32, i32) {
    %c0_i32 = arith.constant 0 : i32
    %c0_i32_0 = arith.constant 0 : i32
    %c0_i32_1 = arith.constant 0 : i32
    return %c0_i32, %c0_i32_0 : i32, i32
  }
  func.func @transform_5(%arg0: i32) -> (i32, i32) {
    %c0_i32 = arith.constant 0 : i32
    %c0_i32_0 = arith.constant 0 : i32
    %c0_i32_1 = arith.constant 0 : i32
    return %c0_i32, %c0_i32_0 : i32, i32
  }
  func.func @transform_6(%arg0: i32) -> (i32, i32) {
    %c0_i32 = arith.constant 0 : i32
    %c0_i32_0 = arith.constant 0 : i32
    %c0_i32_1 = arith.constant 0 : i32
    return %c0_i32, %c0_i32_0 : i32, i32
  }
  func.func @transform_7(%arg0: i32) -> (i32, i32) {
    %c0_i32 = arith.constant 0 : i32
    %c0_i32_0 = arith.constant 0 : i32
    %c0_i32_1 = arith.constant 0 : i32
    return %c0_i32, %c0_i32_0 : i32, i32
  }
  func.func @transform_8(%arg0: i32) -> (i32, i32) {
    %c0_i32 = arith.constant 0 : i32
    %c0_i32_0 = arith.constant 0 : i32
    %c0_i32_1 = arith.constant 0 : i32
    return %c0_i32, %c0_i32_0 : i32, i32
  }
  func.func @transform_9(%arg0: i32) -> (i32, i32) {
    %c0_i32 = arith.constant 0 : i32
    %c0_i32_0 = arith.constant 0 : i32
    %c0_i32_1 = arith.constant 0 : i32
    return %c0_i32, %c0_i32_0 : i32, i32
  }
  func.func @transform_10(%arg0: i32) -> (i32, i32) {
    %c0_i32 = arith.constant 0 : i32
    %c0_i32_0 = arith.constant 0 : i32
    %c0_i32_1 = arith.constant 0 : i32
    return %c0_i32, %c0_i32_0 : i32, i32
  }
  func.func @transform_11(%arg0: i32) -> (i32, i32) {
    %c0_i32 = arith.constant 0 : i32
    %c0_i32_0 = arith.constant 0 : i32
    %c0_i32_1 = arith.constant 0 : i32
    return %c0_i32, %c0_i32_0 : i32, i32
  }
  func.func @transform_12(%arg0: i32) -> (i32, i32) {
    %c0_i32 = arith.constant 0 : i32
    %c0_i32_0 = arith.constant 0 : i32
    %c0_i32_1 = arith.constant 0 : i32
    return %c0_i32, %c0_i32_0 : i32, i32
  }
}

</mosaic_0001>

<bundles_post_ra>
// kernel: forward.1
= control target key start
LH: loop header
LB: loop body
LE: loop exit
PB: predicated region body
PF: predicated region fallthrough
CT: control target
= control target key end

     0   :  { %v5151_v0 = vmov 0   ;;  %vm104_vm0 = vcmask 261120   ;;  %v161_v29 = vlaneseq  ;;  %v5152_v38 = vmov 1.0|1.0   ;;  %s7118_s2 = inlined_call_operand.vmem [shape: f32[32,1], index: 2, kind: input, shape index: {}]   ;;  %s7119_s0 = inlined_call_operand.vmem [shape: bf16[32,256], index: 0, kind: input, shape index: {}]   ;;  %s7120_s1 = inlined_call_operand.vmem [shape: bf16[32,32], index: 1, kind: input, shape index: {}]   ;;  %s7121_s3 = inlined_call_operand.vmem [shape: s32[9,128], index: 3, kind: input, shape index: {}]   ;;  %s7122_s5 = inlined_call_operand.vmem [shape: f32[64,1], index: 5, kind: input, shape index: {}]   ;;  %s7123_s8 = inlined_call_operand.vmem [shape: f32[64,1], index: 8, kind: input, shape index: {}]   ;;  %s7124_s4 = inlined_call_operand.vmem [shape: bf16[64,288], index: 4, kind: input, shape index: {}]   ;;  %s7125_s6 = inlined_call_operand.vmem [shape: s32[9,128], index: 6, kind: input, shape index: {}]   ;;  %s7126_s11 = inlined_call_operand.vmem [shape: f32[8,1], index: 11, kind: input, shape index: {}]   ;;  %s7127_s7 = inlined_call_operand.vmem [shape: bf16[64,576], index: 7, kind: input, shape index: {}]   ;;  %s7128_s9 = inlined_call_operand.vmem [shape: s32[4,128], index: 9, kind: input, shape index: {}]   ;;  %s7129_s10 = inlined_call_operand.vmem [shape: bf16[8,256], index: 10, kind: input, shape index: {}]   ;;  %s7130_s12 = inlined_call_operand.vmem [shape: f32[8,128], index: 12, kind: output, shape index: {}]  }
   0x1   :  { %5127 = vset.pattern.permute.xlu1 %v5151_v0  ;;  %5126 = vset.pattern.permute.xlu0 %v5151_v0  ;;  %v52_v1 = vld [vmem:[%s7118_s2 + $0x10] sm:$0xff]  ;;  %v50_v2 = vld [vmem:[%s7118_s2] sm:$0xff]  ;;  %v4604_v4 = vld [vmem:[%s7119_s0 + $0x14] sm:$0xf0] }
   0x2   :  { %v3677_v3 = vld [vmem:[%s7119_s0 + $0x10] sm:$0xf]  ;;  %66 = vperm.xlu1 %5127, %v52_v1   ;;  %56 = vperm.xlu0 %5126, %v50_v2   ;;  %v4603_v5 = vld [vmem:[%s7119_s0 + $0x14] sm:$0xf]  ;;  %v3679_v6 = vld [vmem:[%s7119_s0 + $0x18] sm:$0xf0] }
   0x3   :  { %v3678_v7 = vor.u32 %v4604_v4, %v3677_v3  ;;  %v3682_v8 = vor.u32 %v4603_v5, %v3679_v6  ;;  %v3669_v9 = vld [vmem:[%s7119_s0] sm:$0xf]  ;;  %v4602_v10 = vld [vmem:[%s7119_s0 + $0x4] sm:$0xf0]  ;;  %v4601_v11 = vld [vmem:[%s7119_s0 + $0x4] sm:$0xf]  ;;  %5128 = vset.pattern.permute.xlu2 %v5151_v0 }
   0x4   :  { %v3671_v12 = vld [vmem:[%s7119_s0 + $0x8] sm:$0xf0]  ;;  %v3670_v13 = vor.u32 %v4602_v10, %v3669_v9  ;;  %v53_v15 = vld [vmem:[%s7118_s2 + $0x18] sm:$0xff]  ;;  %v4599_v17 = vld [vmem:[%s7120_s1] sm:$0xff]  ;;  %v5294_v30 = vshrl.u32 %v161_v29, 7 }
   0x5   :  { %117 = vmatpush.bf16.msra.mxu0 %v3678_v7  ;;  %136 = vmatpush.bf16.msra.mxu3 %v3682_v8  ;;  %v3674_v14 = vor.u32 %v4601_v11, %v3671_v12  ;;  %v51_v16 = vld [vmem:[%s7118_s2 + $0x8] sm:$0xff]  ;;  %v1401_v18 = vld [vmem:[%s7122_s5 + $0x18] sm:$0xff]  ;;  %v1400_v19 = vld [vmem:[%s7122_s5 + $0x10] sm:$0xff] }
   0x6   :  { %v1404_v20 = vld [vmem:[%s7122_s5 + $0x30] sm:$0xff]  ;;  %v1403_v21 = vld [vmem:[%s7122_s5 + $0x28] sm:$0xff]  ;;  %v2604_v24 = vld [vmem:[%s7123_s8] sm:$0xff]  ;;  %v5307_v33 = vadd.s32 112, %v5294_v30  ;;  %v5310_v34 = vadd.s32 120, %v5294_v30  ;;  %v5318_v36 = vadd.s32 96, %v5294_v30 }
   0x7   :  { %v4600_v22 = vld [vmem:[%s7120_s1 + $0x8] sm:$0xff]  ;;  %v2608_v25 = vld [vmem:[%s7123_s8 + $0x20] sm:$0xff]  ;;  %v2607_v26 = vld [vmem:[%s7123_s8 + $0x18] sm:$0xff]  ;;  %v5321_v37 = vadd.s32 104, %v5294_v30  ;;  %v5351_v39 = vadd.s32 240, %v5294_v30  ;;  %v5354_v40 = vadd.s32 248, %v5294_v30 }
   0x8   :  { %v2605_v23 = vld [vmem:[%s7123_s8 + $0x8] sm:$0xff]  ;;  %v2611_v27 = vld [vmem:[%s7123_s8 + $0x38] sm:$0xff]  ;;  %v2610_v28 = vld [vmem:[%s7123_s8 + $0x30] sm:$0xff]  ;;  %v5357_v41 = vadd.s32 80, %v5294_v30  ;;  %v5360_v42 = vadd.s32 88, %v5294_v30  ;;  %v5363_v43 = vadd.s32 224, %v5294_v30 }
   0x9   :  { %118 = vmatpush.bf16.msra.mxu0 %v3670_v13  ;;  %137 = vmatpush.bf16.msra.mxu3 %v3674_v14  ;;  %v5299_v31 = vld [vmem:[%s7121_s3] ss:$0 sm:$0xff]  ;;  %v5304_v32 = vld [vmem:[%s7121_s3 + $0x1] ss:$0 sm:$0xff]  ;;  %v5315_v35 = vld [vmem:[%s7121_s3 + $0x3] ss:$0 sm:$0xff] }
   0xa   :  { %71 = vperm.xlu1 %5127, %v53_v15   ;;  %61 = vperm.xlu0 %5126, %v51_v16   ;;  %vm210_vm1 = vcmp.eq.s32.totalorder %v5307_v33, %v5299_v31  ;;  %vm211_vm2 = vcmp.eq.s32.totalorder %v5310_v34, %v5299_v31  ;;  %vm338_vm3 = vcmp.eq.s32.totalorder %v5307_v33, %v5304_v32  ;;  %v5366_v44 = vadd.s32 232, %v5294_v30  ;;  %v5554_v0 = vld [vmem:[%s7121_s3 + $0x2] ss:$0 sm:$0xff]  ;;  %v5559_v1 = vld [vmem:[%s7121_s3 + $0x5] ss:$0 sm:$0xff] }
   0xb   :  { %vm339_vm4 = vcmp.eq.s32.totalorder %v5310_v34, %v5304_v32  ;;  %vm3687_vm5 = vmpackc.low %vm211_vm2, %vm210_vm1  ;;  %vm594_vm6 = vcmp.eq.s32.totalorder %v5307_v33, %v5315_v35  ;;  %vm595_vm7 = vcmp.eq.s32.totalorder %v5310_v34, %v5315_v35  ;;  %vm208_vm8 = vcmp.eq.s32.totalorder %v5318_v36, %v5299_v31  ;;  %v5744_v15 = vld [vmem:[%s7121_s3 + $0x4] ss:$0 sm:$0xff]  ;;  %v5749_v16 = vld [vmem:[%s7121_s3 + $0x7] ss:$0 sm:$0xff] }
   0xc   :  { %3683 = vmatmul.msk.bf16.vlgmr.msra.gmra.mxu0 %vm104_vm0, %v4599_v17  ;;  %3685 = vmatmul.msk.bf16.vlgmr.msra.gmra.mxu3 %vm104_vm0, %v4599_v17  ;;  %vm209_vm9 = vcmp.eq.s32.totalorder %v5321_v37, %v5299_v31  ;;  %vm3719_vm10 = vmpackc.low %vm339_vm4, %vm338_vm3  ;;  %vm336_vm11 = vcmp.eq.s32.totalorder %v5318_v36, %v5304_v32  ;;  %vm337_vm12 = vcmp.eq.s32.totalorder %v5321_v37, %v5304_v32  ;;  %v5374_v45 = vadd.s32 64, %v5294_v30 }
   0xd   :  { %3688 = vmatpush.bf16.msk.msra.mxu2 %vm3687_vm5, %v5152_v38  ;;  %3720 = vmatpush.bf16.msk.msra.mxu1 %vm3719_vm10, %v5152_v38  ;;  %vm3783_vm13 = vmpackc.low %vm595_vm7, %vm594_vm6  ;;  %vm592_vm15 = vcmp.eq.s32.totalorder %v5318_v36, %v5315_v35  ;;  %vm593_vm1 = vcmp.eq.s32.totalorder %v5321_v37, %v5315_v35  ;;  %vm226_vm4 = vcmp.eq.s32.totalorder %v5351_v39, %v5299_v31  ;;  %v5377_v46 = vadd.s32 72, %v5294_v30 }
   0xe   :  { %3784 = vmatpush.bf16.msk.msrb.mxu0 %vm3783_vm13, %v5152_v38  ;;  %vm3689_vm14 = vmpackc.low %vm209_vm9, %vm208_vm8  ;;  %vm227_vm5 = vcmp.eq.s32.totalorder %v5354_v40, %v5299_v31  ;;  %vm206_vm7 = vcmp.eq.s32.totalorder %v5357_v41, %v5299_v31  ;;  %vm207_vm8 = vcmp.eq.s32.totalorder %v5360_v42, %v5299_v31  ;;  %vm334_vm9 = vcmp.eq.s32.totalorder %v5357_v41, %v5304_v32 }
   0xf   :  { %vm3721_vm2 = vmpackc.low %vm337_vm12, %vm336_vm11  ;;  %vm335_vm10 = vcmp.eq.s32.totalorder %v5360_v42, %v5304_v32  ;;  %vm590_vm12 = vcmp.eq.s32.totalorder %v5357_v41, %v5315_v35  ;;  %vm591_vm13 = vcmp.eq.s32.totalorder %v5360_v42, %v5315_v35  ;;  %v5415_v47 = vadd.s32 208, %v5294_v30 }
  0x10   :  { %vm3785_vm3 = vmpackc.low %vm593_vm1, %vm592_vm15  ;;  %vm225_vm1 = vcmp.eq.s32.totalorder %v5366_v44, %v5299_v31  ;;  %v5418_v48 = vadd.s32 216, %v5294_v30  ;;  %v5426_v49 = vadd.s32 48, %v5294_v30  ;;  %v5429_v50 = vadd.s32 56, %v5294_v30 }
  0x11   :  { %3690 = vmatpush.bf16.msk.msra.mxu2 %vm3689_vm14, %v5152_v38  ;;  %3722 = vmatpush.bf16.msk.msra.mxu1 %vm3721_vm2, %v5152_v38  ;;  %vm3703_vm6 = vmpackc.low %vm227_vm5, %vm226_vm4  ;;  %vm224_vm14 = vcmp.eq.s32.totalorder %v5363_v43, %v5299_v31  ;;  %vm204_vm2 = vcmp.eq.s32.totalorder %v5374_v45, %v5299_v31  ;;  %vm332_vm5 = vcmp.eq.s32.totalorder %v5374_v45, %v5304_v32  ;;  %v5441_v51 = vadd.s32 192, %v5294_v30 }
  0x12   :  { %1423 = vperm.xlu1 %5127, %v1401_v18   ;;  %1418 = vperm.xlu0 %5126, %v1400_v19   ;;  %vm3691_vm11 = vmpackc.low %vm207_vm8, %vm206_vm7  ;;  %v5450_v52 = vadd.s32 200, %v5294_v30  ;;  %v5456_v53 = vadd.s32 32, %v5294_v30  ;;  %v5459_v54 = vadd.s32 40, %v5294_v30  ;;  %v5479_v55 = vadd.s32 176, %v5294_v30 }
  0x13   :  { %3786 = vmatpush.bf16.msk.msrb.mxu0 %vm3785_vm3, %v5152_v38  ;;  %3704 = vmatpush.bf16.msk.msrb.mxu3 %vm3703_vm6, %v5152_v38  ;;  %vm3723_vm15 = vmpackc.low %vm335_vm10, %vm334_vm9  ;;  %vm205_vm3 = vcmp.eq.s32.totalorder %v5377_v46, %v5299_v31  ;;  %vm333_vm6 = vcmp.eq.s32.totalorder %v5377_v46, %v5304_v32  ;;  %vm588_vm9 = vcmp.eq.s32.totalorder %v5374_v45, %v5315_v35  ;;  %v5482_v56 = vadd.s32 184, %v5294_v30 }
  0x14   :  { %vm3787_vm4 = vmpackc.low %vm591_vm13, %vm590_vm12  ;;  %vm589_vm10 = vcmp.eq.s32.totalorder %v5377_v46, %v5315_v35  ;;  %vm222_vm13 = vcmp.eq.s32.totalorder %v5415_v47, %v5299_v31  ;;  %v5486_v57 = vadd.s32 16, %v5294_v30  ;;  %v5489_v58 = vadd.s32 24, %v5294_v30 }
  0x15   :  { %3692 = vmatpush.bf16.msk.msra.mxu2 %vm3691_vm11, %v5152_v38  ;;  %3724 = vmatpush.bf16.msk.msra.mxu1 %vm3723_vm15, %v5152_v38  ;;  %vm3705_vm7 = vmpackc.low %vm225_vm1, %vm224_vm14  ;;  %vm223_vm14 = vcmp.eq.s32.totalorder %v5418_v48, %v5299_v31  ;;  %vm202_vm1 = vcmp.eq.s32.totalorder %v5426_v49, %v5299_v31  ;;  %v5511_v59 = vadd.s32 160, %v5294_v30  ;;  %v5514_v60 = vadd.s32 168, %v5294_v30 }
  0x16   :  { %vm3693_vm8 = vmpackc.low %vm205_vm3, %vm204_vm2  ;;  %vm203_vm2 = vcmp.eq.s32.totalorder %v5429_v50, %v5299_v31  ;;  %vm330_vm3 = vcmp.eq.s32.totalorder %v5426_v49, %v5304_v32  ;;  %v5518_v61 = vadd.s32 8, %v5294_v30  ;;  %v5540_v62 = vadd.s32 144, %v5294_v30 }
  0x17   :  { %3788 = vmatpush.bf16.msk.msrb.mxu0 %vm3787_vm4, %v5152_v38  ;;  %3706 = vmatpush.bf16.msk.msrb.mxu3 %vm3705_vm7, %v5152_v38  ;;  %vm3725_vm11 = vmpackc.low %vm333_vm6, %vm332_vm5  ;;  %vm331_vm5 = vcmp.eq.s32.totalorder %v5429_v50, %v5304_v32  ;;  %vm586_vm6 = vcmp.eq.s32.totalorder %v5426_v49, %v5315_v35  ;;  %vm587_vm7 = vcmp.eq.s32.totalorder %v5429_v50, %v5315_v35  ;;  %v5543_v63 = vadd.s32 152, %v5294_v30 }
  0x18   :  { %vm3789_vm12 = vmpackc.low %vm589_vm10, %vm588_vm9  ;;  %vm220_vm9 = vcmp.eq.s32.totalorder %v5441_v51, %v5299_v31  ;;  %v5576_v2 = vadd.s32 128, %v5294_v30  ;;  %v5579_v3 = vadd.s32 136, %v5294_v30 }
  0x19   :  { %3694 = vmatpush.bf16.msk.msra.mxu2 %vm3693_vm8, %v5152_v38  ;;  %3726 = vmatpush.bf16.msk.msra.mxu1 %vm3725_vm11, %v5152_v38  ;;  %vm3707_vm15 = vmpackc.low %vm223_vm14, %vm222_vm13  ;;  %vm221_vm11 = vcmp.eq.s32.totalorder %v5450_v52, %v5299_v31  ;;  %vm200_vm13 = vcmp.eq.s32.totalorder %v5456_v53, %v5299_v31  ;;  %vm201_vm14 = vcmp.eq.s32.totalorder %v5459_v54, %v5299_v31 }
  0x1a   :  { %1438 = vperm.xlu1 %5127, %v1404_v20   ;;  %1433 = vperm.xlu0 %5126, %v1403_v21   ;;  %vm3695_vm4 = vmpackc.low %vm203_vm2, %vm202_vm1  ;;  %vm329_vm1 = vcmp.eq.s32.totalorder %v5459_v54, %v5304_v32 }
  0x1b   :  { %3790 = vmatpush.bf16.msk.msrb.mxu0 %vm3789_vm12, %v5152_v38  ;;  %3708 = vmatpush.bf16.msk.msrb.mxu3 %vm3707_vm15, %v5152_v38  ;;  %vm3727_vm8 = vmpackc.low %vm331_vm5, %vm330_vm3  ;;  %vm328_vm15 = vcmp.eq.s32.totalorder %v5456_v53, %v5304_v32  ;;  %vm584_vm3 = vcmp.eq.s32.totalorder %v5456_v53, %v5315_v35 }
  0x1c   :  { %3684 = vmatmul.msk.bf16.gmra.mxu0 %vm104_vm0, %v4600_v22  ;;  %3686 = vmatmul.msk.bf16.gmra.mxu3 %vm104_vm0, %v4600_v22  ;;  %vm3791_vm10 = vmpackc.low %vm587_vm7, %vm586_vm6  ;;  %vm218_vm7 = vcmp.eq.s32.totalorder %v5479_v55, %v5299_v31 }
  0x1d   :  { %3696 = vmatpush.bf16.msk.msra.mxu2 %vm3695_vm4, %v5152_v38  ;;  %3728 = vmatpush.bf16.msk.msra.mxu1 %vm3727_vm8, %v5152_v38  ;;  %vm3709_vm12 = vmpackc.low %vm221_vm11, %vm220_vm9  ;;  %vm585_vm4 = vcmp.eq.s32.totalorder %v5459_v54, %v5315_v35  ;;  %vm219_vm8 = vcmp.eq.s32.totalorder %v5482_v56, %v5299_v31  ;;  %vm199_vm11 = vcmp.eq.s32.totalorder %v5489_v58, %v5299_v31 }
  0x1e   :  { %vm3697_vm2 = vmpackc.low %vm201_vm14, %vm200_vm13  ;;  %vm327_vm13 = vcmp.eq.s32.totalorder %v5489_v58, %v5304_v32 }
  0x1f   :  { %3792 = vmatpush.bf16.msk.msrb.mxu0 %vm3791_vm10, %v5152_v38  ;;  %3710 = vmatpush.bf16.msk.msrb.mxu3 %vm3709_vm12, %v5152_v38  ;;  %vm3729_vm5 = vmpackc.low %vm329_vm1, %vm328_vm15  ;;  %vm198_vm10 = vcmp.eq.s32.totalorder %v5486_v57, %v5299_v31  ;;  %vm326_vm12 = vcmp.eq.s32.totalorder %v5486_v57, %v5304_v32  ;;  %vm582_vm15 = vcmp.eq.s32.totalorder %v5486_v57, %v5315_v35 }
  0x20   :  { %vm3793_vm6 = vmpackc.low %vm585_vm4, %vm584_vm3  ;;  %vm583_vm1 = vcmp.eq.s32.totalorder %v5489_v58, %v5315_v35  ;;  %vm216_vm4 = vcmp.eq.s32.totalorder %v5511_v59, %v5299_v31 }
  0x21   :  { %3698 = vmatpush.bf16.msk.msra.mxu2 %vm3697_vm2, %v5152_v38  ;;  %3730 = vmatpush.bf16.msk.msra.mxu1 %vm3729_vm5, %v5152_v38  ;;  %vm3711_vm9 = vmpackc.low %vm219_vm8, %vm218_vm7  ;;  %vm217_vm5 = vcmp.eq.s32.totalorder %v5514_v60, %v5299_v31  ;;  %vm196_vm7 = vcmp.eq.s32.totalorder %v5294_v30, %v5299_v31  ;;  %vm197_vm8 = vcmp.eq.s32.totalorder %v5518_v61, %v5299_v31 }
  0x22   :  { %2619 = vperm.xlu1 %5127, %v2605_v23   ;;  %2614 = vperm.xlu0 %5126, %v2604_v24   ;;  %vm3699_vm14 = vmpackc.low %vm199_vm11, %vm198_vm10  ;;  %vm325_vm10 = vcmp.eq.s32.totalorder %v5518_v61, %v5304_v32 }
  0x23   :  { %3794 = vmatpush.bf16.msk.msrb.mxu0 %vm3793_vm6, %v5152_v38  ;;  %3712 = vmatpush.bf16.msk.msrb.mxu3 %vm3711_vm9, %v5152_v38  ;;  %vm3731_vm2 = vmpackc.low %vm327_vm13, %vm326_vm12  ;;  %vm324_vm9 = vcmp.eq.s32.totalorder %v5294_v30, %v5304_v32  ;;  %vm580_vm12 = vcmp.eq.s32.totalorder %v5294_v30, %v5315_v35  ;;  %vm581_vm13 = vcmp.eq.s32.totalorder %v5518_v61, %v5315_v35 }
  0x24   :  { %vm3795_vm3 = vmpackc.low %vm583_vm1, %vm582_vm15  ;;  %vm214_vm1 = vcmp.eq.s32.totalorder %v5540_v62, %v5299_v31 }
  0x25   :  { %3700 = vmatpush.bf16.msk.msra.mxu2 %vm3699_vm14, %v5152_v38  ;;  %3732 = vmatpush.bf16.msk.msra.mxu1 %vm3731_vm2, %v5152_v38  ;;  %vm3713_vm6 = vmpackc.low %vm217_vm5, %vm216_vm4  ;;  %vm215_vm2 = vcmp.eq.s32.totalorder %v5543_v63, %v5299_v31  ;;  %vm354_vm4 = vcmp.eq.s32.totalorder %v5351_v39, %v5304_v32  ;;  %vm355_vm5 = vcmp.eq.s32.totalorder %v5354_v40, %v5304_v32 }
  0x26   :  { %vm3701_vm11 = vmpackc.low %vm197_vm8, %vm196_vm7  ;;  %vm467_vm7 = vcmp.eq.s32.totalorder %v5310_v34, %v5554_v0 }
  0x27   :  { %3796 = vmatpush.bf16.msk.msrb.mxu0 %vm3795_vm3, %v5152_v38  ;;  %3714 = vmatpush.bf16.msk.msrb.mxu3 %vm3713_vm6, %v5152_v38  ;;  %vm3733_vm14 = vmpackc.low %vm325_vm10, %vm324_vm9  ;;  %vm466_vm6 = vcmp.eq.s32.totalorder %v5307_v33, %v5554_v0  ;;  %vm850_vm9 = vcmp.eq.s32.totalorder %v5307_v33, %v5559_v1  ;;  %vm851_vm10 = vcmp.eq.s32.totalorder %v5310_v34, %v5559_v1 }
  0x28   :  { %vm3797_vm15 = vmpackc.low %vm581_vm13, %vm580_vm12  ;;  %vm212_vm13 = vcmp.eq.s32.totalorder %v5576_v2, %v5299_v31 }
  0x29   :  { %3702 = vmatpush.bf16.msk.msra.mxu2 %vm3701_vm11, %v5152_v38  ;;  %3734 = vmatpush.bf16.msk.msra.mxu1 %vm3733_vm14, %v5152_v38  ;;  %vm3715_vm3 = vmpackc.low %vm215_vm2, %vm214_vm1  ;;  %vm213_vm14 = vcmp.eq.s32.totalorder %v5579_v3, %v5299_v31  ;;  %vm352_vm1 = vcmp.eq.s32.totalorder %v5363_v43, %v5304_v32  ;;  %vm353_vm2 = vcmp.eq.s32.totalorder %v5366_v44, %v5304_v32 }
  0x2a   :  { %2634 = vperm.xlu1 %5127, %v2608_v25   ;;  %2629 = vperm.xlu0 %5126, %v2607_v26   ;;  %vm3735_vm8 = vmpackc.low %vm355_vm5, %vm354_vm4  ;;  %vm465_vm4 = vcmp.eq.s32.totalorder %v5321_v37, %v5554_v0 }
  0x2b   :  { %3798 = vmatpush.bf16.msk.msrb.mxu0 %vm3797_vm15, %v5152_v38  ;;  %3716 = vmatpush.bf16.msk.msrb.mxu3 %vm3715_vm3, %v5152_v38  ;;  %vm3751_vm11 = vmpackc.low %vm467_vm7, %vm466_vm6  ;;  %vm464_vm3 = vcmp.eq.s32.totalorder %v5318_v36, %v5554_v0  ;;  %vm848_vm6 = vcmp.eq.s32.totalorder %v5318_v36, %v5559_v1  ;;  %vm849_vm7 = vcmp.eq.s32.totalorder %v5321_v37, %v5559_v1 }
  0x2c   :  { %vm3847_vm12 = vmpackc.low %vm851_vm10, %vm850_vm9  ;;  %vm482_vm9 = vcmp.eq.s32.totalorder %v5351_v39, %v5554_v0  ;;  %vm483_vm10 = vcmp.eq.s32.totalorder %v5354_v40, %v5554_v0 }
  0x2d   :  { %3736 = vmatpush.bf16.msk.msrb.mxu1 %vm3735_vm8, %v5152_v38  ;;  %3752 = vmatpush.bf16.msk.msrb.mxu2 %vm3751_vm11, %v5152_v38  ;;  %vm3717_vm15 = vmpackc.low %vm213_vm14, %vm212_vm13  ;;  %vm350_vm13 = vcmp.eq.s32.totalorder %v5415_v47, %v5304_v32  ;;  %vm351_vm14 = vcmp.eq.s32.totalorder %v5418_v48, %v5304_v32 }
  0x2e   :  { %vm3737_vm5 = vmpackc.low %vm353_vm2, %vm352_vm1  ;;  %vm463_vm1 = vcmp.eq.s32.totalorder %v5360_v42, %v5554_v0 }
  0x2f   :  { %3848 = vmatpush.bf16.msk.msra.mxu0 %vm3847_vm12, %v5152_v38  ;;  %3718 = vmatpush.bf16.msk.msrb.mxu3 %vm3717_vm15, %v5152_v38  ;;  %vm3753_vm8 = vmpackc.low %vm465_vm4, %vm464_vm3  ;;  %vm462_vm15 = vcmp.eq.s32.totalorder %v5357_v41, %v5554_v0  ;;  %vm846_vm3 = vcmp.eq.s32.totalorder %v5357_v41, %v5559_v1  ;;  %vm847_vm4 = vcmp.eq.s32.totalorder %v5360_v42, %v5559_v1 }
  0x30   :  { %vm3849_vm11 = vmpackc.low %vm849_vm7, %vm848_vm6  ;;  %vm480_vm6 = vcmp.eq.s32.totalorder %v5363_v43, %v5554_v0  ;;  %vm481_vm7 = vcmp.eq.s32.totalorder %v5366_v44, %v5554_v0 }
  0x31   :  { %3738 = vmatpush.bf16.msk.msrb.mxu1 %vm3737_vm5, %v5152_v38  ;;  %3754 = vmatpush.bf16.msk.msrb.mxu2 %vm3753_vm8, %v5152_v38  ;;  %vm3767_vm12 = vmpackc.low %vm483_vm10, %vm482_vm9  ;;  %vm348_vm10 = vcmp.eq.s32.totalorder %v5441_v51, %v5304_v32 }
  0x32   :  { %2649 = vperm.xlu1 %5127, %v2611_v27   ;;  %2644 = vperm.xlu0 %5126, %v2610_v28   ;;  %vm3739_vm2 = vmpackc.low %vm351_vm14, %vm350_vm13  ;;  %vm461_vm13 = vcmp.eq.s32.totalorder %v5377_v46, %v5554_v0 }
  0x33   :  { %3850 = vmatpush.bf16.msk.msra.mxu0 %vm3849_vm11, %v5152_v38  ;;  %3768 = vmatpush.bf16.msk.msra.mxu3 %vm3767_vm12, %v5152_v38  ;;  %vm3755_vm5 = vmpackc.low %vm463_vm1, %vm462_vm15  ;;  %vm349_vm11 = vcmp.eq.s32.totalorder %v5450_v52, %v5304_v32  ;;  %vm460_vm12 = vcmp.eq.s32.totalorder %v5374_v45, %v5554_v0  ;;  %vm844_vm15 = vcmp.eq.s32.totalorder %v5374_v45, %v5559_v1 }
  0x34   :  { %vm3851_vm8 = vmpackc.low %vm847_vm4, %vm846_vm3  ;;  %vm845_vm1 = vcmp.eq.s32.totalorder %v5377_v46, %v5559_v1  ;;  %vm478_vm3 = vcmp.eq.s32.totalorder %v5415_v47, %v5554_v0  ;;  %vm479_vm4 = vcmp.eq.s32.totalorder %v5418_v48, %v5554_v0 }
  0x35   :  { %3740 = vmatpush.bf16.msk.msrb.mxu1 %vm3739_vm2, %v5152_v38  ;;  %3756 = vmatpush.bf16.msk.msrb.mxu2 %vm3755_vm5, %v5152_v38  ;;  %vm3769_vm9 = vmpackc.low %vm481_vm7, %vm480_vm6  ;;  %vm346_vm7 = vcmp.eq.s32.totalorder %v5479_v55, %v5304_v32 }
  0x36   :  { %vm3741_vm14 = vmpackc.low %vm349_vm11, %vm348_vm10  ;;  %vm459_vm10 = vcmp.eq.s32.totalorder %v5429_v50, %v5554_v0 }
  0x37   :  { %3852 = vmatpush.bf16.msk.msra.mxu0 %vm3851_vm8, %v5152_v38  ;;  %3770 = vmatpush.bf16.msk.msra.mxu3 %vm3769_vm9, %v5152_v38  ;;  %vm3757_vm2 = vmpackc.low %vm461_vm13, %vm460_vm12  ;;  %vm347_vm8 = vcmp.eq.s32.totalorder %v5482_v56, %v5304_v32  ;;  %vm458_vm9 = vcmp.eq.s32.totalorder %v5426_v49, %v5554_v0  ;;  %vm842_vm12 = vcmp.eq.s32.totalorder %v5426_v49, %v5559_v1 }
  0x38   :  { %vm3853_vm5 = vmpackc.low %vm845_vm1, %vm844_vm15  ;;  %vm843_vm13 = vcmp.eq.s32.totalorder %v5429_v50, %v5559_v1  ;;  %vm476_vm15 = vcmp.eq.s32.totalorder %v5441_v51, %v5554_v0  ;;  %vm477_vm1 = vcmp.eq.s32.totalorder %v5450_v52, %v5554_v0 }
  0x39   :  { %3742 = vmatpush.bf16.msk.msrb.mxu1 %vm3741_vm14, %v5152_v38  ;;  %3758 = vmatpush.bf16.msk.msrb.mxu2 %vm3757_vm2, %v5152_v38  ;;  %vm3771_vm6 = vmpackc.low %vm479_vm4, %vm478_vm3  ;;  %vm344_vm4 = vcmp.eq.s32.totalorder %v5511_v59, %v5304_v32 }
  0x3a   :  { %vm3743_vm11 = vmpackc.low %vm347_vm8, %vm346_vm7  ;;  %vm457_vm8 = vcmp.eq.s32.totalorder %v5459_v54, %v5554_v0 }
  0x3b   :  { %3854 = vmatpush.bf16.msk.msra.mxu0 %vm3853_vm5, %v5152_v38  ;;  %3772 = vmatpush.bf16.msk.msra.mxu3 %vm3771_vm6, %v5152_v38  ;;  %vm3759_vm14 = vmpackc.low %vm459_vm10, %vm458_vm9  ;;  %vm345_vm5 = vcmp.eq.s32.totalorder %v5514_v60, %v5304_v32  ;;  %vm456_vm6 = vcmp.eq.s32.totalorder %v5456_v53, %v5554_v0  ;;  %vm840_vm9 = vcmp.eq.s32.totalorder %v5456_v53, %v5559_v1 }
  0x3c   :  { %vm3855_vm2 = vmpackc.low %vm843_vm13, %vm842_vm12  ;;  %vm841_vm10 = vcmp.eq.s32.totalorder %v5459_v54, %v5559_v1  ;;  %vm474_vm12 = vcmp.eq.s32.totalorder %v5479_v55, %v5554_v0  ;;  %vm475_vm13 = vcmp.eq.s32.totalorder %v5482_v56, %v5554_v0 }
  0x3d   :  { %3744 = vmatpush.bf16.msk.msrb.mxu1 %vm3743_vm11, %v5152_v38  ;;  %3760 = vmatpush.bf16.msk.msrb.mxu2 %vm3759_vm14, %v5152_v38  ;;  %vm3773_vm3 = vmpackc.low %vm477_vm1, %vm476_vm15  ;;  %vm342_vm14 = vcmp.eq.s32.totalorder %v5540_v62, %v5304_v32  ;;  %vm343_vm15 = vcmp.eq.s32.totalorder %v5543_v63, %v5304_v32 }
  0x3e   :  { %vm3745_vm7 = vmpackc.low %vm345_vm5, %vm344_vm4  ;;  %vm838_vm5 = vcmp.eq.s32.totalorder %v5486_v57, %v5559_v1 }
  0x3f   :  { %3856 = vmatpush.bf16.msk.msra.mxu0 %vm3855_vm2, %v5152_v38  ;;  %3774 = vmatpush.bf16.msk.msra.mxu3 %vm3773_vm3, %v5152_v38  ;;  %vm3761_vm11 = vmpackc.low %vm457_vm8, %vm456_vm6  ;;  %vm454_vm2 = vcmp.eq.s32.totalorder %v5486_v57, %v5554_v0  ;;  %vm455_vm3 = vcmp.eq.s32.totalorder %v5489_v58, %v5554_v0  ;;  %vm839_vm6 = vcmp.eq.s32.totalorder %v5489_v58, %v5559_v1 }
  0x40   :  { %vm3857_vm1 = vmpackc.low %vm841_vm10, %vm840_vm9  ;;  %vm472_vm8 = vcmp.eq.s32.totalorder %v5511_v59, %v5554_v0  ;;  %vm473_vm9 = vcmp.eq.s32.totalorder %v5514_v60, %v5554_v0 }
  0x41   :  { %3746 = vmatpush.bf16.msk.msrb.mxu1 %vm3745_vm7, %v5152_v38  ;;  %3762 = vmatpush.bf16.msk.msrb.mxu2 %vm3761_vm11, %v5152_v38  ;;  %vm3775_vm4 = vmpackc.low %vm475_vm13, %vm474_vm12  ;;  %vm340_vm11 = vcmp.eq.s32.totalorder %v5576_v2, %v5304_v32  ;;  %vm341_vm12 = vcmp.eq.s32.totalorder %v5579_v3, %v5304_v32 }
  0x42   :  { %vm3747_vm7 = vmpackc.low %vm343_vm15, %vm342_vm14  ;;  %vm452_vm14 = vcmp.eq.s32.totalorder %v5294_v30, %v5554_v0  ;;  %vm453_vm15 = vcmp.eq.s32.totalorder %v5518_v61, %v5554_v0 }
  0x43   :  { %3858 = vmatpush.bf16.msk.msra.mxu0 %vm3857_vm1, %v5152_v38  ;;  %3776 = vmatpush.bf16.msk.msra.mxu3 %vm3775_vm4, %v5152_v38  ;;  %vm3763_vm10 = vmpackc.low %vm455_vm3, %vm454_vm2  ;;  %vm836_vm2 = vcmp.eq.s32.totalorder %v5294_v30, %v5559_v1  ;;  %vm837_vm3 = vcmp.eq.s32.totalorder %v5518_v61, %v5559_v1 }
  0x44   :  { %vm3859_vm13 = vmpackc.low %vm839_vm6, %vm838_vm5  ;;  %vm470_vm5 = vcmp.eq.s32.totalorder %v5540_v62, %v5554_v0  ;;  %vm471_vm6 = vcmp.eq.s32.totalorder %v5543_v63, %v5554_v0 }
  0x45   :  { %3748 = vmatpush.bf16.msk.msrb.mxu1 %vm3747_vm7, %v5152_v38  ;;  %3764 = vmatpush.bf16.msk.msrb.mxu2 %vm3763_vm10, %v5152_v38  ;;  %vm3777_vm1 = vmpackc.low %vm473_vm9, %vm472_vm8  ;;  %vm610_vm10 = vcmp.eq.s32.totalorder %v5351_v39, %v5315_v35 }
  0x46   :  { %vm3749_vm4 = vmpackc.low %vm341_vm12, %vm340_vm11  ;;  %vm611_vm11 = vcmp.eq.s32.totalorder %v5354_v40, %v5315_v35 }
  0x47   :  { %3860 = vmatpush.bf16.msk.msra.mxu0 %vm3859_vm13, %v5152_v38  ;;  %3778 = vmatpush.bf16.msk.msra.mxu3 %vm3777_vm1, %v5152_v38  ;;  %vm3765_vm7 = vmpackc.low %vm453_vm15, %vm452_vm14  ;;  %vm722_vm13 = vcmp.eq.s32.totalorder %v5307_v33, %v5744_v15  ;;  %vm723_vm14 = vcmp.eq.s32.totalorder %v5310_v34, %v5744_v15  ;;  %vm1106_vm15 = vcmp.eq.s32.totalorder %v5307_v33, %v5749_v16 }
  0x48   :  { %vm5757_vm8 = vmpackc.low %vm837_vm3, %vm836_vm2  ;;  %vm1107_vm2 = vcmp.eq.s32.totalorder %v5310_v34, %v5749_v16  ;;  %vm468_vm3 = vcmp.eq.s32.totalorder %v5576_v2, %v5554_v0 }
  0x49   :  { %3750 = vmatpush.bf16.msk.msrb.mxu1 %vm3749_vm4, %v5152_v38  ;;  %3766 = vmatpush.bf16.msk.msrb.mxu2 %vm3765_vm7, %v5152_v38  ;;  %vm3779_vm9 = vmpackc.low %vm471_vm6, %vm470_vm5  ;;  %vm469_vm5 = vcmp.eq.s32.totalorder %v5579_v3, %v5554_v0  ;;  %vm608_vm6 = vcmp.eq.s32.totalorder %v5363_v43, %v5315_v35  ;;  %vm609_vm7 = vcmp.eq.s32.totalorder %v5366_v44, %v5315_v35 }
  0x4a   :  { %vm3799_vm12 = vmpackc.low %vm611_vm11, %vm610_vm10  ;;  %vm721_vm10 = vcmp.eq.s32.totalorder %v5321_v37, %v5744_v15  ;;  %vm1104_vm11 = vcmp.eq.s32.totalorder %v5318_v36, %v5749_v16 }
  0x4b   :  { %3780 = vmatpush.bf16.msk.msra.mxu3 %vm3779_vm9, %v5152_v38  ;;  %3862 = vmatpush.bf16.msk.msra.mxu0 %vm5757_vm8, %v5152_v38  ;;  %vm3815_vm1 = vmpackc.low %vm723_vm14, %vm722_vm13  ;;  %vm720_vm8 = vcmp.eq.s32.totalorder %v5318_v36, %v5744_v15  ;;  %vm1105_vm13 = vcmp.eq.s32.totalorder %v5321_v37, %v5749_v16 }
  0x4c   :  { %vm3911_vm4 = vmpackc.low %vm1107_vm2, %vm1106_vm15  ;;  %vm738_vm15 = vcmp.eq.s32.totalorder %v5351_v39, %v5744_v15  ;;  %vm606_vm2 = vcmp.eq.s32.totalorder %v5415_v47, %v5315_v35 }
  0x4d   :  { %vm3781_vm9 = vmpackc.low %vm469_vm5, %vm468_vm3  ;;  %vm718_vm5 = vcmp.eq.s32.totalorder %v5357_v41, %v5744_v15 }
  0x4e   :  { %vm3817_vm14 = vmpackc.low %vm721_vm10, %vm720_vm8  ;;  %vm1102_vm8 = vcmp.eq.s32.totalorder %v5357_v41, %v5749_v16 }
  0x4f   :  { %3782 = vmatpush.bf16.msk.msra.mxu3 %vm3781_vm9, %v5152_v38  ;;  %vm3913_vm3 = vmpackc.low %vm1105_vm13, %vm1104_vm11  ;;  %vm1103_vm9 = vcmp.eq.s32.totalorder %v5360_v42, %v5749_v16  ;;  %vm736_vm11 = vcmp.eq.s32.totalorder %v5363_v43, %v5744_v15 }
  0x74   :  { %v5646_v4 = vpop.permute.xlu0 %56  ;;  %v5751_v17 = vpop.permute.xlu1 %66 }
  0x7c   :  { %v62_v8 = vpop.permute.xlu0 %61  ;;  %v72_v27 = vpop.permute.xlu1 %71 }
  0x89   :  { %v120_v5 = vpop.f32.mrf.mxu0 }
  0x8a   :  { %v121_v7 = vadd.f32 %v120_v5, %v5646_v4 }
  0x8c   :  { %v149_v11 = vmax.f32 %v121_v7, 0.0 }
  0x8f   :  { %v139_v6 = vpop.f32.mrf.mxu3 }
  0x90   :  { %v140_v13 = vadd.f32 %v139_v6, %v5646_v4 }
  0x91   :  { %v122_v9 = vpop.f32.mrf.mxu0 }
  0x92   :  { %v123_v10 = vadd.f32 %v122_v9, %v62_v8  ;;  %v150_v22 = vmax.f32 %v140_v13, 0.0 }
  0x94   :  { %v151_v12 = vmax.f32 %v123_v10, 0.0 }
  0x96   :  { %v5735_v14 = vpack.c.bf16 %v151_v12, %v149_v11 }
  0x97   :  { %v141_v18 = vpop.f32.mrf.mxu3 }
  0x98   :  { %v142_v20 = vadd.f32 %v141_v18, %v62_v8  ;;  %284 = vmatmul.bf16.vlgmr.msra.gmra.mxu2 %v5735_v14  ;;  %412 = vmatmul.bf16.vlgmr.msra.gmra.mxu1 %v5735_v14 }
  0x99   :  { %668 = vmatmul.bf16.vlgmr.msrb.gmra.mxu0 %v5735_v14  ;;  %v125_v21 = vpop.f32.mrf.mxu0  ;;  %3800 = vmatpush.bf16.msk.msra.mxu1 %vm3799_vm12, %v5152_v38  ;;  %vm3801_vm12 = vmpackc.low %vm609_vm7, %vm608_vm6  ;;  %vm719_vm6 = vcmp.eq.s32.totalorder %v5360_v42, %v5744_v15 }
  0x9a   :  { %v152_v23 = vmax.f32 %v142_v20, 0.0  ;;  %3816 = vmatpush.bf16.msk.msra.mxu2 %vm3815_vm1, %v5152_v38  ;;  %3912 = vmatpush.bf16.msk.msrb.mxu0 %vm3911_vm4, %v5152_v38  ;;  %vm739_vm1 = vcmp.eq.s32.totalorder %v5354_v40, %v5744_v15  ;;  %vm607_vm4 = vcmp.eq.s32.totalorder %v5418_v48, %v5315_v35  ;;  %v126_v26 = vadd.f32 %v125_v21, %v5751_v17  ;;  %vm3819_vm13 = vmpackc.low %vm719_vm6, %vm718_vm5 }
  0x9b   :  { %vm3831_vm7 = vmpackc.low %vm739_vm1, %vm738_vm15  ;;  %vm605_vm15 = vcmp.eq.s32.totalorder %v5450_v52, %v5315_v35  ;;  %vm1100_vm5 = vcmp.eq.s32.totalorder %v5374_v45, %v5749_v16  ;;  %vm1101_vm6 = vcmp.eq.s32.totalorder %v5377_v46, %v5749_v16 }
  0x9c   :  { %v5795_v24 = vpack.c.bf16 %v152_v23, %v150_v22  ;;  %vm3803_vm10 = vmpackc.low %vm607_vm4, %vm606_vm2  ;;  %vm716_vm2 = vcmp.eq.s32.totalorder %v5374_v45, %v5744_v15  ;;  %v153_v31 = vmax.f32 %v126_v26, 0.0 }
  0x9d   :  { %3802 = vmatpush.bf16.msk.msra.mxu1 %vm3801_vm12, %v5152_v38  ;;  %vm737_vm12 = vcmp.eq.s32.totalorder %v5366_v44, %v5744_v15  ;;  %vm3915_vm1 = vmpackc.low %vm1103_vm9, %vm1102_vm8  ;;  %vm734_vm8 = vcmp.eq.s32.totalorder %v5415_v47, %v5744_v15  ;;  %vm735_vm9 = vcmp.eq.s32.totalorder %v5418_v48, %v5744_v15 }
  0x9e   :  { %303 = vmatmul.bf16.vlgmr.msrb.gmra.mxu3 %v5795_v24  ;;  %3818 = vmatpush.bf16.msk.msra.mxu2 %vm3817_vm14, %v5152_v38  ;;  %vm604_vm14 = vcmp.eq.s32.totalorder %v5441_v51, %v5315_v35  ;;  %vm3833_vm4 = vmpackc.low %vm737_vm12, %vm736_vm11 }
  0x9f   :  { %v144_v25 = vpop.f32.mrf.mxu3  ;;  %3914 = vmatpush.bf16.msk.msrb.mxu0 %vm3913_vm3, %v5152_v38  ;;  %3832 = vmatpush.bf16.msk.msrb.mxu3 %vm3831_vm7, %v5152_v38  ;;  %vm717_vm3 = vcmp.eq.s32.totalorder %v5377_v46, %v5744_v15  ;;  %vm3805_vm7 = vmpackc.low %vm605_vm15, %vm604_vm14  ;;  %vm603_vm14 = vcmp.eq.s32.totalorder %v5482_v56, %v5315_v35 }
  0xa0   :  { %v145_v0 = vadd.f32 %v144_v25, %v5751_v17  ;;  %vm3917_vm11 = vmpackc.low %vm1101_vm6, %vm1100_vm5  ;;  %vm1099_vm5 = vcmp.eq.s32.totalorder %v5429_v50, %v5749_v16  ;;  %vm732_vm6 = vcmp.eq.s32.totalorder %v5441_v51, %v5744_v15 }
  0xa1   :  { %v127_v28 = vpop.f32.mrf.mxu0  ;;  %3804 = vmatpush.bf16.msk.msra.mxu1 %vm3803_vm10, %v5152_v38  ;;  %vm3821_vm10 = vmpackc.low %vm717_vm3, %vm716_vm2  ;;  %vm715_vm2 = vcmp.eq.s32.totalorder %v5429_v50, %v5744_v15  ;;  %vm1098_vm3 = vcmp.eq.s32.totalorder %v5426_v49, %v5749_v16 }
  0xa2   :  { %v128_v29 = vadd.f32 %v127_v28, %v72_v27  ;;  %3820 = vmatpush.bf16.msk.msra.mxu2 %vm3819_vm13, %v5152_v38  ;;  %vm3835_vm12 = vmpackc.low %vm735_vm9, %vm734_vm8  ;;  %vm602_vm13 = vcmp.eq.s32.totalorder %v5479_v55, %v5315_v35  ;;  %v154_v7 = vmax.f32 %v145_v0, 0.0  ;;  %vm600_vm9 = vcmp.eq.s32.totalorder %v5511_v59, %v5315_v35 }
  0xa3   :  { %3916 = vmatpush.bf16.msk.msrb.mxu0 %vm3915_vm1, %v5152_v38  ;;  %3834 = vmatpush.bf16.msk.msrb.mxu3 %vm3833_vm4, %v5152_v38  ;;  %vm3807_vm15 = vmpackc.low %vm603_vm14, %vm602_vm13  ;;  %vm714_vm1 = vcmp.eq.s32.totalorder %v5426_v49, %v5744_v15  ;;  %vm1096_vm14 = vcmp.eq.s32.totalorder %v5456_v53, %v5749_v16 }
  0xa4   :  { %v155_v32 = vmax.f32 %v128_v29, 0.0  ;;  %vm3823_vm4 = vmpackc.low %vm715_vm2, %vm714_vm1 }
  0xa5   :  { %3806 = vmatpush.bf16.msk.msra.mxu1 %vm3805_vm7, %v5152_v38  ;;  %vm733_vm7 = vcmp.eq.s32.totalorder %v5450_v52, %v5744_v15  ;;  %vm3919_vm8 = vmpackc.low %vm1099_vm5, %vm1098_vm3  ;;  %vm730_vm3 = vcmp.eq.s32.totalorder %v5479_v55, %v5744_v15  ;;  %vm598_vm5 = vcmp.eq.s32.totalorder %v5540_v62, %v5315_v35 }
  0xa6   :  { %v5858_v4 = vpack.c.bf16 %v155_v32, %v153_v31  ;;  %3822 = vmatpush.bf16.msk.msra.mxu2 %vm3821_vm10, %v5152_v38  ;;  %vm601_vm10 = vcmp.eq.s32.totalorder %v5514_v60, %v5315_v35  ;;  %vm3837_vm13 = vmpackc.low %vm733_vm7, %vm732_vm6  ;;  %vm599_vm7 = vcmp.eq.s32.totalorder %v5543_v63, %v5315_v35 }
  0xa7   :  { %v146_v5 = vpop.f32.mrf.mxu3  ;;  %3836 = vmatpush.bf16.msk.msrb.mxu3 %vm3835_vm12, %v5152_v38  ;;  %3918 = vmatpush.bf16.msk.msrb.mxu0 %vm3917_vm11, %v5152_v38  ;;  %vm712_vm11 = vcmp.eq.s32.totalorder %v5456_v53, %v5744_v15  ;;  %vm713_vm12 = vcmp.eq.s32.totalorder %v5459_v54, %v5744_v15  ;;  %vm3809_vm1 = vmpackc.low %vm601_vm10, %vm600_vm9  ;;  %vm711_vm9 = vcmp.eq.s32.totalorder %v5489_v58, %v5744_v15 }
  0xa8   :  { %v147_v6 = vadd.f32 %v146_v5, %v72_v27  ;;  %289 = vmatmul.bf16.gmra.mxu2 %v5858_v4  ;;  %417 = vmatmul.bf16.gmra.mxu1 %v5858_v4  ;;  %vm3825_vm2 = vmpackc.low %vm713_vm12, %vm712_vm11  ;;  %vm1094_vm11 = vcmp.eq.s32.totalorder %v5486_v57, %v5749_v16  ;;  %vm1095_vm12 = vcmp.eq.s32.totalorder %v5489_v58, %v5749_v16 }
  0xa9   :  { %673 = vmatmul.bf16.gmra.mxu0 %v5858_v4  ;;  %3808 = vmatpush.bf16.msk.msra.mxu1 %vm3807_vm15, %v5152_v38  ;;  %vm1097_vm15 = vcmp.eq.s32.totalorder %v5459_v54, %v5749_v16 }
  0xaa   :  { %v156_v8 = vmax.f32 %v147_v6, 0.0  ;;  %3824 = vmatpush.bf16.msk.msra.mxu2 %vm3823_vm4, %v5152_v38  ;;  %vm731_vm4 = vcmp.eq.s32.totalorder %v5482_v56, %v5744_v15  ;;  %vm3921_vm6 = vmpackc.low %vm1097_vm15, %vm1096_vm14  ;;  %vm728_vm14 = vcmp.eq.s32.totalorder %v5511_v59, %v5744_v15  ;;  %vm729_vm15 = vcmp.eq.s32.totalorder %v5514_v60, %v5744_v15 }
  0xab   :  { %3838 = vmatpush.bf16.msk.msrb.mxu3 %vm3837_vm13, %v5152_v38  ;;  %3920 = vmatpush.bf16.msk.msrb.mxu0 %vm3919_vm8, %v5152_v38  ;;  %vm710_vm8 = vcmp.eq.s32.totalorder %v5486_v57, %v5744_v15  ;;  %vm3839_vm10 = vmpackc.low %vm731_vm4, %vm730_vm3  ;;  %vm597_vm3 = vcmp.eq.s32.totalorder %v5579_v3, %v5315_v35 }
  0xac   :  { %v5896_v9 = vpack.c.bf16 %v156_v8, %v154_v7  ;;  %vm3811_vm13 = vmpackc.low %vm599_vm7, %vm598_vm5  ;;  %vm708_vm5 = vcmp.eq.s32.totalorder %v5294_v30, %v5744_v15  ;;  %vm709_vm7 = vcmp.eq.s32.totalorder %v5518_v61, %v5744_v15 }
  0xad   :  { %3810 = vmatpush.bf16.msk.msra.mxu1 %vm3809_vm1, %v5152_v38  ;;  %vm3827_vm1 = vmpackc.low %vm711_vm9, %vm710_vm8  ;;  %vm1093_vm8 = vcmp.eq.s32.totalorder %v5518_v61, %v5749_v16 }
  0xae   :  { %308 = vmatmul.bf16.gmra.mxu3 %v5896_v9  ;;  %3826 = vmatpush.bf16.msk.msra.mxu2 %vm3825_vm2, %v5152_v38  ;;  %vm596_vm2 = vcmp.eq.s32.totalorder %v5576_v2, %v5315_v35  ;;  %vm3923_vm4 = vmpackc.low %vm1095_vm12, %vm1094_vm11  ;;  %vm727_vm11 = vcmp.eq.s32.totalorder %v5543_v63, %v5744_v15  ;;  %v5952_v35 = vld [vmem:[%s7121_s3 + $0x6] ss:$0 sm:$0xff] }
  0xaf   :  { %3840 = vmatpush.bf16.msk.msrb.mxu3 %vm3839_vm10, %v5152_v38  ;;  %3922 = vmatpush.bf16.msk.msrb.mxu0 %vm3921_vm6, %v5152_v38  ;;  %vm3841_vm10 = vmpackc.low %vm729_vm15, %vm728_vm14  ;;  %vm1092_vm6 = vcmp.eq.s32.totalorder %v5294_v30, %v5749_v16 }
  0xb0   :  { %vm3813_vm9 = vmpackc.low %vm597_vm3, %vm596_vm2  ;;  %vm867_vm2 = vcmp.eq.s32.totalorder %v5354_v40, %v5559_v1  ;;  %vm978_vm3 = vcmp.eq.s32.totalorder %v5307_v33, %v5952_v35 }
  0xb1   :  { %3812 = vmatpush.bf16.msk.msra.mxu1 %vm3811_vm13, %v5152_v38  ;;  %vm726_vm13 = vcmp.eq.s32.totalorder %v5540_v62, %v5744_v15  ;;  %vm3829_vm12 = vmpackc.low %vm709_vm7, %vm708_vm5  ;;  %vm979_vm5 = vcmp.eq.s32.totalorder %v5310_v34, %v5952_v35  ;;  %vm724_vm7 = vcmp.eq.s32.totalorder %v5576_v2, %v5744_v15 }
  0xb2   :  { %3828 = vmatpush.bf16.msk.msra.mxu2 %vm3827_vm1, %v5152_v38  ;;  %vm3925_vm14 = vmpackc.low %vm1093_vm8, %vm1092_vm6  ;;  %vm866_vm1 = vcmp.eq.s32.totalorder %v5351_v39, %v5559_v1  ;;  %vm864_vm8 = vcmp.eq.s32.totalorder %v5363_v43, %v5559_v1 }
  0xb3   :  { %3842 = vmatpush.bf16.msk.msrb.mxu3 %vm3841_vm10, %v5152_v38  ;;  %3924 = vmatpush.bf16.msk.msrb.mxu0 %vm3923_vm4, %v5152_v38  ;;  %vm3843_vm15 = vmpackc.low %vm727_vm11, %vm726_vm13  ;;  %vm725_vm10 = vcmp.eq.s32.totalorder %v5579_v3, %v5744_v15  ;;  %vm976_vm13 = vcmp.eq.s32.totalorder %v5318_v36, %v5952_v35 }
  0xb4   :  { %vm3863_vm4 = vmpackc.low %vm867_vm2, %vm866_vm1  ;;  %vm994_vm1 = vcmp.eq.s32.totalorder %v5351_v39, %v5952_v35  ;;  %vm995_vm2 = vcmp.eq.s32.totalorder %v5354_v40, %v5952_v35 }
  0xb5   :  { %3814 = vmatpush.bf16.msk.msra.mxu1 %vm3813_vm9, %v5152_v38  ;;  %vm3879_vm6 = vmpackc.low %vm979_vm5, %vm978_vm3  ;;  %vm865_vm9 = vcmp.eq.s32.totalorder %v5366_v44, %v5559_v1  ;;  %vm862_vm3 = vcmp.eq.s32.totalorder %v5415_v47, %v5559_v1  ;;  %vm863_vm5 = vcmp.eq.s32.totalorder %v5418_v48, %v5559_v1 }
  0xb6   :  { %3830 = vmatpush.bf16.msk.msra.mxu2 %vm3829_vm12, %v5152_v38  ;;  %vm3845_vm11 = vmpackc.low %vm725_vm10, %vm724_vm7  ;;  %vm977_vm12 = vcmp.eq.s32.totalorder %v5321_v37, %v5952_v35  ;;  %vm974_vm7 = vcmp.eq.s32.totalorder %v5357_v41, %v5952_v35  ;;  %vm975_vm10 = vcmp.eq.s32.totalorder %v5360_v42, %v5952_v35 }
  0xb7   :  { %3844 = vmatpush.bf16.msk.msrb.mxu3 %vm3843_vm15, %v5152_v38  ;;  %3926 = vmatpush.bf16.msk.msrb.mxu0 %vm3925_vm14, %v5152_v38  ;;  %vm3865_vm15 = vmpackc.low %vm865_vm9, %vm864_vm8  ;;  %vm993_vm9 = vcmp.eq.s32.totalorder %v5366_v44, %v5952_v35 }
  0xb8   :  { %431 = vmatmul.bf16.vlgmr.msrb.gmra.mxu1 %v5795_v24  ;;  %540 = vmatmul.bf16.vlgmr.msrb.gmra.mxu2 %v5735_v14  ;;  %vm3881_vm14 = vmpackc.low %vm977_vm12, %vm976_vm13  ;;  %vm860_vm13 = vcmp.eq.s32.totalorder %v5441_v51, %v5559_v1 }
  0xb9   :  { %924 = vmatmul.bf16.vlgmr.msra.gmra.mxu0 %v5735_v14  ;;  %3864 = vmatpush.bf16.msk.msrb.mxu1 %vm3863_vm4, %v5152_v38  ;;  %vm3895_vm4 = vmpackc.low %vm995_vm2, %vm994_vm1 }
  0xba   :  { %3880 = vmatpush.bf16.msk.msrb.mxu2 %vm3879_vm6, %v5152_v38  ;;  %vm992_vm6 = vcmp.eq.s32.totalorder %v5363_v43, %v5952_v35  ;;  %vm3867_vm8 = vmpackc.low %vm863_vm5, %vm862_vm3  ;;  %vm990_vm3 = vcmp.eq.s32.totalorder %v5415_v47, %v5952_v35 }
  0xbb   :  { %3846 = vmatpush.bf16.msk.msrb.mxu3 %vm3845_vm11, %v5152_v38  ;;  %vm861_vm11 = vcmp.eq.s32.totalorder %v5450_v52, %v5559_v1  ;;  %vm3883_vm12 = vmpackc.low %vm975_vm10, %vm974_vm7  ;;  %vm858_vm10 = vcmp.eq.s32.totalorder %v5479_v55, %v5559_v1 }
  0xbc   :  { %vm3897_vm1 = vmpackc.low %vm993_vm9, %vm992_vm6  ;;  %vm859_vm6 = vcmp.eq.s32.totalorder %v5482_v56, %v5559_v1 }
  0xbd   :  { %3866 = vmatpush.bf16.msk.msrb.mxu1 %vm3865_vm15, %v5152_v38  ;;  %vm972_vm15 = vcmp.eq.s32.totalorder %v5374_v45, %v5952_v35  ;;  %vm3869_vm2 = vmpackc.low %vm861_vm11, %vm860_vm13  ;;  %vm971_vm13 = vcmp.eq.s32.totalorder %v5429_v50, %v5952_v35  ;;  %vm988_vm11 = vcmp.eq.s32.totalorder %v5441_v51, %v5952_v35 }
  0xbe   :  { %559 = vmatmul.bf16.vlgmr.msra.gmra.mxu3 %v5795_v24  ;;  %3882 = vmatpush.bf16.msk.msrb.mxu2 %vm3881_vm14, %v5152_v38  ;;  %vm973_vm14 = vcmp.eq.s32.totalorder %v5377_v46, %v5952_v35  ;;  %vm3871_vm9 = vmpackc.low %vm859_vm6, %vm858_vm10  ;;  %vm986_vm10 = vcmp.eq.s32.totalorder %v5479_v55, %v5952_v35  ;;  %vm987_vm6 = vcmp.eq.s32.totalorder %v5482_v56, %v5952_v35 }
  0xbf   :  { %3896 = vmatpush.bf16.msk.msra.mxu3 %vm3895_vm4, %v5152_v38  ;;  %vm991_vm4 = vcmp.eq.s32.totalorder %v5418_v48, %v5952_v35  ;;  %vm3885_vm5 = vmpackc.low %vm973_vm14, %vm972_vm15  ;;  %vm856_vm14 = vcmp.eq.s32.totalorder %v5511_v59, %v5559_v1 }
  0xc0   :  { %vm3899_vm7 = vmpackc.low %vm991_vm4, %vm990_vm3  ;;  %vm969_vm3 = vcmp.eq.s32.totalorder %v5459_v54, %v5952_v35 }
  0xc1   :  { %3868 = vmatpush.bf16.msk.msrb.mxu1 %vm3867_vm8, %v5152_v38  ;;  %vm970_vm8 = vcmp.eq.s32.totalorder %v5426_v49, %v5952_v35 }
  0xc2   :  { %3884 = vmatpush.bf16.msk.msrb.mxu2 %vm3883_vm12, %v5152_v38  ;;  %vm989_vm12 = vcmp.eq.s32.totalorder %v5450_v52, %v5952_v35  ;;  %vm3887_vm15 = vmpackc.low %vm971_vm13, %vm970_vm8  ;;  %vm854_vm8 = vcmp.eq.s32.totalorder %v5540_v62, %v5559_v1  ;;  %vm855_vm13 = vcmp.eq.s32.totalorder %v5543_v63, %v5559_v1 }
  0xc3   :  { %3898 = vmatpush.bf16.msk.msra.mxu3 %vm3897_vm1, %v5152_v38  ;;  %vm857_vm1 = vcmp.eq.s32.totalorder %v5514_v60, %v5559_v1  ;;  %vm3901_vm4 = vmpackc.low %vm989_vm12, %vm988_vm11  ;;  %vm966_vm11 = vcmp.eq.s32.totalorder %v5486_v57, %v5952_v35  ;;  %vm967_vm12 = vcmp.eq.s32.totalorder %v5489_v58, %v5952_v35 }
  0xc5   :  { %3870 = vmatpush.bf16.msk.msrb.mxu1 %vm3869_vm2, %v5152_v38  ;;  %vm968_vm2 = vcmp.eq.s32.totalorder %v5456_v53, %v5952_v35 }
  0xc6   :  { %3886 = vmatpush.bf16.msk.msrb.mxu2 %vm3885_vm5, %v5152_v38  ;;  %vm3873_vm5 = vmpackc.low %vm857_vm1, %vm856_vm14  ;;  %vm985_vm1 = vcmp.eq.s32.totalorder %v5514_v60, %v5952_v35 }
  0xc7   :  { %3900 = vmatpush.bf16.msk.msra.mxu3 %vm3899_vm7, %v5152_v38  ;;  %vm3889_vm7 = vmpackc.low %vm969_vm3, %vm968_vm2  ;;  %vm852_vm2 = vcmp.eq.s32.totalorder %v5576_v2, %v5559_v1  ;;  %vm853_vm3 = vcmp.eq.s32.totalorder %v5579_v3, %v5559_v1  ;;  %v6087_v1 = vld [vmem:[%s7121_s3 + $0x8] ss:$0 sm:$0xff] }
  0xc8   :  { %436 = vmatmul.bf16.gmra.mxu1 %v5896_v9  ;;  %545 = vmatmul.bf16.gmra.mxu2 %v5858_v4  ;;  %vm3875_vm14 = vmpackc.low %vm855_vm13, %vm854_vm8  ;;  %vm982_vm8 = vcmp.eq.s32.totalorder %v5540_v62, %v5952_v35  ;;  %vm983_vm13 = vcmp.eq.s32.totalorder %v5543_v63, %v5952_v35 }
  0xc9   :  { %929 = vmatmul.bf16.gmra.mxu0 %v5858_v4  ;;  %3872 = vmatpush.bf16.msk.msrb.mxu1 %vm3871_vm9, %v5152_v38  ;;  %vm3903_vm9 = vmpackc.low %vm987_vm6, %vm986_vm10 }
  0xca   :  { %3888 = vmatpush.bf16.msk.msrb.mxu2 %vm3887_vm15, %v5152_v38  ;;  %vm984_vm15 = vcmp.eq.s32.totalorder %v5511_v59, %v5952_v35  ;;  %vm3877_vm6 = vmpackc.low %vm853_vm3, %vm852_vm2  ;;  %vm1235_vm2 = vcmp.eq.s32.totalorder %v5310_v34, %v6087_v1  ;;  %vm980_vm3 = vcmp.eq.s32.totalorder %v5576_v2, %v5952_v35 }
  0xcb   :  { %3902 = vmatpush.bf16.msk.msra.mxu3 %vm3901_vm4, %v5152_v38  ;;  %vm3891_vm4 = vmpackc.low %vm967_vm12, %vm966_vm11  ;;  %vm1122_vm12 = vcmp.eq.s32.totalorder %v5351_v39, %v5749_v16 }
  0xcc   :  { %vm3905_vm10 = vmpackc.low %vm985_vm1, %vm984_vm15  ;;  %vm1123_vm15 = vcmp.eq.s32.totalorder %v5354_v40, %v5749_v16 }
  0xcd   :  { %3874 = vmatpush.bf16.msk.msrb.mxu1 %vm3873_vm5, %v5152_v38  ;;  %vm964_vm5 = vcmp.eq.s32.totalorder %v5294_v30, %v5952_v35  ;;  %vm3907_vm11 = vmpackc.low %vm983_vm13, %vm982_vm8  ;;  %vm1233_vm8 = vcmp.eq.s32.totalorder %v5321_v37, %v6087_v1 }
  0xce   :  { %564 = vmatmul.bf16.gmra.mxu3 %v5896_v9  ;;  %3890 = vmatpush.bf16.msk.msrb.mxu2 %vm3889_vm7, %v5152_v38  ;;  %vm965_vm7 = vcmp.eq.s32.totalorder %v5518_v61, %v5952_v35  ;;  %vm3927_vm1 = vmpackc.low %vm1123_vm15, %vm1122_vm12  ;;  %vm1250_vm12 = vcmp.eq.s32.totalorder %v5351_v39, %v6087_v1  ;;  %vm1251_vm15 = vcmp.eq.s32.totalorder %v5354_v40, %v6087_v1 }
  0xcf   :  { %3904 = vmatpush.bf16.msk.msra.mxu3 %vm3903_vm9, %v5152_v38  ;;  %vm3893_vm9 = vmpackc.low %vm965_vm7, %vm964_vm5  ;;  %vm1120_vm7 = vcmp.eq.s32.totalorder %v5363_v43, %v5749_v16 }
  0xd1   :  { %3876 = vmatpush.bf16.msk.msrb.mxu1 %vm3875_vm14, %v5152_v38  ;;  %vm1234_vm14 = vcmp.eq.s32.totalorder %v5307_v33, %v6087_v1 }
  0xd2   :  { %3892 = vmatpush.bf16.msk.msrb.mxu2 %vm3891_vm4, %v5152_v38  ;;  %vm981_vm4 = vcmp.eq.s32.totalorder %v5579_v3, %v5952_v35  ;;  %vm3943_vm5 = vmpackc.low %vm1235_vm2, %vm1234_vm14  ;;  %vm1118_vm14 = vcmp.eq.s32.totalorder %v5415_v47, %v5749_v16  ;;  %vm1119_vm2 = vcmp.eq.s32.totalorder %v5418_v48, %v5749_v16 }
  0xd3   :  { %3906 = vmatpush.bf16.msk.msra.mxu3 %vm3905_vm10, %v5152_v38  ;;  %vm1121_vm10 = vcmp.eq.s32.totalorder %v5366_v44, %v5749_v16  ;;  %vm3909_vm13 = vmpackc.low %vm981_vm4, %vm980_vm3  ;;  %vm1230_vm3 = vcmp.eq.s32.totalorder %v5357_v41, %v6087_v1  ;;  %vm1231_vm4 = vcmp.eq.s32.totalorder %v5360_v42, %v6087_v1 }
  0xd5   :  { %3878 = vmatpush.bf16.msk.msrb.mxu1 %vm3877_vm6, %v5152_v38  ;;  %vm1232_vm6 = vcmp.eq.s32.totalorder %v5318_v36, %v6087_v1 }
  0xd6   :  { %3894 = vmatpush.bf16.msk.msrb.mxu2 %vm3893_vm9, %v5152_v38  ;;  %vm3929_vm9 = vmpackc.low %vm1121_vm10, %vm1120_vm7  ;;  %vm1249_vm10 = vcmp.eq.s32.totalorder %v5366_v44, %v6087_v1 }
  0xd7   :  { %3908 = vmatpush.bf16.msk.msra.mxu3 %vm3907_vm11, %v5152_v38  ;;  %vm3945_vm11 = vmpackc.low %vm1233_vm8, %vm1232_vm6  ;;  %vm1116_vm6 = vcmp.eq.s32.totalorder %v5441_v51, %v5749_v16  ;;  %vm1117_vm8 = vcmp.eq.s32.totalorder %v5450_v52, %v5749_v16 }
  0xd8   :  { %687 = vmatmul.bf16.vlgmr.msra.gmra.mxu1 %v5795_v24  ;;  %796 = vmatmul.bf16.vlgmr.msra.gmra.mxu2 %v5735_v14  ;;  %vm3931_vm7 = vmpackc.low %vm1119_vm2, %vm1118_vm14  ;;  %vm1246_vm14 = vcmp.eq.s32.totalorder %v5415_v47, %v6087_v1 }
  0xd9   :  { %1180 = vmatmul.bf16.vlgmr.msrb.gmra.mxu0 %v5735_v14  ;;  %3928 = vmatpush.bf16.msk.msra.mxu1 %vm3927_vm1, %v5152_v38  ;;  %vm3959_vm1 = vmpackc.low %vm1251_vm15, %vm1250_vm12 }
  0xda   :  { %3944 = vmatpush.bf16.msk.msra.mxu2 %vm3943_vm5, %v5152_v38  ;;  %vm1248_vm5 = vcmp.eq.s32.totalorder %v5363_v43, %v6087_v1  ;;  %vm3933_vm15 = vmpackc.low %vm1117_vm8, %vm1116_vm6  ;;  %vm1227_vm6 = vcmp.eq.s32.totalorder %v5429_v50, %v6087_v1  ;;  %vm1244_vm8 = vcmp.eq.s32.totalorder %v5441_v51, %v6087_v1 }
  0xdb   :  { %3910 = vmatpush.bf16.msk.msra.mxu3 %vm3909_vm13, %v5152_v38  ;;  %vm3947_vm13 = vmpackc.low %vm1231_vm4, %vm1230_vm3  ;;  %vm1114_vm4 = vcmp.eq.s32.totalorder %v5479_v55, %v5749_v16 }
  0xdc   :  { %vm3961_vm12 = vmpackc.low %vm1249_vm10, %vm1248_vm5  ;;  %vm1115_vm5 = vcmp.eq.s32.totalorder %v5482_v56, %v5749_v16 }
  0xdd   :  { %3930 = vmatpush.bf16.msk.msra.mxu1 %vm3929_vm9, %v5152_v38  ;;  %vm1228_vm9 = vcmp.eq.s32.totalorder %v5374_v45, %v6087_v1  ;;  %vm3935_vm10 = vmpackc.low %vm1115_vm5, %vm1114_vm4  ;;  %vm1242_vm4 = vcmp.eq.s32.totalorder %v5479_v55, %v6087_v1  ;;  %vm1243_vm5 = vcmp.eq.s32.totalorder %v5482_v56, %v6087_v1 }
  0xde   :  { %815 = vmatmul.bf16.vlgmr.msrb.gmra.mxu3 %v5795_v24  ;;  %3946 = vmatpush.bf16.msk.msra.mxu2 %vm3945_vm11, %v5152_v38  ;;  %vm1229_vm11 = vcmp.eq.s32.totalorder %v5377_v46, %v6087_v1 }
  0xdf   :  { %3960 = vmatpush.bf16.msk.msrb.mxu3 %vm3959_vm1, %v5152_v38  ;;  %vm1247_vm1 = vcmp.eq.s32.totalorder %v5418_v48, %v6087_v1  ;;  %vm3949_vm2 = vmpackc.low %vm1229_vm11, %vm1228_vm9  ;;  %vm1112_vm11 = vcmp.eq.s32.totalorder %v5511_v59, %v5749_v16 }
  0xe0   :  { %vm3963_vm3 = vmpackc.low %vm1247_vm1, %vm1246_vm14  ;;  %vm1225_vm14 = vcmp.eq.s32.totalorder %v5459_v54, %v6087_v1 }
  0xe1   :  { %3932 = vmatpush.bf16.msk.msra.mxu1 %vm3931_vm7, %v5152_v38  ;;  %vm1226_vm7 = vcmp.eq.s32.totalorder %v5426_v49, %v6087_v1 }
  0xe2   :  { %3948 = vmatpush.bf16.msk.msra.mxu2 %vm3947_vm13, %v5152_v38  ;;  %vm1245_vm13 = vcmp.eq.s32.totalorder %v5450_v52, %v6087_v1  ;;  %vm3951_vm9 = vmpackc.low %vm1227_vm6, %vm1226_vm7  ;;  %vm1110_vm7 = vcmp.eq.s32.totalorder %v5540_v62, %v5749_v16  ;;  %vm1111_vm6 = vcmp.eq.s32.totalorder %v5543_v63, %v5749_v16 }
  0xe3   :  { %3962 = vmatpush.bf16.msk.msrb.mxu3 %vm3961_vm12, %v5152_v38  ;;  %vm1113_vm12 = vcmp.eq.s32.totalorder %v5514_v60, %v5749_v16  ;;  %vm3965_vm1 = vmpackc.low %vm1245_vm13, %vm1244_vm8  ;;  %vm1222_vm8 = vcmp.eq.s32.totalorder %v5486_v57, %v6087_v1  ;;  %vm1223_vm13 = vcmp.eq.s32.totalorder %v5489_v58, %v6087_v1 }
  0xe5   :  { %3934 = vmatpush.bf16.msk.msra.mxu1 %vm3933_vm15, %v5152_v38  ;;  %vm1224_vm15 = vcmp.eq.s32.totalorder %v5456_v53, %v6087_v1 }
  0xe6   :  { %3950 = vmatpush.bf16.msk.msra.mxu2 %vm3949_vm2, %v5152_v38  ;;  %vm3937_vm2 = vmpackc.low %vm1113_vm12, %vm1112_vm11  ;;  %vm1241_vm12 = vcmp.eq.s32.totalorder %v5514_v60, %v6087_v1 }
  0xe7   :  { %3964 = vmatpush.bf16.msk.msrb.mxu3 %vm3963_vm3, %v5152_v38  ;;  %vm3953_vm3 = vmpackc.low %vm1225_vm14, %vm1224_vm15 }
  0xe8   :  { %692 = vmatmul.bf16.gmra.mxu1 %v5896_v9  ;;  %801 = vmatmul.bf16.gmra.mxu2 %v5858_v4  ;;  %vm3939_vm11 = vmpackc.low %vm1111_vm6, %vm1110_vm7  ;;  %vm1239_vm6 = vcmp.eq.s32.totalorder %v5543_v63, %v6087_v1 }
  0xe9   :  { %1185 = vmatmul.bf16.gmra.mxu0 %v5858_v4  ;;  %3936 = vmatpush.bf16.msk.msra.mxu1 %vm3935_vm10, %v5152_v38  ;;  %vm3967_vm10 = vmpackc.low %vm1243_vm5, %vm1242_vm4  ;;  %vm1221_vm4 = vcmp.eq.s32.totalorder %v5518_v61, %v6087_v1 }
  0xea   :  { %3952 = vmatpush.bf16.msk.msra.mxu2 %vm3951_vm9, %v5152_v38  ;;  %vm1240_vm9 = vcmp.eq.s32.totalorder %v5511_v59, %v6087_v1  ;;  %vm3955_vm15 = vmpackc.low %vm1223_vm13, %vm1222_vm8  ;;  %vm1236_vm13 = vcmp.eq.s32.totalorder %v5576_v2, %v6087_v1 }
  0xeb   :  { %3966 = vmatpush.bf16.msk.msrb.mxu3 %vm3965_vm1, %v5152_v38  ;;  %vm3969_vm14 = vmpackc.low %vm1241_vm12, %vm1240_vm9  ;;  %vm1108_vm1 = vcmp.eq.s32.totalorder %v5576_v2, %v5749_v16  ;;  %vm1237_vm9 = vcmp.eq.s32.totalorder %v5579_v3, %v6087_v1 }
  0xed   :  { %3938 = vmatpush.bf16.msk.msra.mxu1 %vm3937_vm2, %v5152_v38  ;;  %vm1109_vm2 = vcmp.eq.s32.totalorder %v5579_v3, %v5749_v16 }
  0xee   :  { %820 = vmatmul.bf16.gmra.mxu3 %v5896_v9  ;;  %3954 = vmatpush.bf16.msk.msra.mxu2 %vm3953_vm3, %v5152_v38  ;;  %vm1220_vm3 = vcmp.eq.s32.totalorder %v5294_v30, %v6087_v1  ;;  %vm3941_vm5 = vmpackc.low %vm1109_vm2, %vm1108_vm1 }
  0xef   :  { %3968 = vmatpush.bf16.msk.msrb.mxu3 %vm3967_vm10, %v5152_v38  ;;  %vm3957_vm7 = vmpackc.low %vm1221_vm4, %vm1220_vm3  ;;  %vm1238_vm10 = vcmp.eq.s32.totalorder %v5540_v62, %v6087_v1 }
  0xf0   :  { %vm3971_vm8 = vmpackc.low %vm1239_vm6, %vm1238_vm10 }
  0xf1   :  { %3940 = vmatpush.bf16.msk.msra.mxu1 %vm3939_vm11, %v5152_v38  ;;  %vm3973_vm11 = vmpackc.low %vm1237_vm9, %vm1236_vm13 }
  0xf2   :  { %3956 = vmatpush.bf16.msk.msra.mxu2 %vm3955_vm15, %v5152_v38 }
  0xf3   :  { %3970 = vmatpush.bf16.msk.msrb.mxu3 %vm3969_vm14, %v5152_v38 }
  0xf5   :  { %3942 = vmatpush.bf16.msk.msra.mxu1 %vm3941_vm5, %v5152_v38 }
  0xf6   :  { %3958 = vmatpush.bf16.msk.msra.mxu2 %vm3957_vm7, %v5152_v38 }
  0xf7   :  { %3972 = vmatpush.bf16.msk.msrb.mxu3 %vm3971_vm8, %v5152_v38 }
  0xf8   :  { %943 = vmatmul.bf16.vlgmr.msrb.gmra.mxu1 %v5795_v24  ;;  %1052 = vmatmul.bf16.vlgmr.msrb.gmra.mxu2 %v5735_v14 }
  0xfb   :  { %3974 = vmatpush.bf16.msk.msrb.mxu3 %vm3973_vm11, %v5152_v38 }
  0xfe   :  { %1071 = vmatmul.bf16.vlgmr.msra.gmra.mxu3 %v5795_v24 }
 0x108   :  { %948 = vmatmul.bf16.gmra.mxu1 %v5896_v9  ;;  %1057 = vmatmul.bf16.gmra.mxu2 %v5858_v4 }
 0x10e   :  { %1076 = vmatmul.bf16.gmra.mxu3 %v5896_v9 }
 0x115   :  { %v413_v39 = vpop.f32.mrf.mxu1 }
 0x116   :  { %v669_v17 = vpop.f32.mrf.mxu0 }
 0x118   :  { %1199 = vmatmul.bf16.vlgmr.msra.gmra.mxu1 %v5795_v24  ;;  %1308 = vmatmul.bf16.vlgmr.msra.gmra.mxu2 %v5735_v14 }
 0x11b   :  { %v285_v40 = vpop.f32.mrf.mxu2 }
 0x11d   :  { %v415_v43 = vpop.f32.mrf.mxu1 }
 0x11e   :  { %1327 = vmatmul.bf16.vlgmr.msrb.gmra.mxu3 %v5795_v24  ;;  %v671_v22 = vpop.f32.mrf.mxu0 }
 0x121   :  { %v304_v44 = vpop.f32.mrf.mxu3 }
 0x122   :  { %v305_v52 = vadd.f32 %v304_v44, %v285_v40 }
 0x123   :  { %v287_v47 = vpop.f32.mrf.mxu2 }
 0x125   :  { %v418_v48 = vpop.f32.mrf.mxu1 }
 0x128   :  { %1204 = vmatmul.bf16.gmra.mxu1 %v5896_v9  ;;  %1313 = vmatmul.bf16.gmra.mxu2 %v5858_v4  ;;  %v674_v4 = vpop.f32.mrf.mxu0 }
 0x129   :  { %v306_v51 = vpop.f32.mrf.mxu3 }
 0x12a   :  { %v307_v55 = vadd.f32 %v306_v51, %v287_v47 }
 0x12b   :  { %v290_v56 = vpop.f32.mrf.mxu2 }
 0x12c   :  { %v4710_v59 = vpack.c.bf16 %v307_v55, %v305_v52 }
 0x12d   :  { %v420_v60 = vpop.f32.mrf.mxu1 }
 0x12e   :  { %4711 = vst [vmem:[#allocation2] sm:$0xff] %v4710_v59   ;;  %1332 = vmatmul.bf16.gmra.mxu3 %v5896_v9 }
 0x131   :  { %v309_v62 = vpop.f32.mrf.mxu3 }
 0x132   :  { %v310_v10 = vadd.f32 %v309_v62, %v290_v56 }
 0x133   :  { %v292_v63 = vpop.f32.mrf.mxu2 }
 0x135   :  { %v432_v2 = vpop.f32.mrf.mxu1 }
 0x136   :  { %v433_v15 = vadd.f32 %v432_v2, %v413_v39  ;;  %v676_v39 = vpop.f32.mrf.mxu0 }
 0x139   :  { %v311_v3 = vpop.f32.mrf.mxu3 }
 0x13a   :  { %v312_v11 = vadd.f32 %v311_v3, %v292_v63 }
 0x13b   :  { %v541_v12 = vpop.f32.mrf.mxu2 }
 0x13c   :  { %v4715_v13 = vpack.c.bf16 %v312_v11, %v310_v10 }
 0x13d   :  { %v434_v14 = vpop.f32.mrf.mxu1 }
 0x13e   :  { %5057 = vst [vmem:[#allocation2 + $0x38] sm:$0xff] %v4715_v13   ;;  %v435_v16 = vadd.f32 %v434_v14, %v415_v43  ;;  %v925_v55 = vpop.f32.mrf.mxu0 }
 0x140   :  { %v4720_v18 = vpack.c.bf16 %v435_v16, %v433_v15 }
 0x141   :  { %v560_v19 = vpop.f32.mrf.mxu3 }
 0x142   :  { %5058 = vst [vmem:[#allocation2 + $0x78] sm:$0xff] %v4720_v18   ;;  %v561_v24 = vadd.f32 %v560_v19, %v541_v12 }
 0x143   :  { %v543_v20 = vpop.f32.mrf.mxu2 }
 0x145   :  { %v437_v21 = vpop.f32.mrf.mxu1 }
 0x146   :  { %v438_v29 = vadd.f32 %v437_v21, %v418_v48  ;;  %v927_v12 = vpop.f32.mrf.mxu0 }
 0x149   :  { %v562_v23 = vpop.f32.mrf.mxu3 }
 0x14a   :  { %v563_v25 = vadd.f32 %v562_v23, %v543_v20 }
 0x14b   :  { %v546_v26 = vpop.f32.mrf.mxu2 }
 0x14c   :  { %v4730_v27 = vpack.c.bf16 %v563_v25, %v561_v24 }
 0x14d   :  { %v439_v28 = vpop.f32.mrf.mxu1 }
 0x14e   :  { %5060 = vst [vmem:[#allocation2 + $0x20] sm:$0xff] %v4730_v27   ;;  %v440_v31 = vadd.f32 %v439_v28, %v420_v60  ;;  %v930_v20 = vpop.f32.mrf.mxu0 }
 0x150   :  { %v4725_v32 = vpack.c.bf16 %v440_v31, %v438_v29 }
 0x151   :  { %v565_v0 = vpop.f32.mrf.mxu3 }
 0x152   :  { %5059 = vst [vmem:[#allocation2 + $0x58] sm:$0xff] %v4725_v32   ;;  %v566_v8 = vadd.f32 %v565_v0, %v546_v26 }
 0x153   :  { %v548_v5 = vpop.f32.mrf.mxu2 }
 0x155   :  { %v688_v6 = vpop.f32.mrf.mxu1 }
 0x156   :  { %v689_v43 = vadd.f32 %v688_v6, %v669_v17  ;;  %v932_v32 = vpop.f32.mrf.mxu0 }
 0x159   :  { %v567_v7 = vpop.f32.mrf.mxu3  ;;  %v4620_v6 = vld [vmem:[#allocation2 + $0x58] sm:$0xff] }
 0x15a   :  { %v568_v9 = vadd.f32 %v567_v7, %v548_v5 }
 0x15b   :  { %v797_v35 = vpop.f32.mrf.mxu2 }
 0x15c   :  { %v4735_v1 = vpack.c.bf16 %v568_v9, %v566_v8 }
 0x15d   :  { %v690_v40 = vpop.f32.mrf.mxu1 }
 0x15e   :  { %5061 = vst [vmem:[#allocation2 + $0x8] sm:$0xff] %v4735_v1   ;;  %v691_v44 = vadd.f32 %v690_v40, %v671_v22 }
 0x160   :  { %v4740_v47 = vpack.c.bf16 %v691_v44, %v689_v43  ;;  %v1181_v44 = vpop.f32.mrf.mxu0 }
 0x161   :  { %v816_v48 = vpop.f32.mrf.mxu3 }
 0x162   :  { %5062 = vst [vmem:[#allocation2 + $0x70] sm:$0xff] %v4740_v47   ;;  %v817_v59 = vadd.f32 %v816_v48, %v797_v35 }
 0x163   :  { %v799_v51 = vpop.f32.mrf.mxu2 }
 0x165   :  { %v693_v52 = vpop.f32.mrf.mxu1  ;;  %v4622_v29 = vld [vmem:[#allocation2 + $0x8] sm:$0xff] }
 0x166   :  { %v694_v3 = vadd.f32 %v693_v52, %v674_v4  ;;  %v4621_v4 = vld [vmem:[#allocation2 + $0x20] sm:$0xff] }
 0x169   :  { %v818_v56 = vpop.f32.mrf.mxu3  ;;  %v4623_v24 = vld [vmem:[#allocation2 + $0x70] sm:$0xff] }
 0x16a   :  { %v819_v60 = vadd.f32 %v818_v56, %v799_v51  ;;  %v4618_v51 = vld [vmem:[#allocation2 + $0x38] sm:$0xff]  ;;  %v4606_v56 = vld [vmem:[%s7124_s4 + $0x8] sm:$0xf0] }
 0x16b   :  { %v802_v62 = vpop.f32.mrf.mxu2 }
 0x16c   :  { %v4750_v63 = vpack.c.bf16 %v819_v60, %v817_v59  ;;  %v4617_v60 = vld [vmem:[#allocation2] sm:$0xff] }
 0x16d   :  { %v695_v2 = vpop.f32.mrf.mxu1 }
 0x16e   :  { %5064 = vst [vmem:[#allocation2 + $0x88] sm:$0xff] %v4750_v63   ;;  %v696_v10 = vadd.f32 %v695_v2, %v676_v39  ;;  %v4619_v39 = vld [vmem:[#allocation2 + $0x78] sm:$0xff]  ;;  %v1183_v63 = vpop.f32.mrf.mxu0 }
 0x170   :  { %v4745_v11 = vpack.c.bf16 %v696_v10, %v694_v3 }
 0x171   :  { %v821_v13 = vpop.f32.mrf.mxu3 }
 0x172   :  { %5063 = vst [vmem:[#allocation2 + $0x80] sm:$0xff] %v4745_v11   ;;  %v822_v18 = vadd.f32 %v821_v13, %v802_v62 }
 0x173   :  { %v804_v14 = vpop.f32.mrf.mxu2 }
 0x175   :  { %v944_v15 = vpop.f32.mrf.mxu1 }
 0x176   :  { %v945_v25 = vadd.f32 %v944_v15, %v925_v55  ;;  %v3977_v55 = vld [vmem:[%s7124_s4] sm:$0xf] }
 0x177   :  { %v3978_v62 = vor.u32 %v4606_v56, %v3977_v55  ;;  %v4013_v56 = vld [vmem:[%s7124_s4 + $0x48] sm:$0xf] }
 0x179   :  { %v823_v16 = vpop.f32.mrf.mxu3  ;;  %v4624_v17 = vld [vmem:[#allocation2 + $0x80] sm:$0xff] }
 0x17a   :  { %v824_v19 = vadd.f32 %v823_v16, %v804_v14  ;;  %1626 = vmatpush.bf16.msra.mxu0 %v4624_v17 }
 0x17b   :  { %v1053_v21 = vpop.f32.mrf.mxu2 }
 0x17c   :  { %v4755_v22 = vpack.c.bf16 %v824_v19, %v822_v18  ;;  %v1186_v18 = vpop.f32.mrf.mxu0  ;;  %v3989_v19 = vld [vmem:[%s7124_s4 + $0x18] sm:$0xf] }
 0x17d   :  { %v946_v23 = vpop.f32.mrf.mxu1 }
 0x17e   :  { %5065 = vst [vmem:[#allocation2 + $0x40] sm:$0xff] %v4755_v22   ;;  %v947_v26 = vadd.f32 %v946_v23, %v927_v12  ;;  %1627 = vmatpush.bf16.msra.mxu0 %v4623_v24 }
 0x180   :  { %v4760_v27 = vpack.c.bf16 %v947_v26, %v945_v25 }
 0x181   :  { %v1072_v28 = vpop.f32.mrf.mxu3 }
 0x182   :  { %5066 = vst [vmem:[#allocation2 + $0x50] sm:$0xff] %v4760_v27   ;;  %1628 = vmatpush.bf16.msra.mxu0 %v4622_v29  ;;  %v1073_v7 = vadd.f32 %v1072_v28, %v1053_v21  ;;  %v1398_v27 = vld [vmem:[%s7122_s5] sm:$0xff] }
 0x183   :  { %v1055_v31 = vpop.f32.mrf.mxu2  ;;  %1408 = vperm.xlu2 %5128, %v1398_v27  }
 0x184   :  { %v1188_v29 = vpop.f32.mrf.mxu0 }
 0x185   :  { %v949_v0 = vpop.f32.mrf.mxu1 }
 0x186   :  { %1629 = vmatpush.bf16.msra.mxu0 %v4621_v4  ;;  %v950_v40 = vadd.f32 %v949_v0, %v930_v20  ;;  %v4609_v20 = vld [vmem:[%s7124_s4 + $0x20] sm:$0xf0] }
 0x187   :  { %v3990_v23 = vor.u32 %v4609_v20, %v3989_v19  ;;  %v4625_v19 = vld [vmem:[#allocation2 + $0x88] sm:$0xff] }
 0x189   :  { %v1074_v5 = vpop.f32.mrf.mxu3 }
 0x18a   :  { %v1075_v8 = vadd.f32 %v1074_v5, %v1055_v31  ;;  %1630 = vmatpush.bf16.msra.mxu0 %v4620_v6  ;;  %v1399_v6 = vld [vmem:[%s7122_s5 + $0x8] sm:$0xff] }
 0x18b   :  { %v1058_v9 = vpop.f32.mrf.mxu2  ;;  %1413 = vperm.xlu2 %5128, %v1399_v6   ;;  %v4616_v6 = vld [vmem:[%s7124_s4 + $0x58] sm:$0xf0] }
 0x18c   :  { %v4770_v35 = vpack.c.bf16 %v1075_v8, %v1073_v7  ;;  %v4001_v8 = vld [vmem:[%s7124_s4 + $0x30] sm:$0xf] }
 0x18d   :  { %v951_v1 = vpop.f32.mrf.mxu1 }
 0x18e   :  { %5068 = vst [vmem:[#allocation2 + $0x10] sm:$0xff] %v4770_v35   ;;  %v952_v43 = vadd.f32 %v951_v1, %v932_v32  ;;  %1631 = vmatpush.bf16.msra.mxu0 %v4619_v39 }
 0x190   :  { %v4765_v47 = vpack.c.bf16 %v952_v43, %v950_v40 }
 0x191   :  { %v1077_v48 = vpop.f32.mrf.mxu3 }
 0x192   :  { %5067 = vst [vmem:[#allocation2 + $0x28] sm:$0xff] %v4765_v47   ;;  %1632 = vmatpush.bf16.msra.mxu0 %v4618_v51  ;;  %v1078_v3 = vadd.f32 %v1077_v48, %v1058_v9  ;;  %v4612_v9 = vld [vmem:[%s7124_s4 + $0x38] sm:$0xf0]  ;;  %v1402_v47 = vld [vmem:[%s7122_s5 + $0x20] sm:$0xff] }
 0x193   :  { %v1060_v52 = vpop.f32.mrf.mxu2  ;;  %v4002_v35 = vor.u32 %v4612_v9, %v4001_v8  ;;  %1428 = vperm.xlu2 %5128, %v1402_v47   ;;  %v4614_v8 = vld [vmem:[%s7124_s4 + $0x4c] sm:$0xf]  ;;  %v4015_v9 = vld [vmem:[%s7124_s4 + $0x54] sm:$0xf0] }
 0x195   :  { %v1200_v59 = vpop.f32.mrf.mxu1 }
 0x196   :  { %1633 = vmatpush.bf16.msra.mxu0 %v4617_v60  ;;  %v1201_v14 = vadd.f32 %v1200_v59, %v1181_v44  ;;  %v4615_v59 = vld [vmem:[%s7124_s4 + $0x50] sm:$0xf0] }
 0x197   :  { %v4629_v60 = vld [vmem:[#allocation2 + $0x10] sm:$0xff] }
 0x199   :  { %v1079_v2 = vpop.f32.mrf.mxu3  ;;  %1634 = vmatmul.bf16.vlgmr.msra.gmra.mxu0 %v3978_v62 }
 0x19a   :  { %v1080_v10 = vadd.f32 %v1079_v2, %v1060_v52  ;;  %v1405_v52 = vld [vmem:[%s7122_s5 + $0x38] sm:$0xff]  ;;  %v4607_v2 = vld [vmem:[%s7124_s4 + $0x10] sm:$0xf0] }
 0x19b   :  { %v1309_v11 = vpop.f32.mrf.mxu2  ;;  %1443 = vperm.xlu2 %5128, %v1405_v52  }
 0x19c   :  { %v4775_v12 = vpack.c.bf16 %v1080_v10, %v1078_v3  ;;  %v4014_v3 = vor.u32 %v4615_v59, %v4013_v56  ;;  %v4628_v10 = vld [vmem:[#allocation2 + $0x28] sm:$0xff] }
 0x19d   :  { %v1202_v13 = vpop.f32.mrf.mxu1 }
 0x19e   :  { %5069 = vst [vmem:[#allocation2 + $0x48] sm:$0xff] %v4775_v12   ;;  %v1203_v15 = vadd.f32 %v1202_v13, %v1183_v63  ;;  %v3985_v63 = vld [vmem:[%s7124_s4 + $0x8] sm:$0xf]  ;;  %v2606_v13 = vld [vmem:[%s7123_s8 + $0x10] sm:$0xff] }
 0x19f   :  { %v3986_v12 = vor.u32 %v4607_v2, %v3985_v63 }
 0x1a0   :  { %v4780_v16 = vpack.c.bf16 %v1203_v15, %v1201_v14  ;;  %v4627_v14 = vld [vmem:[#allocation2 + $0x50] sm:$0xff]  ;;  %v4626_v15 = vld [vmem:[#allocation2 + $0x40] sm:$0xff] }
 0x1a1   :  { %v1328_v17 = vpop.f32.mrf.mxu3 }
 0x1a2   :  { %5070 = vst [vmem:[#allocation2 + $0x30] sm:$0xff] %v4780_v16   ;;  %v1329_v25 = vadd.f32 %v1328_v17, %v1309_v11  ;;  %v2609_v16 = vld [vmem:[%s7123_s8 + $0x28] sm:$0xff]  ;;  %v4605_v17 = vld [vmem:[%s7124_s4 + $0x4] sm:$0xf] }
 0x1a3   :  { %v1311_v21 = vpop.f32.mrf.mxu2  ;;  %2624 = vperm.xlu2 %5128, %v2606_v13  }
 0x1a5   :  { %v1205_v22 = vpop.f32.mrf.mxu1  ;;  %v4630_v55 = vld [vmem:[#allocation2 + $0x48] sm:$0xff] }
 0x1a6   :  { %v1206_v32 = vadd.f32 %v1205_v22, %v1186_v18  ;;  %v3979_v18 = vld [vmem:[%s7124_s4 + $0xc] sm:$0xf0]  ;;  %v4610_v22 = vld [vmem:[%s7124_s4 + $0x28] sm:$0xf0] }
 0x1a7   :  { %v3982_v20 = vor.u32 %v4605_v17, %v3979_v18  ;;  %v6518_v17 = vld [vmem:[%s7125_s6 + $0x4] ss:$0 sm:$0xff]  ;;  %v6523_v18 = vld [vmem:[%s7125_s6 + $0x5] ss:$0 sm:$0xff] }
 0x1a9   :  { %v1330_v24 = vpop.f32.mrf.mxu3  ;;  %1639 = vmatmul.bf16.gmra.mxu0 %v3990_v23  ;;  %v4631_v51 = vld [vmem:[#allocation2 + $0x30] sm:$0xff] }
 0x1aa   :  { %v1331_v26 = vadd.f32 %v1330_v24, %v1311_v21  ;;  %v3997_v21 = vld [vmem:[%s7124_s4 + $0x20] sm:$0xf] }
 0x1ab   :  { %v1314_v4 = vpop.f32.mrf.mxu2  ;;  %2639 = vperm.xlu2 %5128, %v2609_v16   ;;  %v3998_v23 = vor.u32 %v4610_v22, %v3997_v21  ;;  %v3519_v24 = vld [vmem:[%s7126_s11] sm:$0xff] }
 0x1ac   :  { %v4790_v28 = vpack.c.bf16 %v1331_v26, %v1329_v25  ;;  %v4608_v25 = vld [vmem:[%s7124_s4 + $0x1c] sm:$0xf]  ;;  %v3991_v26 = vld [vmem:[%s7124_s4 + $0x24] sm:$0xf0]  ;;  %v6533_v22 = vld [vmem:[%s7125_s6 + $0x7] ss:$0 sm:$0xff] }
 0x1ad   :  { %v1207_v31 = vpop.f32.mrf.mxu1  ;;  %v3994_v27 = vor.u32 %v4608_v25, %v3991_v26  ;;  %v1424_v26 = vpop.permute.xlu1 %1423 }
 0x1ae   :  { %5072 = vst [vmem:[#allocation2 + $0x68] sm:$0xff] %v4790_v28   ;;  %v1208_v0 = vadd.f32 %v1207_v31, %v1188_v29  ;;  %v4009_v28 = vld [vmem:[%s7124_s4 + $0x38] sm:$0xf]  ;;  %v4613_v29 = vld [vmem:[%s7124_s4 + $0x40] sm:$0xf0] }
 0x1af   :  { %v4010_v31 = vor.u32 %v4613_v29, %v4009_v28 }
 0x1b0   :  { %v4785_v5 = vpack.c.bf16 %v1208_v0, %v1206_v32  ;;  %v4611_v32 = vld [vmem:[%s7124_s4 + $0x34] sm:$0xf]  ;;  %v4003_v0 = vld [vmem:[%s7124_s4 + $0x3c] sm:$0xf0] }
 0x1b1   :  { %v1333_v7 = vpop.f32.mrf.mxu3 }
 0x1b2   :  { %5071 = vst [vmem:[#allocation2 + $0x18] sm:$0xff] %v4785_v5   ;;  %v1334_v43 = vadd.f32 %v1333_v7, %v1314_v4  ;;  %v4006_v4 = vor.u32 %v4611_v32, %v4003_v0  ;;  %v4021_v5 = vld [vmem:[%s7124_s4 + $0x50] sm:$0xf] }
 0x1b3   :  { %v1316_v1 = vpop.f32.mrf.mxu2  ;;  %3522 = vperm.xlu2 %5128, %v3519_v24   ;;  %v4022_v7 = vor.u32 %v4616_v6, %v4021_v5 }
 0x1b5   :  { %v4633_v11 = vld [vmem:[#allocation2 + $0x68] sm:$0xff] }
 0x1b9   :  { %v1335_v39 = vpop.f32.mrf.mxu3  ;;  %v4632_v40 = vld [vmem:[#allocation2 + $0x18] sm:$0xff]  ;;  %1644 = vmatmul.bf16.gmra.mxu0 %v4002_v35  ;;  %v4018_v35 = vor.u32 %v4614_v8, %v4015_v9 }
 0x1ba   :  { %v1336_v44 = vadd.f32 %v1335_v39, %v1316_v1  ;;  %1655 = vmatpush.bf16.msrb.mxu1 %v4632_v40  ;;  %v6336_v1 = vld [vmem:[%s7125_s6] ss:$0 sm:$0xff]  ;;  %v6341_v39 = vld [vmem:[%s7125_s6 + $0x1] ss:$0 sm:$0xff]  ;;  %v6346_v40 = vld [vmem:[%s7125_s6 + $0x2] ss:$0 sm:$0xff] }
 0x1bb   :  { %vm1742_vm12 = vcmp.eq.s32.totalorder %v5310_v34, %v6336_v1  ;;  %vm1828_vm15 = vcmp.eq.s32.totalorder %v5307_v33, %v6341_v39  ;;  %vm1829_vm1 = vcmp.eq.s32.totalorder %v5310_v34, %v6341_v39  ;;  %vm1915_vm2 = vcmp.eq.s32.totalorder %v5307_v33, %v6346_v40 }
 0x1bc   :  { %v4795_v48 = vpack.c.bf16 %v1336_v44, %v1334_v43  ;;  %v6351_v43 = vld [vmem:[%s7125_s6 + $0x3] ss:$0 sm:$0xff]  ;;  %vm1916_vm3 = vcmp.eq.s32.totalorder %v5310_v34, %v6346_v40  ;;  %vm4115_vm5 = vmpackc.low %vm1829_vm1, %vm1828_vm15  ;;  %vm1739_vm10 = vcmp.eq.s32.totalorder %v5318_v36, %v6336_v1  ;;  %vm1740_vm6 = vcmp.eq.s32.totalorder %v5321_v37, %v6336_v1 }
 0x1bd   :  { %vm2002_vm4 = vcmp.eq.s32.totalorder %v5307_v33, %v6351_v43  ;;  %vm2003_vm7 = vcmp.eq.s32.totalorder %v5310_v34, %v6351_v43  ;;  %4116 = vmatpush.bf16.msk.msrb.mxu0 %vm4115_vm5, %v5152_v38  ;;  %vm4131_vm8 = vmpackc.low %vm1916_vm3, %vm1915_vm2  ;;  %vm1826_vm13 = vcmp.eq.s32.totalorder %v5318_v36, %v6341_v39  ;;  %vm1827_vm9 = vcmp.eq.s32.totalorder %v5321_v37, %v6341_v39 }
 0x1be   :  { %5073 = vst [vmem:[#allocation2 + $0x60] sm:$0xff] %v4795_v48   ;;  %1656 = vmatpush.bf16.msrb.mxu1 %v4631_v51  ;;  %vm4147_vm11 = vmpackc.low %vm2003_vm7, %vm2002_vm4  ;;  %vm2001_vm1 = vcmp.eq.s32.totalorder %v5321_v37, %v6351_v43  ;;  %vm1737_vm5 = vcmp.eq.s32.totalorder %v5357_v41, %v6336_v1  ;;  %vm1738_vm7 = vcmp.eq.s32.totalorder %v5360_v42, %v6336_v1 }
 0x1bf   :  { %vm4101_vm15 = vmpackc.low %vm1740_vm6, %vm1739_vm10  ;;  %vm1824_vm10 = vcmp.eq.s32.totalorder %v5357_v41, %v6341_v39 }
 0x1c0   :  { %vm4117_vm2 = vmpackc.low %vm1827_vm9, %vm1826_vm13  ;;  %vm1911_vm13 = vcmp.eq.s32.totalorder %v5357_v41, %v6346_v40  ;;  %vm1912_vm9 = vcmp.eq.s32.totalorder %v5360_v42, %v6346_v40 }
 0x1c1   :  { %4118 = vmatpush.bf16.msk.msrb.mxu0 %vm4117_vm2, %v5152_v38  ;;  %vm4103_vm6 = vmpackc.low %vm1738_vm7, %vm1737_vm5  ;;  %vm1822_vm2 = vcmp.eq.s32.totalorder %v5374_v45, %v6341_v39  ;;  %vm1909_vm5 = vcmp.eq.s32.totalorder %v5374_v45, %v6346_v40  ;;  %vm1910_vm7 = vcmp.eq.s32.totalorder %v5377_v46, %v6346_v40 }
 0x1c2   :  { %1657 = vmatpush.bf16.msrb.mxu1 %v4630_v55 }
 0x1c5   :  { %v4634_v62 = vld [vmem:[#allocation2 + $0x60] sm:$0xff] }
 0x1c6   :  { %1658 = vmatpush.bf16.msrb.mxu1 %v4629_v60  ;;  %1690 = vmatpush.bf16.msrb.mxu2 %v4634_v62 }
 0x1c9   :  { %1649 = vmatmul.bf16.gmra.mxu0 %v4014_v3 }
 0x1ca   :  { %1659 = vmatpush.bf16.msrb.mxu1 %v4628_v10  ;;  %1691 = vmatpush.bf16.msrb.mxu2 %v4633_v11 }
 0x1cd   :  { %4095 = vmatmul.msk.bf16.vlgmr.msrb.gmra.mxu2 %vm104_vm0, %v3986_v12 }
 0x1ce   :  { %1660 = vmatpush.bf16.msrb.mxu1 %v4627_v14  ;;  %4148 = vmatpush.bf16.msk.msra.mxu2 %vm4147_vm11, %v5152_v38  ;;  %vm1998_vm11 = vcmp.eq.s32.totalorder %v5357_v41, %v6351_v43 }
 0x1d2   :  { %1661 = vmatpush.bf16.msrb.mxu1 %v4626_v15 }
 0x1d6   :  { %1662 = vmatpush.bf16.msrb.mxu1 %v4625_v19  ;;  %v6528_v19 = vld [vmem:[%s7125_s6 + $0x6] ss:$0 sm:$0xff] }
 0x1d9   :  { %1663 = vmatmul.bf16.vlgmr.msrb.gmra.mxu1 %v3982_v20  ;;  %v1419_v20 = vpop.permute.xlu0 %1418 }
 0x1da   :  { %4132 = vmatpush.bf16.msk.msra.mxu1 %vm4131_vm8, %v5152_v38  ;;  %vm1825_vm8 = vcmp.eq.s32.totalorder %v5360_v42, %v6341_v39 }
 0x1dd   :  { %4096 = vmatmul.msk.bf16.gmra.mxu2 %vm104_vm0, %v3998_v23  ;;  %v1409_v51 = vpop.permute.xlu2 %1408 }
 0x1e5   :  { %v1414_v62 = vpop.permute.xlu2 %1413 }
 0x1e9   :  { %1668 = vmatmul.bf16.gmra.mxu1 %v3994_v27 }
 0x1ed   :  { %4097 = vmatmul.msk.bf16.gmra.mxu2 %vm104_vm0, %v4010_v31  ;;  %v1429_v9 = vpop.permute.xlu2 %1428 }
 0x1f9   :  { %1673 = vmatmul.bf16.gmra.mxu1 %v4006_v4 }
 0x1fd   :  { %4098 = vmatmul.msk.bf16.gmra.mxu2 %vm104_vm0, %v4022_v7  ;;  %vm1741_vm0 = vcmp.eq.s32.totalorder %v5307_v33, %v6336_v1 }
 0x1fe   :  { %vm4099_vm14 = vmpackc.low %vm1742_vm12, %vm1741_vm0  ;;  %vm1913_vm0 = vcmp.eq.s32.totalorder %v5318_v36, %v6346_v40  ;;  %vm1914_vm12 = vcmp.eq.s32.totalorder %v5321_v37, %v6346_v40 }
 0x1ff   :  { %4100 = vmatpush.bf16.msk.msra.mxu3 %vm4099_vm14, %v5152_v38  ;;  %vm2000_vm14 = vcmp.eq.s32.totalorder %v5318_v36, %v6351_v43  ;;  %vm4133_vm3 = vmpackc.low %vm1914_vm12, %vm1913_vm0  ;;  %vm1999_vm12 = vcmp.eq.s32.totalorder %v5360_v42, %v6351_v43 }
 0x200   :  { %4134 = vmatpush.bf16.msk.msra.mxu1 %vm4133_vm3, %v5152_v38  ;;  %vm4149_vm4 = vmpackc.low %vm2001_vm1, %vm2000_vm14  ;;  %vm1736_vm14 = vcmp.eq.s32.totalorder %v5377_v46, %v6336_v1  ;;  %vm1823_vm3 = vcmp.eq.s32.totalorder %v5377_v46, %v6341_v39 }
 0x201   :  { %4150 = vmatpush.bf16.msk.msra.mxu2 %vm4149_vm4, %v5152_v38  ;;  %vm4119_vm0 = vmpackc.low %vm1825_vm8, %vm1824_vm10  ;;  %vm1997_vm8 = vcmp.eq.s32.totalorder %v5377_v46, %v6351_v43 }
 0x202   :  { %4120 = vmatpush.bf16.msk.msrb.mxu0 %vm4119_vm0, %v5152_v38  ;;  %vm4135_vm1 = vmpackc.low %vm1912_vm9, %vm1911_vm13  ;;  %vm1733_vm0 = vcmp.eq.s32.totalorder %v5426_v49, %v6336_v1 }
 0x203   :  { %4102 = vmatpush.bf16.msk.msra.mxu3 %vm4101_vm15, %v5152_v38  ;;  %vm1735_vm15 = vcmp.eq.s32.totalorder %v5374_v45, %v6336_v1  ;;  %vm4151_vm4 = vmpackc.low %vm1999_vm12, %vm1998_vm11  ;;  %vm1734_vm12 = vcmp.eq.s32.totalorder %v5429_v50, %v6336_v1 }
 0x204   :  { %4136 = vmatpush.bf16.msk.msra.mxu1 %vm4135_vm1, %v5152_v38  ;;  %vm4105_vm10 = vmpackc.low %vm1736_vm14, %vm1735_vm15  ;;  %vm1820_vm15 = vcmp.eq.s32.totalorder %v5426_v49, %v6341_v39  ;;  %vm1821_vm1 = vcmp.eq.s32.totalorder %v5429_v50, %v6341_v39 }
 0x205   :  { %4152 = vmatpush.bf16.msk.msra.mxu2 %vm4151_vm4, %v5152_v38  ;;  %vm4121_vm13 = vmpackc.low %vm1823_vm3, %vm1822_vm2  ;;  %vm1907_vm2 = vcmp.eq.s32.totalorder %v5426_v49, %v6346_v40  ;;  %vm1908_vm3 = vcmp.eq.s32.totalorder %v5429_v50, %v6346_v40  ;;  %vm1994_vm4 = vcmp.eq.s32.totalorder %v5426_v49, %v6351_v43 }
 0x206   :  { %4122 = vmatpush.bf16.msk.msrb.mxu0 %vm4121_vm13, %v5152_v38  ;;  %vm4137_vm9 = vmpackc.low %vm1910_vm7, %vm1909_vm5  ;;  %vm1995_vm7 = vcmp.eq.s32.totalorder %v5429_v50, %v6351_v43  ;;  %vm1732_vm13 = vcmp.eq.s32.totalorder %v5459_v54, %v6336_v1 }
 0x207   :  { %4104 = vmatpush.bf16.msk.msra.mxu3 %vm4103_vm6, %v5152_v38  ;;  %vm1996_vm6 = vcmp.eq.s32.totalorder %v5374_v45, %v6351_v43  ;;  %vm4107_vm14 = vmpackc.low %vm1734_vm12, %vm1733_vm0  ;;  %vm1905_vm12 = vcmp.eq.s32.totalorder %v5456_v53, %v6346_v40 }
 0x208   :  { %4138 = vmatpush.bf16.msk.msra.mxu1 %vm4137_vm9, %v5152_v38  ;;  %vm4153_vm11 = vmpackc.low %vm1997_vm8, %vm1996_vm6  ;;  %vm1731_vm8 = vcmp.eq.s32.totalorder %v5456_v53, %v6336_v1  ;;  %vm1818_vm9 = vcmp.eq.s32.totalorder %v5456_v53, %v6341_v39 }
 0x209   :  { %1678 = vmatmul.bf16.gmra.mxu1 %v4018_v35  ;;  %4154 = vmatpush.bf16.msk.msra.mxu2 %vm4153_vm11, %v5152_v38  ;;  %vm4123_vm5 = vmpackc.low %vm1821_vm1, %vm1820_vm15  ;;  %vm1819_vm11 = vcmp.eq.s32.totalorder %v5459_v54, %v6341_v39  ;;  %vm1906_vm15 = vcmp.eq.s32.totalorder %v5459_v54, %v6346_v40  ;;  %vm1993_vm1 = vcmp.eq.s32.totalorder %v5459_v54, %v6351_v43 }
 0x20a   :  { %4124 = vmatpush.bf16.msk.msrb.mxu0 %vm4123_vm5, %v5152_v38  ;;  %vm4155_vm6 = vmpackc.low %vm1995_vm7, %vm1994_vm4  ;;  %vm1729_vm5 = vcmp.eq.s32.totalorder %v5486_v57, %v6336_v1  ;;  %vm1730_vm7 = vcmp.eq.s32.totalorder %v5489_v58, %v6336_v1 }
 0x20b   :  { %4106 = vmatpush.bf16.msk.msra.mxu3 %vm4105_vm10, %v5152_v38  ;;  %vm4139_vm10 = vmpackc.low %vm1908_vm3, %vm1907_vm2 }
 0x20c   :  { %4140 = vmatpush.bf16.msk.msra.mxu1 %vm4139_vm10, %v5152_v38  ;;  %vm4109_vm0 = vmpackc.low %vm1732_vm13, %vm1731_vm8  ;;  %vm1816_vm10 = vcmp.eq.s32.totalorder %v5486_v57, %v6341_v39  ;;  %vm1817_vm8 = vcmp.eq.s32.totalorder %v5489_v58, %v6341_v39  ;;  %vm1903_vm13 = vcmp.eq.s32.totalorder %v5486_v57, %v6346_v40 }
 0x20d   :  { %4156 = vmatpush.bf16.msk.msra.mxu2 %vm4155_vm6, %v5152_v38  ;;  %vm4125_vm2 = vmpackc.low %vm1819_vm11, %vm1818_vm9  ;;  %vm1904_vm9 = vcmp.eq.s32.totalorder %v5489_v58, %v6346_v40  ;;  %vm1990_vm11 = vcmp.eq.s32.totalorder %v5486_v57, %v6351_v43 }
 0x20e   :  { %4126 = vmatpush.bf16.msk.msrb.mxu0 %vm4125_vm2, %v5152_v38  ;;  %vm4141_vm3 = vmpackc.low %vm1906_vm15, %vm1905_vm12  ;;  %vm1991_vm12 = vcmp.eq.s32.totalorder %v5489_v58, %v6351_v43  ;;  %vm1728_vm2 = vcmp.eq.s32.totalorder %v5518_v61, %v6336_v1 }
 0x20f   :  { %4108 = vmatpush.bf16.msk.msra.mxu3 %vm4107_vm14, %v5152_v38  ;;  %vm1992_vm14 = vcmp.eq.s32.totalorder %v5456_v53, %v6351_v43  ;;  %vm4111_vm6 = vmpackc.low %vm1730_vm7, %vm1729_vm5  ;;  %vm1901_vm7 = vcmp.eq.s32.totalorder %v5294_v30, %v6346_v40 }
 0x210   :  { %4142 = vmatpush.bf16.msk.msra.mxu1 %vm4141_vm3, %v5152_v38  ;;  %vm4157_vm4 = vmpackc.low %vm1993_vm1, %vm1992_vm14  ;;  %vm1727_vm1 = vcmp.eq.s32.totalorder %v5294_v30, %v6336_v1  ;;  %vm1814_vm3 = vcmp.eq.s32.totalorder %v5294_v30, %v6341_v39 }
 0x211   :  { %4158 = vmatpush.bf16.msk.msra.mxu2 %vm4157_vm4, %v5152_v38  ;;  %vm4143_vm15 = vmpackc.low %vm1904_vm9, %vm1903_vm13  ;;  %vm1815_vm4 = vcmp.eq.s32.totalorder %v5518_v61, %v6341_v39 }
 0x212   :  { %vm4159_vm14 = vmpackc.low %vm1991_vm12, %vm1990_vm11  ;;  %vm2090_vm12 = vcmp.eq.s32.totalorder %v5310_v34, %v6518_v17 }
 0x213   :  { %4110 = vmatpush.bf16.msk.msra.mxu3 %vm4109_vm0, %v5152_v38  ;;  %vm4127_vm0 = vmpackc.low %vm1817_vm8, %vm1816_vm10  ;;  %vm1902_vm10 = vcmp.eq.s32.totalorder %v5518_v61, %v6346_v40  ;;  %vm1989_vm8 = vcmp.eq.s32.totalorder %v5518_v61, %v6351_v43 }
 0x214   :  { %4128 = vmatpush.bf16.msk.msrb.mxu0 %vm4127_vm0, %v5152_v38  ;;  %4144 = vmatpush.bf16.msk.msra.mxu1 %vm4143_vm15, %v5152_v38  ;;  %vm4113_vm5 = vmpackc.low %vm1728_vm2, %vm1727_vm1  ;;  %vm2089_vm0 = vcmp.eq.s32.totalorder %v5307_v33, %v6518_v17  ;;  %vm2177_vm1 = vcmp.eq.s32.totalorder %v5310_v34, %v6523_v18  ;;  %vm2263_vm2 = vcmp.eq.s32.totalorder %v5307_v33, %v6528_v19 }
 0x215   :  { %4160 = vmatpush.bf16.msk.msra.mxu2 %vm4159_vm14, %v5152_v38  ;;  %vm4129_vm13 = vmpackc.low %vm1815_vm4, %vm1814_vm3  ;;  %vm2176_vm14 = vcmp.eq.s32.totalorder %v5307_v33, %v6523_v18  ;;  %vm2264_vm4 = vcmp.eq.s32.totalorder %v5310_v34, %v6528_v19 }
 0x216   :  { %v1635_v44 = vpop.f32.mrf.mxu0  ;;  %vm4145_vm9 = vmpackc.low %vm1902_vm10, %vm1901_vm7  ;;  %vm2351_vm7 = vcmp.eq.s32.totalorder %v5310_v34, %v6533_v22 }
 0x217   :  { %4112 = vmatpush.bf16.msk.msra.mxu3 %vm4111_vm6, %v5152_v38  ;;  %vm1988_vm6 = vcmp.eq.s32.totalorder %v5294_v30, %v6351_v43  ;;  %v1636_v55 = vadd.f32 %v1635_v44, %v1409_v51  ;;  %vm4163_vm15 = vmpackc.low %vm2090_vm12, %vm2089_vm0  ;;  %vm2175_vm0 = vcmp.eq.s32.totalorder %v5321_v37, %v6523_v18  ;;  %vm2261_vm12 = vcmp.eq.s32.totalorder %v5318_v36, %v6528_v19  ;;  %v1434_v43 = vpop.permute.xlu0 %1433 }
 0x218   :  { %4130 = vmatpush.bf16.msk.msrb.mxu0 %vm4129_vm13, %v5152_v38  ;;  %4146 = vmatpush.bf16.msk.msra.mxu1 %vm4145_vm9, %v5152_v38  ;;  %vm4161_vm11 = vmpackc.low %vm1989_vm8, %vm1988_vm6  ;;  %vm2087_vm8 = vcmp.eq.s32.totalorder %v5318_v36, %v6518_v17  ;;  %vm2088_vm13 = vcmp.eq.s32.totalorder %v5321_v37, %v6518_v17  ;;  %vm2174_vm9 = vcmp.eq.s32.totalorder %v5318_v36, %v6523_v18 }
 0x219   :  { %4162 = vmatpush.bf16.msk.msra.mxu2 %vm4161_vm11, %v5152_v38  ;;  %vm4179_vm3 = vmpackc.low %vm2177_vm1, %vm2176_vm14  ;;  %vm2348_vm14 = vcmp.eq.s32.totalorder %v5318_v36, %v6533_v22 }
 0x21a   :  { %vm4195_vm10 = vmpackc.low %vm2264_vm4, %vm2263_vm2  ;;  %vm2349_vm2 = vcmp.eq.s32.totalorder %v5321_v37, %v6533_v22 }
 0x21b   :  { %4114 = vmatpush.bf16.msk.msra.mxu3 %vm4113_vm5, %v5152_v38  ;;  %vm2350_vm5 = vcmp.eq.s32.totalorder %v5307_v33, %v6533_v22  ;;  %vm4165_vm11 = vmpackc.low %vm2088_vm13, %vm2087_vm8  ;;  %vm2173_vm8 = vcmp.eq.s32.totalorder %v5360_v42, %v6523_v18  ;;  %vm2259_vm13 = vcmp.eq.s32.totalorder %v5357_v41, %v6528_v19 }
 0x21c   :  { %4180 = vmatpush.bf16.msk.msra.mxu0 %vm4179_vm3, %v5152_v38  ;;  %4196 = vmatpush.bf16.msk.msrb.mxu1 %vm4195_vm10, %v5152_v38  ;;  %vm4211_vm6 = vmpackc.low %vm2351_vm7, %vm2350_vm5  ;;  %vm2085_vm5 = vcmp.eq.s32.totalorder %v5357_v41, %v6518_v17  ;;  %vm2086_vm7 = vcmp.eq.s32.totalorder %v5360_v42, %v6518_v17  ;;  %vm2172_vm10 = vcmp.eq.s32.totalorder %v5357_v41, %v6523_v18 }
 0x21d   :  { %4212 = vmatpush.bf16.msk.msrb.mxu2 %vm4211_vm6, %v5152_v38  ;;  %vm4181_vm1 = vmpackc.low %vm2175_vm0, %vm2174_vm9  ;;  %vm2260_vm9 = vcmp.eq.s32.totalorder %v5360_v42, %v6528_v19 }
 0x21e   :  { %v1637_v47 = vpop.f32.mrf.mxu0  ;;  %vm4213_vm4 = vmpackc.low %vm2349_vm2, %vm2348_vm14  ;;  %vm2084_vm2 = vcmp.eq.s32.totalorder %v5377_v46, %v6518_v17 }
 0x21f   :  { %v1638_v63 = vadd.f32 %v1637_v47, %v1414_v62  ;;  %4164 = vmatpush.bf16.msk.msrb.mxu3 %vm4163_vm15, %v5152_v38  ;;  %vm2262_vm15 = vcmp.eq.s32.totalorder %v5321_v37, %v6528_v19  ;;  %vm4167_vm6 = vmpackc.low %vm2086_vm7, %vm2085_vm5  ;;  %vm2171_vm5 = vcmp.eq.s32.totalorder %v5377_v46, %v6523_v18  ;;  %vm2257_vm7 = vcmp.eq.s32.totalorder %v5374_v45, %v6528_v19 }
 0x220   :  { %4182 = vmatpush.bf16.msk.msra.mxu0 %vm4181_vm1, %v5152_v38  ;;  %vm4197_vm3 = vmpackc.low %vm2262_vm15, %vm2261_vm12  ;;  %vm2347_vm12 = vcmp.eq.s32.totalorder %v5360_v42, %v6533_v22  ;;  %vm2083_vm1 = vcmp.eq.s32.totalorder %v5374_v45, %v6518_v17 }
 0x221   :  { %4198 = vmatpush.bf16.msk.msrb.mxu1 %vm4197_vm3, %v5152_v38  ;;  %4214 = vmatpush.bf16.msk.msrb.mxu2 %vm4213_vm4, %v5152_v38  ;;  %vm4183_vm0 = vmpackc.low %vm2173_vm8, %vm2172_vm10  ;;  %vm2170_vm3 = vcmp.eq.s32.totalorder %v5374_v45, %v6523_v18  ;;  %vm2258_vm10 = vcmp.eq.s32.totalorder %v5377_v46, %v6528_v19 }
 0x222   :  { %vm4199_vm15 = vmpackc.low %vm2260_vm9, %vm2259_vm13  ;;  %vm2345_vm13 = vcmp.eq.s32.totalorder %v5377_v46, %v6533_v22 }
 0x223   :  { %4166 = vmatpush.bf16.msk.msrb.mxu3 %vm4165_vm11, %v5152_v38  ;;  %vm2346_vm11 = vcmp.eq.s32.totalorder %v5357_v41, %v6533_v22  ;;  %vm4169_vm4 = vmpackc.low %vm2084_vm2, %vm2083_vm1  ;;  %vm2169_vm1 = vcmp.eq.s32.totalorder %v5429_v50, %v6523_v18  ;;  %vm2255_vm2 = vcmp.eq.s32.totalorder %v5426_v49, %v6528_v19 }
 0x224   :  { %4184 = vmatpush.bf16.msk.msra.mxu0 %vm4183_vm0, %v5152_v38  ;;  %vm4215_vm14 = vmpackc.low %vm2347_vm12, %vm2346_vm11  ;;  %vm2081_vm0 = vcmp.eq.s32.totalorder %v5426_v49, %v6518_v17  ;;  %vm2082_vm12 = vcmp.eq.s32.totalorder %v5429_v50, %v6518_v17 }
 0x225   :  { %4200 = vmatpush.bf16.msk.msrb.mxu1 %vm4199_vm15, %v5152_v38  ;;  %4216 = vmatpush.bf16.msk.msrb.mxu2 %vm4215_vm14, %v5152_v38  ;;  %vm4185_vm8 = vmpackc.low %vm2171_vm5, %vm2170_vm3  ;;  %vm2168_vm14 = vcmp.eq.s32.totalorder %v5426_v49, %v6523_v18  ;;  %vm2342_vm5 = vcmp.eq.s32.totalorder %v5426_v49, %v6533_v22 }
 0x226   :  { %v1640_v59 = vpop.f32.mrf.mxu0  ;;  %vm4201_vm9 = vmpackc.low %vm2258_vm10, %vm2257_vm7  ;;  %vm2343_vm10 = vcmp.eq.s32.totalorder %v5429_v50, %v6533_v22 }
 0x227   :  { %v1641_v23 = vadd.f32 %v1640_v59, %v1419_v20  ;;  %4168 = vmatpush.bf16.msk.msrb.mxu3 %vm4167_vm6, %v5152_v38  ;;  %vm2344_vm6 = vcmp.eq.s32.totalorder %v5374_v45, %v6533_v22  ;;  %vm4171_vm15 = vmpackc.low %vm2082_vm12, %vm2081_vm0  ;;  %vm2253_vm0 = vcmp.eq.s32.totalorder %v5456_v53, %v6528_v19 }
 0x228   :  { %4186 = vmatpush.bf16.msk.msra.mxu0 %vm4185_vm8, %v5152_v38  ;;  %vm4217_vm11 = vmpackc.low %vm2345_vm13, %vm2344_vm6  ;;  %vm2079_vm6 = vcmp.eq.s32.totalorder %v5456_v53, %v6518_v17  ;;  %vm2080_vm8 = vcmp.eq.s32.totalorder %v5459_v54, %v6518_v17 }
 0x229   :  { %4202 = vmatpush.bf16.msk.msrb.mxu1 %vm4201_vm9, %v5152_v38  ;;  %4218 = vmatpush.bf16.msk.msrb.mxu2 %vm4217_vm11, %v5152_v38  ;;  %vm4187_vm3 = vmpackc.low %vm2169_vm1, %vm2168_vm14  ;;  %vm2166_vm9 = vcmp.eq.s32.totalorder %v5456_v53, %v6523_v18  ;;  %vm2167_vm11 = vcmp.eq.s32.totalorder %v5459_v54, %v6523_v18  ;;  %vm2340_vm14 = vcmp.eq.s32.totalorder %v5456_v53, %v6533_v22 }
 0x22a   :  { %vm4219_vm13 = vmpackc.low %vm2343_vm10, %vm2342_vm5  ;;  %vm2341_vm1 = vcmp.eq.s32.totalorder %v5459_v54, %v6533_v22  ;;  %vm2165_vm10 = vcmp.eq.s32.totalorder %v5489_v58, %v6523_v18 }
 0x22b   :  { %4170 = vmatpush.bf16.msk.msrb.mxu3 %vm4169_vm4, %v5152_v38  ;;  %vm2256_vm4 = vcmp.eq.s32.totalorder %v5429_v50, %v6528_v19  ;;  %vm4173_vm12 = vmpackc.low %vm2080_vm8, %vm2079_vm6  ;;  %vm2251_vm8 = vcmp.eq.s32.totalorder %v5486_v57, %v6528_v19 }
 0x22c   :  { %4188 = vmatpush.bf16.msk.msra.mxu0 %vm4187_vm3, %v5152_v38  ;;  %vm6643_vm7 = vmpackc.low %vm2256_vm4, %vm2255_vm2  ;;  %vm2077_vm3 = vcmp.eq.s32.totalorder %v5486_v57, %v6518_v17  ;;  %vm2078_vm4 = vcmp.eq.s32.totalorder %v5489_v58, %v6518_v17 }
 0x22d   :  { %4204 = vmatpush.bf16.msk.msrb.mxu1 %vm6643_vm7, %v5152_v38  ;;  %4220 = vmatpush.bf16.msk.msrb.mxu2 %vm4219_vm13, %v5152_v38  ;;  %vm4189_vm2 = vmpackc.low %vm2167_vm11, %vm2166_vm9  ;;  %vm2164_vm7 = vcmp.eq.s32.totalorder %v5486_v57, %v6523_v18  ;;  %vm2252_vm13 = vcmp.eq.s32.totalorder %v5489_v58, %v6528_v19  ;;  %vm2338_vm11 = vcmp.eq.s32.totalorder %v5486_v57, %v6533_v22 }
 0x22e   :  { %v1642_v15 = vpop.f32.mrf.mxu0  ;;  %vm4221_vm6 = vmpackc.low %vm2341_vm1, %vm2340_vm14  ;;  %vm2076_vm14 = vcmp.eq.s32.totalorder %v5518_v61, %v6518_v17 }
 0x22f   :  { %v1643_v27 = vadd.f32 %v1642_v15, %v1424_v26  ;;  %4172 = vmatpush.bf16.msk.msrb.mxu3 %vm4171_vm15, %v5152_v38  ;;  %vm2254_vm15 = vcmp.eq.s32.totalorder %v5459_v54, %v6528_v19  ;;  %vm4175_vm9 = vmpackc.low %vm2078_vm4, %vm2077_vm3  ;;  %vm2163_vm3 = vcmp.eq.s32.totalorder %v5518_v61, %v6523_v18 }
 0x230   :  { %4190 = vmatpush.bf16.msk.msra.mxu0 %vm4189_vm2, %v5152_v38  ;;  %vm4205_vm5 = vmpackc.low %vm2254_vm15, %vm2253_vm0  ;;  %vm2339_vm0 = vcmp.eq.s32.totalorder %v5489_v58, %v6533_v22  ;;  %vm2075_vm15 = vcmp.eq.s32.totalorder %v5294_v30, %v6518_v17  ;;  %vm2162_vm2 = vcmp.eq.s32.totalorder %v5294_v30, %v6523_v18 }
 0x231   :  { %4206 = vmatpush.bf16.msk.msrb.mxu1 %vm4205_vm5, %v5152_v38  ;;  %4222 = vmatpush.bf16.msk.msrb.mxu2 %vm4221_vm6, %v5152_v38  ;;  %vm4207_vm1 = vmpackc.low %vm2252_vm13, %vm2251_vm8  ;;  %vm2249_vm5 = vcmp.eq.s32.totalorder %v5294_v30, %v6528_v19  ;;  %vm2336_vm6 = vcmp.eq.s32.totalorder %v5294_v30, %v6533_v22  ;;  %vm2337_vm8 = vcmp.eq.s32.totalorder %v5518_v61, %v6533_v22 }
 0x232   :  { %vm4223_vm4 = vmpackc.low %vm2339_vm0, %vm2338_vm11 }
 0x233   :  { %4174 = vmatpush.bf16.msk.msrb.mxu3 %vm4173_vm12, %v5152_v38  ;;  %vm4191_vm12 = vmpackc.low %vm2165_vm10, %vm2164_vm7  ;;  %vm2250_vm7 = vcmp.eq.s32.totalorder %v5518_v61, %v6528_v19 }
 0x234   :  { %4192 = vmatpush.bf16.msk.msra.mxu0 %vm4191_vm12, %v5152_v38  ;;  %vm4177_vm10 = vmpackc.low %vm2076_vm14, %vm2075_vm15 }
 0x235   :  { %4208 = vmatpush.bf16.msk.msrb.mxu1 %vm4207_vm1, %v5152_v38  ;;  %4224 = vmatpush.bf16.msk.msrb.mxu2 %vm4223_vm4, %v5152_v38  ;;  %vm4193_vm13 = vmpackc.low %vm2163_vm3, %vm2162_vm2 }
 0x236   :  { %v1645_v28 = vpop.f32.mrf.mxu0  ;;  %vm4225_vm11 = vmpackc.low %vm2337_vm8, %vm2336_vm6 }
 0x237   :  { %v1646_v1 = vadd.f32 %v1645_v28, %v1429_v9  ;;  %4176 = vmatpush.bf16.msk.msrb.mxu3 %vm4175_vm9, %v5152_v38  ;;  %vm4209_vm9 = vmpackc.low %vm2250_vm7, %vm2249_vm5 }
 0x238   :  { %4194 = vmatpush.bf16.msk.msra.mxu0 %vm4193_vm13, %v5152_v38 }
 0x239   :  { %4210 = vmatpush.bf16.msk.msrb.mxu1 %vm4209_vm9, %v5152_v38  ;;  %4226 = vmatpush.bf16.msk.msrb.mxu2 %vm4225_vm11, %v5152_v38 }
 0x23b   :  { %4178 = vmatpush.bf16.msk.msrb.mxu3 %vm4177_vm10, %v5152_v38 }
 0x23e   :  { %v1647_v35 = vpop.f32.mrf.mxu0 }
 0x23f   :  { %v1648_v47 = vadd.f32 %v1647_v35, %v1434_v43 }
 0x250   :  { %v1693_v48 = vpop.f32.mrf.mxu2 }
 0x256   :  { %v1664_v52 = vpop.f32.mrf.mxu1 }
 0x257   :  { %v1665_v60 = vadd.f32 %v1664_v52, %v1636_v55 }
 0x258   :  { %v1695_v56 = vpop.f32.mrf.mxu2 }
 0x259   :  { %v1694_v3 = vadd.f32 %v1693_v48, %v1665_v60 }
 0x25b   :  { %v1713_v13 = vmax.f32 %v1694_v3, 0.0  ;;  %v1439_v3 = vpop.permute.xlu1 %1438 }
 0x25e   :  { %v1666_v2 = vpop.f32.mrf.mxu1 }
 0x25f   :  { %v1667_v10 = vadd.f32 %v1666_v2, %v1638_v63 }
 0x260   :  { %v1698_v11 = vpop.f32.mrf.mxu2 }
 0x261   :  { %v1696_v12 = vadd.f32 %v1695_v56, %v1667_v10  ;;  %v1650_v56 = vpop.f32.mrf.mxu0 }
 0x262   :  { %v1651_v10 = vadd.f32 %v1650_v56, %v1439_v3 }
 0x263   :  { %v1714_v14 = vmax.f32 %v1696_v12, 0.0 }
 0x265   :  { %v6513_v16 = vpack.c.bf16 %v1714_v14, %v1713_v13  ;;  %v1444_v13 = vpop.permute.xlu2 %1443 }
 0x266   :  { %v1669_v21 = vpop.f32.mrf.mxu1 }
 0x267   :  { %1775 = vmatmul.bf16.vlgmr.msra.gmra.mxu3 %v6513_v16  ;;  %1862 = vmatmul.bf16.vlgmr.msrb.gmra.mxu0 %v6513_v16  ;;  %v1670_v25 = vadd.f32 %v1669_v21, %v1641_v23 }
 0x268   :  { %1949 = vmatmul.bf16.vlgmr.msra.gmra.mxu1 %v6513_v16  ;;  %2036 = vmatmul.bf16.vlgmr.msra.gmra.mxu2 %v6513_v16  ;;  %v1700_v24 = vpop.f32.mrf.mxu2 }
 0x269   :  { %v1699_v29 = vadd.f32 %v1698_v11, %v1670_v25  ;;  %v1652_v11 = vpop.f32.mrf.mxu0 }
 0x26a   :  { %v1653_v14 = vadd.f32 %v1652_v11, %v1444_v13 }
 0x26b   :  { %v1715_v4 = vmax.f32 %v1699_v29, 0.0 }
 0x26e   :  { %v1671_v31 = vpop.f32.mrf.mxu1 }
 0x26f   :  { %v1672_v32 = vadd.f32 %v1671_v31, %v1643_v27 }
 0x270   :  { %v6596_v5 = vpop.f32.mrf.mxu2 }
 0x271   :  { %v1701_v0 = vadd.f32 %v1700_v24, %v1672_v32  ;;  %v5146_v24 = vld [vmem:[%s7125_s6 + $0x8] ss:$0 sm:$0xff] }
 0x272   :  { %vm2437_vm0 = vcmp.eq.s32.totalorder %v5307_v33, %v5146_v24  ;;  %vm2438_vm12 = vcmp.eq.s32.totalorder %v5310_v34, %v5146_v24  ;;  %vm2435_vm14 = vcmp.eq.s32.totalorder %v5318_v36, %v5146_v24  ;;  %vm2436_vm1 = vcmp.eq.s32.totalorder %v5321_v37, %v5146_v24 }
 0x273   :  { %v1716_v6 = vmax.f32 %v1701_v0, 0.0  ;;  %vm4227_vm15 = vmpackc.low %vm2438_vm12, %vm2437_vm0  ;;  %vm2433_vm3 = vcmp.eq.s32.totalorder %v5357_v41, %v5146_v24  ;;  %vm2434_vm4 = vcmp.eq.s32.totalorder %v5360_v42, %v5146_v24  ;;  %vm2431_vm7 = vcmp.eq.s32.totalorder %v5374_v45, %v5146_v24 }
 0x274   :  { %4228 = vmatpush.bf16.msk.msra.mxu3 %vm4227_vm15, %v5152_v38  ;;  %vm4229_vm2 = vmpackc.low %vm2436_vm1, %vm2435_vm14  ;;  %vm2432_vm10 = vcmp.eq.s32.totalorder %v5377_v46, %v5146_v24  ;;  %vm2429_vm8 = vcmp.eq.s32.totalorder %v5426_v49, %v5146_v24  ;;  %vm2430_vm13 = vcmp.eq.s32.totalorder %v5429_v50, %v5146_v24  ;;  %vm2427_vm11 = vcmp.eq.s32.totalorder %v5456_v53, %v5146_v24 }
 0x275   :  { %v6615_v7 = vpack.c.bf16 %v1716_v6, %v1715_v4  ;;  %vm4231_vm5 = vmpackc.low %vm2434_vm4, %vm2433_vm3  ;;  %vm2428_vm0 = vcmp.eq.s32.totalorder %v5459_v54, %v5146_v24  ;;  %vm2425_vm15 = vcmp.eq.s32.totalorder %v5486_v57, %v5146_v24  ;;  %vm2426_vm14 = vcmp.eq.s32.totalorder %v5489_v58, %v5146_v24 }
 0x276   :  { %v1674_v8 = vpop.f32.mrf.mxu1  ;;  %vm4233_vm6 = vmpackc.low %vm2432_vm10, %vm2431_vm7  ;;  %vm2424_vm3 = vcmp.eq.s32.totalorder %v5518_v61, %v5146_v24 }
 0x277   :  { %1780 = vmatmul.bf16.gmra.mxu3 %v6615_v7  ;;  %1867 = vmatmul.bf16.gmra.mxu0 %v6615_v7  ;;  %v1675_v40 = vadd.f32 %v1674_v8, %v1646_v1  ;;  %vm4235_vm9 = vmpackc.low %vm2430_vm13, %vm2429_vm8 }
 0x278   :  { %1954 = vmatmul.bf16.gmra.mxu1 %v6615_v7  ;;  %2041 = vmatmul.bf16.gmra.mxu2 %v6615_v7  ;;  %v1705_v44 = vpop.f32.mrf.mxu2  ;;  %vm4237_vm12 = vmpackc.low %vm2428_vm0, %vm2427_vm11 }
 0x279   :  { %v1704_v51 = vadd.f32 %v6596_v5, %v1675_v40  ;;  %4230 = vmatpush.bf16.msk.msra.mxu3 %vm4229_vm2, %v5152_v38  ;;  %vm4239_vm1 = vmpackc.low %vm2426_vm14, %vm2425_vm15  ;;  %vm2423_vm2 = vcmp.eq.s32.totalorder %v5294_v30, %v5146_v24 }
 0x27a   :  { %vm4241_vm4 = vmpackc.low %vm2424_vm3, %vm2423_vm2 }
 0x27b   :  { %v1717_v59 = vmax.f32 %v1704_v51, 0.0 }
 0x27d   :  { %4232 = vmatpush.bf16.msk.msra.mxu3 %vm4231_vm5, %v5152_v38  ;;  %vm2968_vm5 = vcmask 523264  }
 0x27e   :  { %v1676_v48 = vpop.f32.mrf.mxu1 }
 0x27f   :  { %v1677_v52 = vadd.f32 %v1676_v48, %v1648_v47 }
 0x280   :  { %v1708_v63 = vpop.f32.mrf.mxu2 }
 0x281   :  { %v1706_v55 = vadd.f32 %v1705_v44, %v1677_v52  ;;  %4234 = vmatpush.bf16.msk.msra.mxu3 %vm4233_vm6, %v5152_v38 }
 0x283   :  { %v1718_v60 = vmax.f32 %v1706_v55, 0.0 }
 0x285   :  { %v6723_v62 = vpack.c.bf16 %v1718_v60, %v1717_v59  ;;  %4236 = vmatpush.bf16.msk.msra.mxu3 %vm4235_vm9, %v5152_v38 }
 0x286   :  { %v1679_v2 = vpop.f32.mrf.mxu1 }
 0x287   :  { %1785 = vmatmul.bf16.gmra.mxu3 %v6723_v62  ;;  %1872 = vmatmul.bf16.gmra.mxu0 %v6723_v62  ;;  %v1680_v12 = vadd.f32 %v1679_v2, %v1651_v10 }
 0x288   :  { %1959 = vmatmul.bf16.gmra.mxu1 %v6723_v62  ;;  %2046 = vmatmul.bf16.gmra.mxu2 %v6723_v62  ;;  %v1710_v19 = vpop.f32.mrf.mxu2 }
 0x289   :  { %v1709_v17 = vadd.f32 %v1708_v63, %v1680_v12  ;;  %4238 = vmatpush.bf16.msk.msra.mxu3 %vm4237_vm12, %v5152_v38 }
 0x28b   :  { %v1719_v21 = vmax.f32 %v1709_v17, 0.0 }
 0x28d   :  { %4240 = vmatpush.bf16.msk.msra.mxu3 %vm4239_vm1, %v5152_v38 }
 0x28e   :  { %v1681_v15 = vpop.f32.mrf.mxu1 }
 0x28f   :  { %v1682_v18 = vadd.f32 %v1681_v15, %v1653_v14 }
 0x291   :  { %v1711_v20 = vadd.f32 %v1710_v19, %v1682_v18  ;;  %4242 = vmatpush.bf16.msk.msra.mxu3 %vm4241_vm4, %v5152_v38 }
 0x293   :  { %v1720_v22 = vmax.f32 %v1711_v20, 0.0 }
 0x295   :  { %v6735_v23 = vpack.c.bf16 %v1720_v22, %v1719_v21 }
 0x297   :  { %1790 = vmatmul.bf16.gmra.mxu3 %v6735_v23  ;;  %1877 = vmatmul.bf16.gmra.mxu0 %v6735_v23 }
 0x298   :  { %1964 = vmatmul.bf16.gmra.mxu1 %v6735_v23  ;;  %2051 = vmatmul.bf16.gmra.mxu2 %v6735_v23 }
 0x2a7   :  { %2123 = vmatmul.bf16.vlgmr.msrb.gmra.mxu3 %v6513_v16  ;;  %2210 = vmatmul.bf16.vlgmr.msra.gmra.mxu0 %v6513_v16 }
 0x2a8   :  { %2297 = vmatmul.bf16.vlgmr.msrb.gmra.mxu1 %v6513_v16  ;;  %2384 = vmatmul.bf16.vlgmr.msrb.gmra.mxu2 %v6513_v16 }
 0x2b7   :  { %2128 = vmatmul.bf16.gmra.mxu3 %v6615_v7  ;;  %2215 = vmatmul.bf16.gmra.mxu0 %v6615_v7 }
 0x2b8   :  { %2302 = vmatmul.bf16.gmra.mxu1 %v6615_v7  ;;  %2389 = vmatmul.bf16.gmra.mxu2 %v6615_v7 }
 0x2c7   :  { %2133 = vmatmul.bf16.gmra.mxu3 %v6723_v62  ;;  %2220 = vmatmul.bf16.gmra.mxu0 %v6723_v62 }
 0x2c8   :  { %2307 = vmatmul.bf16.gmra.mxu1 %v6723_v62  ;;  %2394 = vmatmul.bf16.gmra.mxu2 %v6723_v62 }
 0x2d7   :  { %2138 = vmatmul.bf16.gmra.mxu3 %v6735_v23  ;;  %2225 = vmatmul.bf16.gmra.mxu0 %v6735_v23 }
 0x2d8   :  { %2312 = vmatmul.bf16.gmra.mxu1 %v6735_v23  ;;  %2399 = vmatmul.bf16.gmra.mxu2 %v6735_v23 }
 0x2e4   :  { %v1863_v25 = vpop.f32.mrf.mxu0 }
 0x2e5   :  { %v1950_v26 = vpop.f32.mrf.mxu1 }
 0x2e7   :  { %2471 = vmatmul.bf16.vlgmr.msra.gmra.mxu3 %v6513_v16 }
 0x2ea   :  { %v1776_v27 = vpop.f32.mrf.mxu3 }
 0x2eb   :  { %v2037_v28 = vpop.f32.mrf.mxu2 }
 0x2ec   :  { %v1865_v29 = vpop.f32.mrf.mxu0 }
 0x2ed   :  { %v4820_v31 = vpack.c.bf16 %v1865_v29, %v1863_v25  ;;  %v1952_v32 = vpop.f32.mrf.mxu1 }
 0x2ee   :  { %v4840_v0 = vpack.c.bf16 %v1952_v32, %v1950_v26 }
 0x2ef   :  { %5077 = vst [vmem:[#allocation3 + $0x48] sm:$0xff] %v4820_v31  }
 0x2f0   :  { %5081 = vst [vmem:[#allocation3 + $0x98] sm:$0xff] %v4840_v0  }
 0x2f2   :  { %v1778_v4 = vpop.f32.mrf.mxu3 }
 0x2f3   :  { %v4800_v5 = vpack.c.bf16 %v1778_v4, %v1776_v27  ;;  %v2039_v6 = vpop.f32.mrf.mxu2 }
 0x2f4   :  { %v4860_v8 = vpack.c.bf16 %v2039_v6, %v2037_v28  ;;  %v1868_v9 = vpop.f32.mrf.mxu0 }
 0x2f5   :  { %4801 = vst [vmem:[#allocation3 + $0x40] sm:$0xff] %v4800_v5   ;;  %v1955_v35 = vpop.f32.mrf.mxu1 }
 0x2f6   :  { %5085 = vst [vmem:[#allocation3 + $0x10] sm:$0xff] %v4860_v8  }
 0x2f7   :  { %2476 = vmatmul.bf16.gmra.mxu3 %v6615_v7 }
 0x2fa   :  { %v1781_v1 = vpop.f32.mrf.mxu3 }
 0x2fb   :  { %v2042_v16 = vpop.f32.mrf.mxu2 }
 0x2fc   :  { %v1870_v39 = vpop.f32.mrf.mxu0 }
 0x2fd   :  { %v4825_v40 = vpack.c.bf16 %v1870_v39, %v1868_v9  ;;  %v1957_v43 = vpop.f32.mrf.mxu1 }
 0x2fe   :  { %v4845_v44 = vpack.c.bf16 %v1957_v43, %v1955_v35 }
 0x2ff   :  { %5078 = vst [vmem:[#allocation3 + $0x58] sm:$0xff] %v4825_v40  }
 0x300   :  { %5082 = vst [vmem:[#allocation3 + $0x20] sm:$0xff] %v4845_v44  }
 0x302   :  { %v1783_v47 = vpop.f32.mrf.mxu3 }
 0x303   :  { %v4805_v48 = vpack.c.bf16 %v1783_v47, %v1781_v1  ;;  %v2044_v51 = vpop.f32.mrf.mxu2 }
 0x304   :  { %v4865_v52 = vpack.c.bf16 %v2044_v51, %v2042_v16  ;;  %v1873_v55 = vpop.f32.mrf.mxu0  ;;  %v4659_v16 = vld [vmem:[#allocation3 + $0x48] sm:$0xff] }
 0x305   :  { %5074 = vst [vmem:[#allocation3 + $0x108] sm:$0xff] %v4805_v48   ;;  %v1960_v56 = vpop.f32.mrf.mxu1 }
 0x306   :  { %5086 = vst [vmem:[#allocation3 + $0xb0] sm:$0xff] %v4865_v52   ;;  %v4660_v9 = vld [vmem:[#allocation3 + $0x58] sm:$0xff]  ;;  %v4667_v52 = vld [vmem:[#allocation3 + $0x10] sm:$0xff] }
 0x307   :  { %2481 = vmatmul.bf16.gmra.mxu3 %v6723_v62 }
 0x30a   :  { %v1786_v59 = vpop.f32.mrf.mxu3 }
 0x30b   :  { %v2047_v7 = vpop.f32.mrf.mxu2 }
 0x30c   :  { %v1875_v60 = vpop.f32.mrf.mxu0 }
 0x30d   :  { %v4830_v63 = vpack.c.bf16 %v1875_v60, %v1873_v55  ;;  %v1962_v2 = vpop.f32.mrf.mxu1  ;;  %v4668_v48 = vld [vmem:[#allocation3 + $0xb0] sm:$0xff] }
 0x30e   :  { %v4850_v3 = vpack.c.bf16 %v1962_v2, %v1960_v56 }
 0x30f   :  { %5079 = vst [vmem:[#allocation3 + $0xf0] sm:$0xff] %v4830_v63  }
 0x310   :  { %5083 = vst [vmem:[#allocation3 + $0xd8] sm:$0xff] %v4850_v3  }
 0x312   :  { %v1788_v10 = vpop.f32.mrf.mxu3 }
 0x313   :  { %v4810_v11 = vpack.c.bf16 %v1788_v10, %v1786_v59  ;;  %v2049_v12 = vpop.f32.mrf.mxu2  ;;  %v4656_v10 = vld [vmem:[#allocation3 + $0x108] sm:$0xff] }
 0x314   :  { %v4870_v13 = vpack.c.bf16 %v2049_v12, %v2047_v7  ;;  %v1878_v14 = vpop.f32.mrf.mxu0  ;;  %v4637_v12 = vld [vmem:[%s7127_s7 + $0x10] sm:$0xf0] }
 0x315   :  { %5075 = vst [vmem:[#allocation3 + $0x118] sm:$0xff] %v4810_v11   ;;  %v1965_v15 = vpop.f32.mrf.mxu1  ;;  %v4245_v11 = vld [vmem:[%s7127_s7] sm:$0xf] }
 0x316   :  { %5087 = vst [vmem:[#allocation3 + $0xa8] sm:$0xff] %v4870_v13  }
 0x317   :  { %2486 = vmatmul.bf16.gmra.mxu3 %v6735_v23  ;;  %v4661_v23 = vld [vmem:[#allocation3 + $0xf0] sm:$0xff]  ;;  %v4665_v13 = vld [vmem:[#allocation3 + $0xd8] sm:$0xff] }
 0x31a   :  { %v1791_v17 = vpop.f32.mrf.mxu3 }
 0x31b   :  { %v2052_v62 = vpop.f32.mrf.mxu2 }
 0x31c   :  { %v1880_v18 = vpop.f32.mrf.mxu0  ;;  %v4657_v56 = vld [vmem:[#allocation3 + $0x118] sm:$0xff] }
 0x31d   :  { %v4835_v19 = vpack.c.bf16 %v1880_v18, %v1878_v14  ;;  %v1967_v20 = vpop.f32.mrf.mxu1  ;;  %v4669_v35 = vld [vmem:[#allocation3 + $0xa8] sm:$0xff]  ;;  %v4246_v18 = vor.u32 %v4637_v12, %v4245_v11  ;;  %v4645_v12 = vld [vmem:[%s7127_s7 + $0x54] sm:$0xf] }
 0x31e   :  { %v4855_v21 = vpack.c.bf16 %v1967_v20, %v1965_v15  ;;  %v4655_v15 = vld [vmem:[#allocation3 + $0x40] sm:$0xff] }
 0x31f   :  { %5080 = vst [vmem:[#allocation3 + $0x18] sm:$0xff] %v4835_v19  }
 0x320   :  { %5084 = vst [vmem:[#allocation3 + $0x28] sm:$0xff] %v4855_v21  }
 0x322   :  { %v1793_v22 = vpop.f32.mrf.mxu3 }
 0x323   :  { %v4815_v24 = vpack.c.bf16 %v1793_v22, %v1791_v17  ;;  %v2054_v25 = vpop.f32.mrf.mxu2  ;;  %v4664_v22 = vld [vmem:[#allocation3 + $0x20] sm:$0xff] }
 0x324   :  { %v4875_v26 = vpack.c.bf16 %v2054_v25, %v2052_v62  ;;  %v2211_v27 = vpop.f32.mrf.mxu0  ;;  %v4247_v25 = vld [vmem:[%s7127_s7 + $0x14] sm:$0xf0] }
 0x325   :  { %5076 = vst [vmem:[#allocation3 + $0xc8] sm:$0xff] %v4815_v24   ;;  %v2298_v28 = vpop.f32.mrf.mxu1  ;;  %v4635_v24 = vld [vmem:[%s7127_s7 + $0x4] sm:$0xf] }
 0x326   :  { %5088 = vst [vmem:[#allocation3 + $0x110] sm:$0xff] %v4875_v26   ;;  %v4662_v29 = vld [vmem:[#allocation3 + $0x18] sm:$0xff] }
 0x327   :  { %2981 = vmatpush.bf16.msrb.mxu0 %v4662_v29  ;;  %v4666_v2 = vld [vmem:[#allocation3 + $0x28] sm:$0xff]  ;;  %v4663_v26 = vld [vmem:[#allocation3 + $0x98] sm:$0xff] }
 0x32a   :  { %v2124_v31 = vpop.f32.mrf.mxu3 }
 0x32b   :  { %v2385_v32 = vpop.f32.mrf.mxu2  ;;  %2982 = vmatpush.bf16.msrb.mxu0 %v4661_v23 }
 0x32c   :  { %v2213_v0 = vpop.f32.mrf.mxu0  ;;  %v4658_v51 = vld [vmem:[#allocation3 + $0xc8] sm:$0xff] }
 0x32d   :  { %v4900_v4 = vpack.c.bf16 %v2213_v0, %v2211_v27  ;;  %v2300_v5 = vpop.f32.mrf.mxu1  ;;  %v4670_v6 = vld [vmem:[#allocation3 + $0x110] sm:$0xff] }
 0x32e   :  { %v4920_v8 = vpack.c.bf16 %v2300_v5, %v2298_v28  ;;  %3010 = vmatpush.bf16.msra.mxu1 %v4670_v6  ;;  %v4250_v28 = vor.u32 %v4635_v24, %v4247_v25  ;;  %v4642_v5 = vld [vmem:[%s7127_s7 + $0x38] sm:$0xf0] }
 0x32f   :  { %5093 = vst [vmem:[#allocation3 + $0x38] sm:$0xff] %v4900_v4   ;;  %2983 = vmatpush.bf16.msrb.mxu0 %v4660_v9  ;;  %v4265_v4 = vld [vmem:[%s7127_s7 + $0x28] sm:$0xf] }
 0x330   :  { %5097 = vst [vmem:[#allocation3 + $0x68] sm:$0xff] %v4920_v8  }
 0x332   :  { %v2126_v1 = vpop.f32.mrf.mxu3  ;;  %3011 = vmatpush.bf16.msra.mxu1 %v4669_v35  ;;  %v4266_v35 = vor.u32 %v4642_v5, %v4265_v4 }
 0x333   :  { %v4880_v39 = vpack.c.bf16 %v2126_v1, %v2124_v31  ;;  %v2387_v40 = vpop.f32.mrf.mxu2  ;;  %2984 = vmatpush.bf16.msrb.mxu0 %v4659_v16 }
 0x334   :  { %v4940_v43 = vpack.c.bf16 %v2387_v40, %v2385_v32  ;;  %v2216_v44 = vpop.f32.mrf.mxu0  ;;  %v4640_v40 = vld [vmem:[%s7127_s7 + $0x2c] sm:$0xf] }
 0x335   :  { %5089 = vst [vmem:[#allocation3 + $0xe0] sm:$0xff] %v4880_v39   ;;  %v2303_v47 = vpop.f32.mrf.mxu1 }
 0x336   :  { %5101 = vst [vmem:[#allocation3 + $0x88] sm:$0xff] %v4940_v43   ;;  %3012 = vmatpush.bf16.msra.mxu1 %v4668_v48  ;;  %v4267_v43 = vld [vmem:[%s7127_s7 + $0x3c] sm:$0xf0]  ;;  %v4675_v24 = vld [vmem:[#allocation3 + $0x38] sm:$0xff] }
 0x337   :  { %2985 = vmatpush.bf16.msrb.mxu0 %v4658_v51 }
 0x33a   :  { %v2129_v55 = vpop.f32.mrf.mxu3  ;;  %3013 = vmatpush.bf16.msra.mxu1 %v4667_v52 }
 0x33b   :  { %v2390_v59 = vpop.f32.mrf.mxu2  ;;  %2986 = vmatpush.bf16.msrb.mxu0 %v4657_v56 }
 0x33c   :  { %v2218_v7 = vpop.f32.mrf.mxu0 }
 0x33d   :  { %v4905_v60 = vpack.c.bf16 %v2218_v7, %v2216_v44  ;;  %v2305_v63 = vpop.f32.mrf.mxu1  ;;  %v4647_v7 = vld [vmem:[%s7127_s7 + $0x60] sm:$0xf0] }
 0x33e   :  { %v4925_v3 = vpack.c.bf16 %v2305_v63, %v2303_v47  ;;  %3014 = vmatpush.bf16.msra.mxu1 %v4666_v2  ;;  %v4270_v47 = vor.u32 %v4640_v40, %v4267_v43 }
 0x33f   :  { %5094 = vst [vmem:[#allocation3 + $0x60] sm:$0xff] %v4905_v60   ;;  %2987 = vmatpush.bf16.msrb.mxu0 %v4656_v10 }
 0x340   :  { %5098 = vst [vmem:[#allocation3 + $0x80] sm:$0xff] %v4925_v3  }
 0x342   :  { %v2131_v14 = vpop.f32.mrf.mxu3  ;;  %3015 = vmatpush.bf16.msra.mxu1 %v4665_v13  ;;  %v4287_v13 = vld [vmem:[%s7127_s7 + $0x64] sm:$0xf0] }
 0x343   :  { %v4885_v17 = vpack.c.bf16 %v2131_v14, %v2129_v55  ;;  %v2392_v62 = vpop.f32.mrf.mxu2  ;;  %2988 = vmatpush.bf16.msrb.mxu0 %v4655_v15 }
 0x344   :  { %v4945_v19 = vpack.c.bf16 %v2392_v62, %v2390_v59  ;;  %v2221_v20 = vpop.f32.mrf.mxu0  ;;  %v4285_v59 = vld [vmem:[%s7127_s7 + $0x50] sm:$0xf] }
 0x345   :  { %5090 = vst [vmem:[#allocation3 + $0x8] sm:$0xff] %v4885_v17   ;;  %v2308_v21 = vpop.f32.mrf.mxu1  ;;  %v4286_v3 = vor.u32 %v4647_v7, %v4285_v59  ;;  %v4290_v17 = vor.u32 %v4645_v12, %v4287_v13  ;;  %v4648_v12 = vld [vmem:[%s7127_s7 + $0x68] sm:$0xf0] }
 0x346   :  { %5102 = vst [vmem:[#allocation3 + $0x70] sm:$0xff] %v4945_v19   ;;  %3016 = vmatpush.bf16.msra.mxu1 %v4664_v22  ;;  %2989 = vmatmul.bf16.vlgmr.msrb.gmra.mxu0 %v4246_v18  ;;  %v4676_v18 = vld [vmem:[#allocation3 + $0x60] sm:$0xff]  ;;  %v4305_v19 = vld [vmem:[%s7127_s7 + $0x78] sm:$0xf] }
 0x347   :  { %v4680_v43 = vld [vmem:[#allocation3 + $0x80] sm:$0xff] }
 0x34a   :  { %v2134_v27 = vpop.f32.mrf.mxu3  ;;  %3017 = vmatpush.bf16.msra.mxu1 %v4663_v26 }
 0x34b   :  { %v2395_v29 = vpop.f32.mrf.mxu2 }
 0x34c   :  { %v2223_v31 = vpop.f32.mrf.mxu0 }
 0x34d   :  { %v4910_v23 = vpack.c.bf16 %v2223_v31, %v2221_v20  ;;  %v2310_v32 = vpop.f32.mrf.mxu1  ;;  %3018 = vmatmul.bf16.vlgmr.msra.gmra.mxu1 %v4250_v28  ;;  %v4652_v20 = vld [vmem:[%s7127_s7 + $0x88] sm:$0xf0]  ;;  %v4307_v31 = vld [vmem:[%s7127_s7 + $0x8c] sm:$0xf0] }
 0x34e   :  { %v4930_v0 = vpack.c.bf16 %v2310_v32, %v2308_v21  ;;  %v4306_v26 = vor.u32 %v4652_v20, %v4305_v19 }
 0x34f   :  { %5095 = vst [vmem:[#allocation3 + $0xc0] sm:$0xff] %v4910_v23   ;;  %v4683_v23 = vld [vmem:[#allocation3 + $0x88] sm:$0xff] }
 0x350   :  { %5099 = vst [vmem:[#allocation3] sm:$0xff] %v4930_v0  }
 0x352   :  { %v2136_v6 = vpop.f32.mrf.mxu3 }
 0x353   :  { %v4890_v8 = vpack.c.bf16 %v2136_v6, %v2134_v27  ;;  %v2397_v9 = vpop.f32.mrf.mxu2  ;;  %v4684_v27 = vld [vmem:[#allocation3 + $0x70] sm:$0xff]  ;;  %v4672_v6 = vld [vmem:[#allocation3 + $0x8] sm:$0xff] }
 0x354   :  { %v4950_v1 = vpack.c.bf16 %v2397_v9, %v2395_v29  ;;  %v2226_v16 = vpop.f32.mrf.mxu0  ;;  %v4650_v29 = vld [vmem:[%s7127_s7 + $0x7c] sm:$0xf] }
 0x355   :  { %5091 = vst [vmem:[#allocation3 + $0x30] sm:$0xff] %v4890_v8   ;;  %v2313_v39 = vpop.f32.mrf.mxu1  ;;  %v4310_v4 = vor.u32 %v4650_v29, %v4307_v31  ;;  %v4253_v8 = vld [vmem:[%s7127_s7 + $0x8] sm:$0xf]  ;;  %v4638_v9 = vld [vmem:[%s7127_s7 + $0x18] sm:$0xf0] }
 0x356   :  { %5103 = vst [vmem:[#allocation3 + $0xe8] sm:$0xff] %v4950_v1   ;;  %2994 = vmatmul.bf16.gmra.mxu0 %v4266_v35  ;;  %v4677_v15 = vld [vmem:[#allocation3 + $0xc0] sm:$0xff]  ;;  %v4254_v40 = vor.u32 %v4638_v9, %v4253_v8  ;;  %v4315_v29 = vld [vmem:[%s7127_s7 + $0x94] sm:$0xf0] }
 0x357   :  { %v4681_v35 = vld [vmem:[#allocation3] sm:$0xff] }
 0x358   :  { %v4649_v8 = vld [vmem:[%s7127_s7 + $0x70] sm:$0xf0] }
 0x35a   :  { %v2139_v44 = vpop.f32.mrf.mxu3 }
 0x35b   :  { %v2400_v48 = vpop.f32.mrf.mxu2 }
 0x35c   :  { %v2228_v51 = vpop.f32.mrf.mxu0  ;;  %v4673_v0 = vld [vmem:[#allocation3 + $0x30] sm:$0xff] }
 0x35d   :  { %v4915_v52 = vpack.c.bf16 %v2228_v51, %v2226_v16  ;;  %v2315_v55 = vpop.f32.mrf.mxu1  ;;  %3023 = vmatmul.bf16.gmra.mxu1 %v4270_v47  ;;  %v4685_v21 = vld [vmem:[#allocation3 + $0xe8] sm:$0xff]  ;;  %v4671_v16 = vld [vmem:[#allocation3 + $0xe0] sm:$0xff]  ;;  %v4255_v47 = vld [vmem:[%s7127_s7 + $0x1c] sm:$0xf0] }
 0x35e   :  { %v4935_v56 = vpack.c.bf16 %v2315_v55, %v2313_v39  ;;  %v4273_v55 = vld [vmem:[%s7127_s7 + $0x30] sm:$0xf] }
 0x35f   :  { %5096 = vst [vmem:[#allocation3 + $0x78] sm:$0xff] %v4915_v52  }
 0x360   :  { %5100 = vst [vmem:[#allocation3 + $0xb8] sm:$0xff] %v4935_v56   ;;  %v4643_v56 = vld [vmem:[%s7127_s7 + $0x40] sm:$0xf0] }
 0x362   :  { %v2141_v60 = vpop.f32.mrf.mxu3 }
 0x363   :  { %v4895_v63 = vpack.c.bf16 %v2141_v60, %v2139_v44  ;;  %v2402_v2 = vpop.f32.mrf.mxu2  ;;  %v4636_v44 = vld [vmem:[%s7127_s7 + $0xc] sm:$0xf]  ;;  %v4274_v60 = vor.u32 %v4643_v56, %v4273_v55 }
 0x364   :  { %v4955_v10 = vpack.c.bf16 %v2402_v2, %v2400_v48  ;;  %v4679_v48 = vld [vmem:[#allocation3 + $0x68] sm:$0xff]  ;;  %v4258_v52 = vor.u32 %v4636_v44, %v4255_v47  ;;  %v4275_v2 = vld [vmem:[%s7127_s7 + $0x44] sm:$0xf0]  ;;  %v6917_v44 = vld [vmem:[%s7128_s9] ss:$0 sm:$0xff] }
 0x365   :  { %5092 = vst [vmem:[#allocation3 + $0x100] sm:$0xff] %v4895_v63   ;;  %v4641_v63 = vld [vmem:[%s7127_s7 + $0x34] sm:$0xf]  ;;  %v6922_v47 = vld [vmem:[%s7128_s9 + $0x1] ss:$0 sm:$0xff]  ;;  %vm3154_vm7 = vcmp.eq.s32.totalorder %v5307_v33, %v6917_v44  ;;  %vm3155_vm10 = vcmp.eq.s32.totalorder %v5310_v34, %v6917_v44  ;;  %vm3152_vm14 = vcmp.eq.s32.totalorder %v5318_v36, %v6917_v44  ;;  %vm3153_vm1 = vcmp.eq.s32.totalorder %v5321_v37, %v6917_v44 }
 0x366   :  { %5104 = vst [vmem:[#allocation3 + $0xd0] sm:$0xff] %v4955_v10   ;;  %v4678_v11 = vld [vmem:[#allocation3 + $0x78] sm:$0xff]  ;;  %2999 = vmatmul.bf16.gmra.mxu0 %v4286_v3  ;;  %v4278_v10 = vor.u32 %v4641_v63, %v4275_v2  ;;  %vm3241_vm6 = vcmp.eq.s32.totalorder %v5307_v33, %v6922_v47  ;;  %vm3242_vm8 = vcmp.eq.s32.totalorder %v5310_v34, %v6922_v47  ;;  %vm4471_vm13 = vmpackc.low %vm3155_vm10, %vm3154_vm7 }
 0x367   :  { %3039 = vmatpush.bf16.msra.mxu2 %v4678_v11  ;;  %v4682_v5 = vld [vmem:[#allocation3 + $0xb8] sm:$0xff]  ;;  %v4293_v11 = vld [vmem:[%s7127_s7 + $0x58] sm:$0xf]  ;;  %4472 = vmatpush.bf16.msk.msrb.mxu1 %vm4471_vm13, %v5152_v38  ;;  %vm4487_vm15 = vmpackc.low %vm3242_vm8, %vm3241_vm6  ;;  %vm3239_vm3 = vcmp.eq.s32.totalorder %v5318_v36, %v6922_v47  ;;  %vm3240_vm4 = vcmp.eq.s32.totalorder %v5321_v37, %v6922_v47 }
 0x368   :  { %vm4473_vm6 = vmpackc.low %vm3153_vm1, %vm3152_vm14  ;;  %vm3237_vm14 = vcmp.eq.s32.totalorder %v5357_v41, %v6922_v47  ;;  %vm3238_vm1 = vcmp.eq.s32.totalorder %v5360_v42, %v6922_v47 }
 0x36a   :  { %v2472_v14 = vpop.f32.mrf.mxu3 }
 0x36b   :  { %3040 = vmatpush.bf16.msra.mxu2 %v4677_v15  ;;  %v4294_v15 = vor.u32 %v4648_v12, %v4293_v11  ;;  %4474 = vmatpush.bf16.msk.msrb.mxu1 %vm4473_vm6, %v5152_v38  ;;  %vm3148_vm6 = vcmp.eq.s32.totalorder %v5374_v45, %v6917_v44 }
 0x36c   :  { %v4674_v28 = vld [vmem:[#allocation3 + $0x100] sm:$0xff] }
 0x36d   :  { %v4686_v62 = vld [vmem:[#allocation3 + $0xd0] sm:$0xff]  ;;  %3028 = vmatmul.bf16.gmra.mxu1 %v4290_v17  ;;  %v4646_v17 = vld [vmem:[%s7127_s7 + $0x5c] sm:$0xf] }
 0x36e   :  { %3068 = vmatpush.bf16.msrb.mxu3 %v4686_v62  ;;  %v4295_v62 = vld [vmem:[%s7127_s7 + $0x6c] sm:$0xf0] }
 0x36f   :  { %3041 = vmatpush.bf16.msra.mxu2 %v4676_v18  ;;  %v4298_v18 = vor.u32 %v4646_v17, %v4295_v62 }
 0x372   :  { %v2474_v22 = vpop.f32.mrf.mxu3  ;;  %3069 = vmatpush.bf16.msrb.mxu3 %v4685_v21  ;;  %v4313_v21 = vld [vmem:[%s7127_s7 + $0x80] sm:$0xf] }
 0x373   :  { %v4960_v25 = vpack.c.bf16 %v2474_v22, %v2472_v14  ;;  %3042 = vmatpush.bf16.msra.mxu2 %v4675_v24  ;;  %v4653_v22 = vld [vmem:[%s7127_s7 + $0x90] sm:$0xf0] }
 0x374   :  { %v4314_v24 = vor.u32 %v4653_v22, %v4313_v21 }
 0x375   :  { %5105 = vst [vmem:[#allocation3 + $0xa0] sm:$0xff] %v4960_v25  }
 0x376   :  { %3070 = vmatpush.bf16.msrb.mxu3 %v4684_v27  ;;  %3004 = vmatmul.bf16.gmra.mxu0 %v4306_v26  ;;  %v4261_v26 = vld [vmem:[%s7127_s7 + $0x10] sm:$0xf]  ;;  %v4639_v27 = vld [vmem:[%s7127_s7 + $0x20] sm:$0xf0] }
 0x377   :  { %3043 = vmatpush.bf16.msra.mxu2 %v4674_v28  ;;  %v4651_v28 = vld [vmem:[%s7127_s7 + $0x84] sm:$0xf] }
 0x37a   :  { %v2477_v32 = vpop.f32.mrf.mxu3  ;;  %3071 = vmatpush.bf16.msrb.mxu3 %v4683_v23  ;;  %v4262_v23 = vor.u32 %v4639_v27, %v4261_v26 }
 0x37b   :  { %3044 = vmatpush.bf16.msra.mxu2 %v4673_v0  ;;  %v4281_v0 = vld [vmem:[%s7127_s7 + $0x38] sm:$0xf] }
 0x37c   :  { %v4687_v31 = vld [vmem:[#allocation3 + $0xa0] sm:$0xff] }
 0x37d   :  { %3033 = vmatmul.bf16.gmra.mxu1 %v4310_v4  ;;  %v4644_v4 = vld [vmem:[%s7127_s7 + $0x48] sm:$0xf0] }
 0x37e   :  { %3072 = vmatpush.bf16.msrb.mxu3 %v4682_v5  ;;  %v4282_v5 = vor.u32 %v4644_v4, %v4281_v0 }
 0x37f   :  { %3045 = vmatpush.bf16.msra.mxu2 %v4672_v6  ;;  %v4301_v6 = vld [vmem:[%s7127_s7 + $0x60] sm:$0xf] }
 0x380   :  { %v4302_v9 = vor.u32 %v4649_v8, %v4301_v6 }
 0x382   :  { %v2479_v1 = vpop.f32.mrf.mxu3  ;;  %3073 = vmatpush.bf16.msrb.mxu3 %v4681_v35  ;;  %v4321_v35 = vld [vmem:[%s7127_s7 + $0x88] sm:$0xf] }
 0x383   :  { %v4965_v39 = vpack.c.bf16 %v2479_v1, %v2477_v32  ;;  %3046 = vmatpush.bf16.msra.mxu2 %v4671_v16  ;;  %v4318_v32 = vor.u32 %v4651_v28, %v4315_v29  ;;  %v4654_v1 = vld [vmem:[%s7127_s7 + $0x98] sm:$0xf0] }
 0x384   :  { %v4322_v16 = vor.u32 %v4654_v1, %v4321_v35 }
 0x385   :  { %5106 = vst [vmem:[#allocation3 + $0x50] sm:$0xff] %v4965_v39  }
 0x386   :  { %3074 = vmatpush.bf16.msrb.mxu3 %v4680_v43  ;;  %3047 = vmatmul.bf16.vlgmr.msra.gmra.mxu2 %v4254_v40 }
 0x387   :  { %4488 = vmatpush.bf16.msk.msrb.mxu2 %vm4487_vm15, %v5152_v38  ;;  %vm3151_vm15 = vcmp.eq.s32.totalorder %v5360_v42, %v6917_v44 }
 0x38a   :  { %v2482_v51 = vpop.f32.mrf.mxu3  ;;  %3075 = vmatpush.bf16.msrb.mxu3 %v4679_v48  ;;  %v6927_v48 = vld [vmem:[%s7128_s9 + $0x2] ss:$0 sm:$0xff] }
 0x38b   :  { %vm3328_vm9 = vcmp.eq.s32.totalorder %v5307_v33, %v6927_v48  ;;  %vm3329_vm11 = vcmp.eq.s32.totalorder %v5310_v34, %v6927_v48  ;;  %vm3326_vm7 = vcmp.eq.s32.totalorder %v5318_v36, %v6927_v48  ;;  %vm3327_vm10 = vcmp.eq.s32.totalorder %v5321_v37, %v6927_v48 }
 0x38c   :  { %v4688_v25 = vld [vmem:[#allocation3 + $0x50] sm:$0xff]  ;;  %vm4503_vm2 = vmpackc.low %vm3329_vm11, %vm3328_vm9 }
 0x38d   :  { %3076 = vmatmul.bf16.vlgmr.msrb.gmra.mxu3 %v4258_v52  ;;  %vm4489_vm9 = vmpackc.low %vm3240_vm4, %vm3239_vm3  ;;  %vm3324_vm3 = vcmp.eq.s32.totalorder %v5357_v41, %v6927_v48  ;;  %vm3325_vm4 = vcmp.eq.s32.totalorder %v5360_v42, %v6927_v48 }
 0x38e   :  { %4504 = vmatpush.bf16.msk.msra.mxu3 %vm4503_vm2, %v5152_v38  ;;  %4490 = vmatpush.bf16.msk.msrb.mxu2 %vm4489_vm9, %v5152_v38  ;;  %vm4505_vm11 = vmpackc.low %vm3327_vm10, %vm3326_vm7  ;;  %vm3235_vm9 = vcmp.eq.s32.totalorder %v5374_v45, %v6922_v47 }
 0x38f   :  { %vm4491_vm7 = vmpackc.low %vm3238_vm1, %vm3237_vm14 }
 0x392   :  { %v2484_v59 = vpop.f32.mrf.mxu3  ;;  %4506 = vmatpush.bf16.msk.msra.mxu3 %vm4505_vm11, %v5152_v38  ;;  %4492 = vmatpush.bf16.msk.msrb.mxu2 %vm4491_vm7, %v5152_v38  ;;  %vm3236_vm11 = vcmp.eq.s32.totalorder %v5377_v46, %v6922_v47  ;;  %vm3146_vm7 = vcmp.eq.s32.totalorder %v5426_v49, %v6917_v44 }
 0x393   :  { %v4970_v7 = vpack.c.bf16 %v2484_v59, %v2482_v51  ;;  %v6932_v51 = vld [vmem:[%s7128_s9 + $0x3] ss:$0 sm:$0xff] }
 0x394   :  { %vm3415_vm0 = vcmp.eq.s32.totalorder %v5307_v33, %v6932_v51  ;;  %vm3416_vm12 = vcmp.eq.s32.totalorder %v5310_v34, %v6932_v51  ;;  %vm3413_vm8 = vcmp.eq.s32.totalorder %v5318_v36, %v6932_v51  ;;  %vm3414_vm13 = vcmp.eq.s32.totalorder %v5321_v37, %v6932_v51 }
 0x395   :  { %5107 = vst [vmem:[#allocation3 + $0x90] sm:$0xff] %v4970_v7   ;;  %vm3412_vm10 = vcmp.eq.s32.totalorder %v5360_v42, %v6932_v51  ;;  %vm3409_vm1 = vcmp.eq.s32.totalorder %v5374_v45, %v6932_v51 }
 0x396   :  { %3052 = vmatmul.bf16.gmra.mxu2 %v4274_v60 }
 0x39a   :  { %v2487_v3 = vpop.f32.mrf.mxu3 }
 0x39c   :  { %v4689_v20 = vld [vmem:[#allocation3 + $0x90] sm:$0xff] }
 0x39d   :  { %3081 = vmatmul.bf16.gmra.mxu3 %v4278_v10 }
 0x3a2   :  { %v2489_v13 = vpop.f32.mrf.mxu3 }
 0x3a3   :  { %v4975_v14 = vpack.c.bf16 %v2489_v13, %v2487_v3 }
 0x3a5   :  { %5108 = vst [vmem:[#allocation3 + $0xf8] sm:$0xff] %v4975_v14  }
 0x3a6   :  { %3057 = vmatmul.bf16.gmra.mxu2 %v4294_v15 }
 0x3ac   :  { %v4690_v19 = vld [vmem:[#allocation3 + $0xf8] sm:$0xff] }
 0x3ad   :  { %3086 = vmatmul.bf16.gmra.mxu3 %v4298_v18  ;;  %3101 = vmatpush.bf16.msra.mxu0 %v4690_v19  ;;  %v2625_v18 = vpop.permute.xlu2 %2624 }
 0x3b1   :  { %3102 = vmatpush.bf16.msra.mxu0 %v4689_v20 }
 0x3b5   :  { %3103 = vmatpush.bf16.msra.mxu0 %v4688_v25 }
 0x3b6   :  { %3062 = vmatmul.bf16.gmra.mxu2 %v4314_v24 }
 0x3b9   :  { %3104 = vmatpush.bf16.msra.mxu0 %v4687_v31 }
 0x3bc   :  { %4467 = vmatmul.msk.bf16.vlgmr.msra.gmra.mxu0 %vm2968_vm5, %v4262_v23 }
 0x3bd   :  { %3091 = vmatmul.bf16.gmra.mxu3 %v4318_v32 }
 0x3c3   :  { %v6908_v39 = vpop.f32.mrf.mxu0 }
 0x3ca   :  { %v3019_v36 = vpop.f32.mrf.mxu1 }
 0x3cb   :  { %v6910_v40 = vpop.f32.mrf.mxu0 }
 0x3cc   :  { %4468 = vmatmul.msk.bf16.gmra.mxu0 %vm2968_vm5, %v4282_v5 }
 0x3d3   :  { %v6912_v43 = vpop.f32.mrf.mxu0 }
 0x3d4   :  { %v2996_v19 = vadd.f32 %v6912_v43, %v2625_v18 }
 0x3db   :  { %v6942_v52 = vpop.f32.mrf.mxu0 }
 0x3dc   :  { %4469 = vmatmul.msk.bf16.gmra.mxu0 %vm2968_vm5, %v4302_v9 }
 0x3e3   :  { %v6997_v33 = vpop.f32.mrf.mxu0 }
 0x3eb   :  { %v7045_v34 = vpop.f32.mrf.mxu0 }
 0x3ec   :  { %4470 = vmatmul.msk.bf16.gmra.mxu0 %vm2968_vm5, %v4322_v16  ;;  %vm4519_vm5 = vmpackc.low %vm3416_vm12, %vm3415_vm0  ;;  %vm3150_vm12 = vcmp.eq.s32.totalorder %v5357_v41, %v6917_v44 }
 0x3ed   :  { %4520 = vmatpush.bf16.msk.msrb.mxu0 %vm4519_vm5, %v5152_v38  ;;  %vm4521_vm0 = vmpackc.low %vm3414_vm13, %vm3413_vm8  ;;  %vm3411_vm5 = vcmp.eq.s32.totalorder %v5357_v41, %v6932_v51  ;;  %vm3149_vm8 = vcmp.eq.s32.totalorder %v5377_v46, %v6917_v44 }
 0x3ee   :  { %vm4475_vm2 = vmpackc.low %vm3151_vm15, %vm3150_vm12  ;;  %vm3322_vm12 = vcmp.eq.s32.totalorder %v5374_v45, %v6927_v48  ;;  %vm3323_vm15 = vcmp.eq.s32.totalorder %v5377_v46, %v6927_v48  ;;  %v3021_v45 = vpop.f32.mrf.mxu1 }
 0x3ef   :  { %4476 = vmatpush.bf16.msk.msrb.mxu1 %vm4475_vm2, %v5152_v38  ;;  %vm4507_vm13 = vmpackc.low %vm3325_vm4, %vm3324_vm3  ;;  %vm3410_vm2 = vcmp.eq.s32.totalorder %v5377_v46, %v6932_v51 }
 0x3f0   :  { %4508 = vmatpush.bf16.msk.msra.mxu3 %vm4507_vm13, %v5152_v38  ;;  %vm4477_vm14 = vmpackc.low %vm3149_vm8, %vm3148_vm6  ;;  %vm3233_vm6 = vcmp.eq.s32.totalorder %v5426_v49, %v6922_v47  ;;  %vm3234_vm8 = vcmp.eq.s32.totalorder %v5429_v50, %v6922_v47 }
 0x3f1   :  { %4522 = vmatpush.bf16.msk.msrb.mxu0 %vm4521_vm0, %v5152_v38  ;;  %vm4523_vm0 = vmpackc.low %vm3412_vm10, %vm3411_vm5  ;;  %vm3147_vm10 = vcmp.eq.s32.totalorder %v5429_v50, %v6917_v44 }
 0x3f2   :  { %vm4493_vm3 = vmpackc.low %vm3236_vm11, %vm3235_vm9  ;;  %vm3320_vm9 = vcmp.eq.s32.totalorder %v5426_v49, %v6927_v48  ;;  %vm3321_vm11 = vcmp.eq.s32.totalorder %v5429_v50, %v6927_v48 }
 0x3f3   :  { %4478 = vmatpush.bf16.msk.msrb.mxu1 %vm4477_vm14, %v5152_v38  ;;  %4494 = vmatpush.bf16.msk.msrb.mxu2 %vm4493_vm3, %v5152_v38  ;;  %vm4509_vm4 = vmpackc.low %vm3323_vm15, %vm3322_vm12  ;;  %vm3408_vm15 = vcmp.eq.s32.totalorder %v5429_v50, %v6932_v51  ;;  %vm3145_vm3 = vcmp.eq.s32.totalorder %v5459_v54, %v6917_v44  ;;  %v7097_v41 = vpop.f32.mrf.mxu0  ;;  %v2615_v50 = vpop.permute.xlu0 %2614 }
 0x3f4   :  { %4510 = vmatpush.bf16.msk.msra.mxu3 %vm4509_vm4, %v5152_v38  ;;  %vm4525_vm5 = vmpackc.low %vm3410_vm2, %vm3409_vm1  ;;  %vm3144_vm2 = vcmp.eq.s32.totalorder %v5456_v53, %v6917_v44  ;;  %vm3231_vm4 = vcmp.eq.s32.totalorder %v5456_v53, %v6922_v47 }
 0x3f5   :  { %4524 = vmatpush.bf16.msk.msrb.mxu0 %vm4523_vm0, %v5152_v38  ;;  %vm4479_vm13 = vmpackc.low %vm3147_vm10, %vm3146_vm7  ;;  %vm3407_vm0 = vcmp.eq.s32.totalorder %v5426_v49, %v6932_v51  ;;  %vm3318_vm10 = vcmp.eq.s32.totalorder %v5456_v53, %v6927_v48 }
 0x3f6   :  { %vm4495_vm12 = vmpackc.low %vm3234_vm8, %vm3233_vm6  ;;  %vm3319_vm6 = vcmp.eq.s32.totalorder %v5459_v54, %v6927_v48  ;;  %vm3405_vm8 = vcmp.eq.s32.totalorder %v5456_v53, %v6932_v51  ;;  %v3024_v53 = vpop.f32.mrf.mxu1 }
 0x3f7   :  { %4480 = vmatpush.bf16.msk.msrb.mxu1 %vm4479_vm13, %v5152_v38  ;;  %4496 = vmatpush.bf16.msk.msrb.mxu2 %vm4495_vm12, %v5152_v38  ;;  %vm4511_vm14 = vmpackc.low %vm3321_vm11, %vm3320_vm9  ;;  %vm3406_vm13 = vcmp.eq.s32.totalorder %v5459_v54, %v6932_v51  ;;  %vm3142_vm12 = vcmp.eq.s32.totalorder %v5486_v57, %v6917_v44  ;;  %v3025_v22 = vadd.f32 %v3024_v53, %v2996_v19 }
 0x3f8   :  { %4512 = vmatpush.bf16.msk.msra.mxu3 %vm4511_vm14, %v5152_v38  ;;  %vm4527_vm1 = vmpackc.low %vm3408_vm15, %vm3407_vm0  ;;  %vm3143_vm15 = vcmp.eq.s32.totalorder %v5489_v58, %v6917_v44  ;;  %vm3229_vm14 = vcmp.eq.s32.totalorder %v5486_v57, %v6922_v47 }
 0x3f9   :  { %4526 = vmatpush.bf16.msk.msrb.mxu0 %vm4525_vm5, %v5152_v38  ;;  %vm3232_vm5 = vcmp.eq.s32.totalorder %v5459_v54, %v6922_v47  ;;  %vm4481_vm7 = vmpackc.low %vm3145_vm3, %vm3144_vm2  ;;  %vm3316_vm3 = vcmp.eq.s32.totalorder %v5486_v57, %v6927_v48  ;;  %v2620_v54 = vpop.permute.xlu1 %2619 }
 0x3fa   :  { %vm4497_vm9 = vmpackc.low %vm3232_vm5, %vm3231_vm4  ;;  %vm3317_vm4 = vcmp.eq.s32.totalorder %v5489_v58, %v6927_v48  ;;  %vm3403_vm5 = vcmp.eq.s32.totalorder %v5486_v57, %v6932_v51  ;;  %v2991_v57 = vadd.f32 %v6908_v39, %v2615_v50  ;;  %v2993_v56 = vadd.f32 %v6910_v40, %v2620_v54  ;;  %v2640_v39 = vpop.permute.xlu2 %2639 }
 0x3fb   :  { %4482 = vmatpush.bf16.msk.msrb.mxu1 %vm4481_vm7, %v5152_v38  ;;  %4498 = vmatpush.bf16.msk.msrb.mxu2 %vm4497_vm9, %v5152_v38  ;;  %vm4513_vm11 = vmpackc.low %vm3319_vm6, %vm3318_vm10  ;;  %vm3404_vm10 = vcmp.eq.s32.totalorder %v5489_v58, %v6932_v51  ;;  %vm3141_vm9 = vcmp.eq.s32.totalorder %v5518_v61, %v6917_v44  ;;  %v2630_v20 = vpop.permute.xlu0 %2629 }
 0x3fc   :  { %4514 = vmatpush.bf16.msk.msra.mxu3 %vm4513_vm11, %v5152_v38  ;;  %vm4529_vm0 = vmpackc.low %vm3406_vm13, %vm3405_vm8  ;;  %vm3140_vm13 = vcmp.eq.s32.totalorder %v5294_v30, %v6917_v44  ;;  %vm3227_vm11 = vcmp.eq.s32.totalorder %v5294_v30, %v6922_v47  ;;  %v3020_v55 = vadd.f32 %v3019_v36, %v2991_v57  ;;  %v3022_v7 = vadd.f32 %v3021_v45, %v2993_v56 }
 0x3fd   :  { %4528 = vmatpush.bf16.msk.msrb.mxu0 %vm4527_vm1, %v5152_v38  ;;  %vm3230_vm1 = vcmp.eq.s32.totalorder %v5489_v58, %v6922_v47  ;;  %vm4483_vm2 = vmpackc.low %vm3143_vm15, %vm3142_vm12  ;;  %vm3314_vm15 = vcmp.eq.s32.totalorder %v5294_v30, %v6927_v48  ;;  %v2998_v24 = vadd.f32 %v6942_v52, %v2630_v20 }
 0x3fe   :  { %vm4499_vm7 = vmpackc.low %vm3230_vm1, %vm3229_vm14  ;;  %vm3315_vm14 = vcmp.eq.s32.totalorder %v5518_v61, %v6927_v48  ;;  %vm3401_vm1 = vcmp.eq.s32.totalorder %v5294_v30, %v6932_v51  ;;  %v7102_v30 = vpop.f32.mrf.mxu0  ;;  %v3026_v10 = vpop.f32.mrf.mxu1  ;;  %v3003_v48 = vadd.f32 %v7045_v34, %v2640_v39 }
 0x3ff   :  { %4484 = vmatpush.bf16.msk.msrb.mxu1 %vm4483_vm2, %v5152_v38  ;;  %4500 = vmatpush.bf16.msk.msrb.mxu2 %vm4499_vm7, %v5152_v38  ;;  %vm4515_vm6 = vmpackc.low %vm3317_vm4, %vm3316_vm3  ;;  %vm3402_vm2 = vcmp.eq.s32.totalorder %v5518_v61, %v6932_v51  ;;  %v3027_v26 = vadd.f32 %v3026_v10, %v2998_v24 }
 0x400   :  { %4516 = vmatpush.bf16.msk.msra.mxu3 %vm4515_vm6, %v5152_v38  ;;  %vm4531_vm8 = vmpackc.low %vm3404_vm10, %vm3403_vm5 }
 0x401   :  { %4530 = vmatpush.bf16.msk.msrb.mxu0 %vm4529_vm0, %v5152_v38  ;;  %vm3228_vm0 = vcmp.eq.s32.totalorder %v5518_v61, %v6922_v47  ;;  %vm4485_vm12 = vmpackc.low %vm3141_vm9, %vm3140_vm13  ;;  %v2635_v1 = vpop.permute.xlu1 %2634 }
 0x402   :  { %vm4501_vm3 = vmpackc.low %vm3228_vm0, %vm3227_vm11  ;;  %v3001_v40 = vadd.f32 %v6997_v33, %v2635_v1 }
 0x403   :  { %4486 = vmatpush.bf16.msk.msrb.mxu1 %vm4485_vm12, %v5152_v38  ;;  %4502 = vmatpush.bf16.msk.msrb.mxu2 %vm4501_vm3, %v5152_v38  ;;  %vm4517_vm4 = vmpackc.low %vm3315_vm14, %vm3314_vm15 }
 0x404   :  { %4518 = vmatpush.bf16.msk.msra.mxu3 %vm4517_vm4, %v5152_v38  ;;  %vm4533_vm5 = vmpackc.low %vm3402_vm2, %vm3401_vm1 }
 0x405   :  { %4532 = vmatpush.bf16.msk.msrb.mxu0 %vm4531_vm8, %v5152_v38 }
 0x406   :  { %v3029_v25 = vpop.f32.mrf.mxu1 }
 0x407   :  { %v3030_v47 = vadd.f32 %v3029_v25, %v3001_v40 }
 0x409   :  { %v3048_v37 = vpop.f32.mrf.mxu2  ;;  %4534 = vmatpush.bf16.msk.msrb.mxu0 %vm4533_vm5, %v5152_v38 }
 0x40a   :  { %v3049_v60 = vadd.f32 %v3048_v37, %v3020_v55  ;;  %v2650_v55 = vpop.permute.xlu1 %2649 }
 0x40e   :  { %v3031_v9 = vpop.f32.mrf.mxu1 }
 0x40f   :  { %v3032_v51 = vadd.f32 %v3031_v9, %v3003_v48 }
 0x410   :  { %v3077_v42 = vpop.f32.mrf.mxu3 }
 0x411   :  { %v3050_v46 = vpop.f32.mrf.mxu2  ;;  %v3078_v63 = vadd.f32 %v3077_v42, %v3049_v60  ;;  %v3008_v60 = vadd.f32 %v7102_v30, %v2650_v55 }
 0x412   :  { %v3051_v38 = vadd.f32 %v3050_v46, %v3022_v7 }
 0x416   :  { %v3034_v42 = vpop.f32.mrf.mxu1 }
 0x418   :  { %v3079_v49 = vpop.f32.mrf.mxu3 }
 0x419   :  { %v3053_v58 = vpop.f32.mrf.mxu2  ;;  %v3080_v2 = vadd.f32 %v3079_v49, %v3051_v38 }
 0x41a   :  { %v3054_v27 = vadd.f32 %v3053_v58, %v3025_v22 }
 0x41e   :  { %v3036_v34 = vpop.f32.mrf.mxu1 }
 0x41f   :  { %v3037_v38 = vadd.f32 %v3036_v34, %v3008_v60 }
 0x420   :  { %v3082_v59 = vpop.f32.mrf.mxu3 }
 0x421   :  { %v3055_v13 = vpop.f32.mrf.mxu2  ;;  %v3083_v29 = vadd.f32 %v3082_v59, %v3054_v27 }
 0x422   :  { %v3056_v31 = vadd.f32 %v3055_v13, %v3027_v26 }
 0x428   :  { %v3084_v17 = vpop.f32.mrf.mxu3 }
 0x429   :  { %v3058_v28 = vpop.f32.mrf.mxu2  ;;  %v3085_v32 = vadd.f32 %v3084_v17, %v3056_v31 }
 0x42a   :  { %v3059_v52 = vadd.f32 %v3058_v28, %v3030_v47 }
 0x430   :  { %v3087_v23 = vpop.f32.mrf.mxu3 }
 0x431   :  { %v3060_v16 = vpop.f32.mrf.mxu2  ;;  %v3088_v36 = vadd.f32 %v3087_v23, %v3059_v52 }
 0x432   :  { %v3061_v37 = vadd.f32 %v3060_v16, %v3032_v51 }
 0x438   :  { %v3089_v43 = vpop.f32.mrf.mxu3 }
 0x439   :  { %v3106_v61 = vpop.f32.mrf.mxu0  ;;  %v3090_v45 = vadd.f32 %v3089_v43, %v3061_v37  ;;  %v3063_v49 = vpop.f32.mrf.mxu2 }
 0x43a   :  { %v3107_v3 = vadd.f32 %v3106_v61, %v3078_v63  ;;  %v2645_v61 = vpop.permute.xlu0 %2644 }
 0x43b   :  { %v3006_v56 = vadd.f32 %v7097_v41, %v2645_v61 }
 0x43c   :  { %v3126_v14 = vmax.f32 %v3107_v3, 0.0 }
 0x43d   :  { %v3035_v7 = vadd.f32 %v3034_v42, %v3006_v56 }
 0x440   :  { %v3092_v33 = vpop.f32.mrf.mxu3 }
 0x441   :  { %v3108_v11 = vpop.f32.mrf.mxu0  ;;  %v3065_v63 = vpop.f32.mrf.mxu2 }
 0x442   :  { %v3109_v12 = vadd.f32 %v3108_v11, %v3080_v2  ;;  %v3064_v2 = vadd.f32 %v3063_v49, %v3035_v7  ;;  %v3066_v11 = vadd.f32 %v3065_v63, %v3037_v38 }
 0x444   :  { %v3127_v15 = vmax.f32 %v3109_v12, 0.0  ;;  %v3093_v10 = vadd.f32 %v3092_v33, %v3064_v2 }
 0x446   :  { %v3134_v62 = vpack.c.bf16 %v3127_v15, %v3126_v14 }
 0x448   :  { %3188 = vmatmul.bf16.vlgmr.msrb.gmra.mxu1 %v3134_v62  ;;  %3275 = vmatmul.bf16.vlgmr.msrb.gmra.mxu2 %v3134_v62  ;;  %v3094_v3 = vpop.f32.mrf.mxu3 }
 0x449   :  { %3362 = vmatmul.bf16.vlgmr.msra.gmra.mxu3 %v3134_v62  ;;  %3449 = vmatmul.bf16.vlgmr.msrb.gmra.mxu0 %v3134_v62  ;;  %v3111_v21 = vpop.f32.mrf.mxu0  ;;  %v3095_v12 = vadd.f32 %v3094_v3, %v3066_v11 }
 0x44a   :  { %v3112_v0 = vadd.f32 %v3111_v21, %v3083_v29 }
 0x44c   :  { %v3128_v6 = vmax.f32 %v3112_v0, 0.0 }
 0x451   :  { %v3113_v4 = vpop.f32.mrf.mxu0 }
 0x452   :  { %v3114_v5 = vadd.f32 %v3113_v4, %v3085_v32 }
 0x454   :  { %v3129_v8 = vmax.f32 %v3114_v5, 0.0 }
 0x456   :  { %v3135_v35 = vpack.c.bf16 %v3129_v8, %v3128_v6 }
 0x458   :  { %3193 = vmatmul.bf16.gmra.mxu1 %v3135_v35  ;;  %3280 = vmatmul.bf16.gmra.mxu2 %v3135_v35 }
 0x459   :  { %3367 = vmatmul.bf16.gmra.mxu3 %v3135_v35  ;;  %3454 = vmatmul.bf16.gmra.mxu0 %v3135_v35  ;;  %v3116_v44 = vpop.f32.mrf.mxu0 }
 0x45a   :  { %v3117_v46 = vadd.f32 %v3116_v44, %v3088_v36 }
 0x45c   :  { %v3130_v54 = vmax.f32 %v3117_v46, 0.0 }
 0x461   :  { %v3118_v50 = vpop.f32.mrf.mxu0 }
 0x462   :  { %v3119_v53 = vadd.f32 %v3118_v50, %v3090_v45 }
 0x464   :  { %v3131_v57 = vmax.f32 %v3119_v53, 0.0 }
 0x466   :  { %v3136_v58 = vpack.c.bf16 %v3131_v57, %v3130_v54 }
 0x468   :  { %3198 = vmatmul.bf16.gmra.mxu1 %v3136_v58  ;;  %3285 = vmatmul.bf16.gmra.mxu2 %v3136_v58 }
 0x469   :  { %3372 = vmatmul.bf16.gmra.mxu3 %v3136_v58  ;;  %3459 = vmatmul.bf16.gmra.mxu0 %v3136_v58  ;;  %v3121_v59 = vpop.f32.mrf.mxu0 }
 0x46a   :  { %v3122_v13 = vadd.f32 %v3121_v59, %v3093_v10 }
 0x46c   :  { %v3132_v41 = vmax.f32 %v3122_v13, 0.0 }
 0x471   :  { %v3123_v14 = vpop.f32.mrf.mxu0 }
 0x472   :  { %v3124_v15 = vadd.f32 %v3123_v14, %v3095_v12  ;;  %v3486_v14 = vld [vmem:[%s7129_s10] sm:$0xff] }
 0x474   :  { %v3133_v17 = vmax.f32 %v3124_v15, 0.0 }
 0x476   :  { %v3137_v62 = vpack.c.bf16 %v3133_v17, %v3132_v41  ;;  %v3527_v17 = vunpack.c.h.b16 %v3486_v14 }
 0x478   :  { %3203 = vmatmul.bf16.gmra.mxu1 %v3137_v62  ;;  %3290 = vmatmul.bf16.gmra.mxu2 %v3137_v62 }
 0x479   :  { %3377 = vmatmul.bf16.gmra.mxu3 %v3137_v62  ;;  %3464 = vmatmul.bf16.gmra.mxu0 %v3137_v62 }
 0x4c5   :  { %v3189_v18 = vpop.f32.mrf.mxu1 }
 0x4c6   :  { %v3450_v19 = vpop.f32.mrf.mxu0 }
 0x4cb   :  { %v3276_v30 = vpop.f32.mrf.mxu2 }
 0x4cc   :  { %v3363_v20 = vpop.f32.mrf.mxu3 }
 0x4cd   :  { %v3191_v21 = vpop.f32.mrf.mxu1 }
 0x4ce   :  { %v4980_v22 = vpack.c.bf16 %v3191_v21, %v3189_v18  ;;  %v3452_v24 = vpop.f32.mrf.mxu0 }
 0x4cf   :  { %v5040_v25 = vpack.c.bf16 %v3452_v24, %v3450_v19  ;;  %v3529_v19 = vpack.c.b16 %v3527_v17, %v3527_v17 }
 0x4d0   :  { %4981 = vst [vmem:[#allocation4 + $0x18] sm:$0xff] %v4980_v22   ;;  %v3523_v22 = vpop.permute.xlu2 %3522 }
 0x4d1   :  { %5120 = vst [vmem:[#allocation4 + $0x30] sm:$0xff] %v5040_v25  }
 0x4d3   :  { %v3278_v26 = vpop.f32.mrf.mxu2 }
 0x4d4   :  { %v5000_v27 = vpack.c.bf16 %v3278_v26, %v3276_v30  ;;  %v3365_v28 = vpop.f32.mrf.mxu3  ;;  %v3526_v30 = vunpack.c.l.b16 %v3486_v14 }
 0x4d5   :  { %v5020_v29 = vpack.c.bf16 %v3365_v28, %v3363_v20  ;;  %v3194_v31 = vpop.f32.mrf.mxu1 }
 0x4d6   :  { %5112 = vst [vmem:[#allocation4 + $0x8] sm:$0xff] %v5000_v27   ;;  %v3455_v23 = vpop.f32.mrf.mxu0  ;;  %v3528_v21 = vpack.c.b16 %v3526_v30, %v3526_v30 }
 0x4d7   :  { %5116 = vst [vmem:[#allocation4 + $0x28] sm:$0xff] %v5020_v29   ;;  %v4691_v20 = vld [vmem:[#allocation4 + $0x18] sm:$0xff] }
 0x4d8   :  { %v4703_v2 = vld [vmem:[#allocation4 + $0x30] sm:$0xff] }
 0x4db   :  { %v3281_v32 = vpop.f32.mrf.mxu2 }
 0x4dc   :  { %v3368_v0 = vpop.f32.mrf.mxu3 }
 0x4dd   :  { %v3196_v4 = vpop.f32.mrf.mxu1  ;;  %v4695_v11 = vld [vmem:[#allocation4 + $0x8] sm:$0xff] }
 0x4de   :  { %v4985_v5 = vpack.c.bf16 %v3196_v4, %v3194_v31  ;;  %v3457_v6 = vpop.f32.mrf.mxu0  ;;  %v4699_v62 = vld [vmem:[#allocation4 + $0x28] sm:$0xff] }
 0x4df   :  { %v5045_v8 = vpack.c.bf16 %v3457_v6, %v3455_v23 }
 0x4e0   :  { %5109 = vst [vmem:[#allocation4 + $0x10] sm:$0xff] %v4985_v5  }
 0x4e1   :  { %5121 = vst [vmem:[#allocation4 + $0x50] sm:$0xff] %v5045_v8  }
 0x4e3   :  { %v3283_v9 = vpop.f32.mrf.mxu2 }
 0x4e4   :  { %v5005_v35 = vpack.c.bf16 %v3283_v9, %v3281_v32  ;;  %v3370_v1 = vpop.f32.mrf.mxu3 }
 0x4e5   :  { %v5025_v16 = vpack.c.bf16 %v3370_v1, %v3368_v0  ;;  %v3199_v39 = vpop.f32.mrf.mxu1 }
 0x4e6   :  { %5113 = vst [vmem:[#allocation4 + $0x40] sm:$0xff] %v5005_v35   ;;  %v3460_v40 = vpop.f32.mrf.mxu0 }
 0x4e7   :  { %5117 = vst [vmem:[#allocation4] sm:$0xff] %v5025_v16   ;;  %v4692_v18 = vld [vmem:[#allocation4 + $0x10] sm:$0xff] }
 0x4e8   :  { %v4704_v63 = vld [vmem:[#allocation4 + $0x50] sm:$0xff] }
 0x4eb   :  { %v3286_v43 = vpop.f32.mrf.mxu2 }
 0x4ec   :  { %v3373_v44 = vpop.f32.mrf.mxu3 }
 0x4ed   :  { %v3201_v47 = vpop.f32.mrf.mxu1  ;;  %v4696_v3 = vld [vmem:[#allocation4 + $0x40] sm:$0xff] }
 0x4ee   :  { %v4990_v48 = vpack.c.bf16 %v3201_v47, %v3199_v39  ;;  %v3462_v51 = vpop.f32.mrf.mxu0  ;;  %v4700_v15 = vld [vmem:[#allocation4] sm:$0xff] }
 0x4ef   :  { %v5050_v52 = vpack.c.bf16 %v3462_v51, %v3460_v40 }
 0x4f0   :  { %5110 = vst [vmem:[#allocation4 + $0x48] sm:$0xff] %v4990_v48  }
 0x4f1   :  { %5122 = vst [vmem:[#allocation4 + $0x20] sm:$0xff] %v5050_v52  }
 0x4f3   :  { %v3288_v36 = vpop.f32.mrf.mxu2 }
 0x4f4   :  { %v5010_v37 = vpack.c.bf16 %v3288_v36, %v3286_v43  ;;  %v3375_v42 = vpop.f32.mrf.mxu3 }
 0x4f5   :  { %v5030_v45 = vpack.c.bf16 %v3375_v42, %v3373_v44  ;;  %v3204_v46 = vpop.f32.mrf.mxu1 }
 0x4f6   :  { %5114 = vst [vmem:[#allocation4 + $0x68] sm:$0xff] %v5010_v37   ;;  %v3465_v49 = vpop.f32.mrf.mxu0 }
 0x4f7   :  { %5118 = vst [vmem:[#allocation4 + $0x38] sm:$0xff] %v5030_v45   ;;  %v4693_v41 = vld [vmem:[#allocation4 + $0x48] sm:$0xff] }
 0x4f8   :  { %v4705_v7 = vld [vmem:[#allocation4 + $0x20] sm:$0xff] }
 0x4fb   :  { %v3291_v50 = vpop.f32.mrf.mxu2 }
 0x4fc   :  { %v3378_v53 = vpop.f32.mrf.mxu3 }
 0x4fd   :  { %v3206_v33 = vpop.f32.mrf.mxu1  ;;  %v4697_v38 = vld [vmem:[#allocation4 + $0x68] sm:$0xff] }
 0x4fe   :  { %v4995_v54 = vpack.c.bf16 %v3206_v33, %v3204_v46  ;;  %v3467_v57 = vpop.f32.mrf.mxu0  ;;  %v4701_v12 = vld [vmem:[#allocation4 + $0x38] sm:$0xff] }
 0x4ff   :  { %v5055_v58 = vpack.c.bf16 %v3467_v57, %v3465_v49 }
 0x500   :  { %5111 = vst [vmem:[#allocation4 + $0x70] sm:$0xff] %v4995_v54  }
 0x501   :  { %5123 = vst [vmem:[#allocation4 + $0x60] sm:$0xff] %v5055_v58  }
 0x503   :  { %v3293_v61 = vpop.f32.mrf.mxu2 }
 0x504   :  { %v5015_v55 = vpack.c.bf16 %v3293_v61, %v3291_v50  ;;  %v3380_v56 = vpop.f32.mrf.mxu3 }
 0x505   :  { %v5035_v34 = vpack.c.bf16 %v3380_v56, %v3378_v53 }
 0x506   :  { %5115 = vst [vmem:[#allocation4 + $0x58] sm:$0xff] %v5015_v55  }
 0x507   :  { %5119 = vst [vmem:[#allocation4 + $0x78] sm:$0xff] %v5035_v34   ;;  %v4694_v13 = vld [vmem:[#allocation4 + $0x70] sm:$0xff] }
 0x508   :  { %v4706_v59 = vld [vmem:[#allocation4 + $0x60] sm:$0xff] }
 0x509   :  { %3641 = vmatpush.bf16.msra.mxu2 %v4706_v59 }
 0x50d   :  { %v4698_v60 = vld [vmem:[#allocation4 + $0x58] sm:$0xff]  ;;  %3642 = vmatpush.bf16.msra.mxu2 %v4705_v7 }
 0x50e   :  { %3628 = vmatpush.bf16.msra.mxu1 %v4698_v60  ;;  %v4702_v10 = vld [vmem:[#allocation4 + $0x78] sm:$0xff] }
 0x511   :  { %3643 = vmatpush.bf16.msra.mxu2 %v4704_v63 }
 0x512   :  { %3629 = vmatpush.bf16.msra.mxu1 %v4697_v38 }
 0x515   :  { %3644 = vmatpush.bf16.msra.mxu2 %v4703_v2 }
 0x516   :  { %3630 = vmatpush.bf16.msra.mxu1 %v4696_v3 }
 0x519   :  { %3645 = vmatpush.bf16.msra.mxu2 %v4702_v10 }
 0x51a   :  { %3631 = vmatpush.bf16.msra.mxu1 %v4695_v11 }
 0x51d   :  { %3646 = vmatpush.bf16.msra.mxu2 %v4701_v12 }
 0x51e   :  { %3632 = vmatpush.bf16.msra.mxu1 %v4694_v13 }
 0x521   :  { %3647 = vmatpush.bf16.msra.mxu2 %v4700_v15 }
 0x522   :  { %3633 = vmatpush.bf16.msra.mxu1 %v4693_v41 }
 0x525   :  { %3648 = vmatpush.bf16.msra.mxu2 %v4699_v62 }
 0x526   :  { %3634 = vmatpush.bf16.msra.mxu1 %v4692_v18 }
 0x528   :  { %3649 = vmatmul.bf16.vlgmr.msra.gmra.mxu2 %v3529_v19 }
 0x52a   :  { %3635 = vmatpush.bf16.msra.mxu1 %v4691_v20 }
 0x52d   :  { %3636 = vmatmul.bf16.vlgmr.msra.gmra.mxu1 %v3528_v21 }
 0x5aa   :  { %v3637_v24 = vpop.f32.mrf.mxu1 }
 0x5ab   :  { %v3638_v25 = vadd.f32 %v3637_v24, %v3523_v22  ;;  %v3650_v26 = vpop.f32.mrf.mxu2 }
 0x5ad   :  { %v3651_v27 = vadd.f32 %v3650_v26, %v3638_v25 }
 0x5af   :  { %3654 = vst [vmem:[%s7130_s12] sm:$0xff] %v3651_v27 }
 0x5b2   :  { %v3639_v28 = vpop.f32.mrf.mxu1 }
 0x5b3   :  { %v3652_v29 = vpop.f32.mrf.mxu2 }

</bundles_post_ra>
